<compile_context>
chip_gen: v6e
topology: v6e:2x2x1
jax: 0.10.0
libtpu: 0.0.40
codegen_flags: <defaults>
</compile_context>

<pallas_src>
import functools

import jax
import jax.numpy as jnp
from jax import lax
from jax.experimental import pallas as pl
from jax.experimental.pallas import tpu as pltpu

BN_EPS = 1e-5


# ------------------------------ fused kernel --------------------------------

def _net2_kernel(x_ref,
                 b1a, p1a, b1b, p1b, b1c, p1c,
                 spool,
                 b2a, p2a, b2b, p2b,
                 b3a, p3a,
                 bhd, bhd_bias, shead,
                 o_ref, *, n):
    f32 = jnp.float32
    bf16 = jnp.bfloat16

    def conv3x3(x, w_ref, p_ref, rows_out):
        # x: (R, Win*Cin) f32
        # w_ref: (3, Win*Cin, Wo*Cout) bf16  -- kw taps already folded per row
        # p_ref: (3, Wo*Cout) f32 with rows = (bias, bn_scale, bn_shift)
        acc = None
        for di in range(3):
            lhs = x[di:di + rows_out, :].astype(bf16)
            part = jnp.dot(lhs, w_ref[di], preferred_element_type=f32)
            acc = part if acc is None else acc + part
        # PyTorch ordering: Conv -> ReLU -> BatchNorm (eval, folded)
        y = jnp.maximum(acc + p_ref[0:1, :], 0.0)
        return y * p_ref[1:2, :] + p_ref[2:3, :]

    x = x_ref[...]                                        # (28n, 28) f32

    # conv1 block: 28 -> 26 -> 24 -> 22
    y = conv3x3(x, b1a, p1a, 28 * n - 2)                  # (28n-2, 26*8)
    y = conv3x3(y, b1b, p1b, 28 * n - 4)                  # (28n-4, 24*8)
    y = conv3x3(y, b1c, p1c, 28 * n - 6)                  # (28n-6, 22*8)

    # MaxPool2d(2,2): 22x22 -> 11x11 (fused, VMEM resident)
    r = 28 * n - 7
    t = jnp.maximum(y[0:r, :], y[1:r + 1, :])             # pair-max over rows
    u = jnp.maximum(t[:, 0:21 * 8], t[:, 8:22 * 8])       # pair-max over width
    y = jnp.dot(spool[...], u, preferred_element_type=f32)  # (11n, 21*8)

    # conv2 block: 11 -> 9 -> 7 (width down-sample folded into b2a)
    y = conv3x3(y, b2a, p2a, 11 * n - 2)                  # (11n-2, 9*16)
    y = conv3x3(y, b2b, p2b, 11 * n - 4)                  # (11n-4, 7*16)

    # conv3: 1x1 conv + ReLU + BN
    z = jnp.dot(y.astype(bf16), b3a[...], preferred_element_type=f32)
    z = jnp.maximum(z + p3a[0:1, :], 0.0) * p3a[1:2, :] + p3a[2:3, :]  # (11n-4, 70)

    # 7x7 conv head (full contraction per image) + log_softmax
    acc = None
    for di in range(7):
        part = jnp.dot(z[di:di + 11 * n - 10, :].astype(bf16), bhd[di],
                       preferred_element_type=f32)
        acc = part if acc is None else acc + part         # (11n-10, 10)
    logits = jnp.dot(shead[...], acc, preferred_element_type=f32) + bhd_bias[...]
    m = jnp.max(logits, axis=-1, keepdims=True)
    s = logits - m
    lse = jnp.log(jnp.sum(jnp.exp(s), axis=-1, keepdims=True))
    o_ref[...] = s - lse                                  # (n, 10)


# -------------------------- weight / spec helpers ----------------------------

def _band_weights(w4, win_chunks, wo, *, chunk_stride=1, dtype=jnp.bfloat16):
    """Fold a (Cout,Cin,kh,kw) conv kernel into per-row-shift band matrices.

    Returns B of shape (kh, win_chunks*Cin, wo*Cout) where
      B[di, wi*Cin+ci, wo*Cout+co] = sum_{dj} w4[co,ci,di,dj] * [wi == s*(wo+dj)]
    so the conv becomes  sum_{di}  A[di:di+rows_out, :] @ B[di]
    (the kw taps share the same row-shifted lhs, so they are pre-summed here).
    """
    cout, cin, kh, kw = w4.shape
    km = jnp.transpose(w4, (2, 3, 1, 0))                  # (kh, kw, Cin, Cout)
    dj = jnp.arange(kw)
    wi = jnp.arange(win_chunks)
    woi = jnp.arange(wo)
    mask = (wi[None, :, None] ==
            chunk_stride * (woi[None, None, :] + dj[:, None, None])
            ).astype(w4.dtype)                            # (kw, Win, Wo)
    b = jnp.einsum('jwv,hjio->hwivo', mask, km)           # (kh, Win, Cin, Wo, Cout)
    return b.reshape(kh, win_chunks * cin, wo * cout).astype(dtype)


def _epilogue_params(b, gamma, beta, mean, var, wo):
    scale = gamma / jnp.sqrt(var + BN_EPS)
    shift = beta - mean * scale
    return jnp.stack([jnp.tile(b, wo), jnp.tile(scale, wo), jnp.tile(shift, wo)]
                     ).astype(jnp.float32)                # (3, wo*Cout)


def _pool_select(n):
    # Picks row n*28 + 2*hp of the pair-maxed map for pooled row n*11 + hp.
    rows = jnp.arange(11 * n)
    cols = 28 * (rows // 11) + 2 * (rows % 11)
    return (jnp.arange(28 * n - 7)[None, :] == cols[:, None]).astype(jnp.float32)


def _head_select(n):
    # Picks row 11*n_img (one valid head row per image).
    cols = 11 * jnp.arange(n)
    return (jnp.arange(11 * n - 10)[None, :] == cols[:, None]).astype(jnp.float32)


# --------------------------------- forward -----------------------------------

def net2_forward(x_nchw, params):
    n = x_nchw.shape[0]
    assert x_nchw.shape[1:] == (1, 28, 28)
    x2d = x_nchw.astype(jnp.float32).reshape(n * 28, 28)

    b1a = _band_weights(params['c1a'][0], 28, 26)
    b1b = _band_weights(params['c1b'][0], 26, 24)
    b1c = _band_weights(params['c1c'][0], 24, 22)
    b2a = _band_weights(params['c2a'][0], 21, 9, chunk_stride=2)  # pooled input
    b2b = _band_weights(params['c2b'][0], 9, 7)
    b3a = _band_weights(params['c3a'][0], 7, 7)[0]                # 1x1 conv

    p1a = _epilogue_params(*params['c1a'][1:], 26)
    p1b = _epilogue_params(*params['c1b'][1:], 24)
    p1c = _epilogue_params(*params['c1c'][1:], 22)
    p2a = _epilogue_params(*params['c2a'][1:], 9)
    p2b = _epilogue_params(*params['c2b'][1:], 7)
    p3a = _epilogue_params(*params['c3a'][1:], 7)

    # 7x7 head: per-row (70 -> 10) matrices, Bhd[h, w*10+ci, co] = W[co,ci,h,w]
    bhd = jnp.transpose(params['c3b_w'], (2, 3, 1, 0)).reshape(7, 70, 10)
    bhd = bhd.astype(jnp.bfloat16)
    bhd_bias = params['c3b_b'].reshape(1, 10).astype(jnp.float32)

    spool = _pool_select(n)
    shead = _head_select(n)

    inputs = (x2d, b1a, p1a, b1b, p1b, b1c, p1c, spool,
              b2a, p2a, b2b, p2b, b3a, p3a, bhd, bhd_bias, shead)

    def full_spec(a):
        nd = a.ndim
        return pl.BlockSpec(a.shape, lambda i, _nd=nd: (0,) * _nd)

    return pl.pallas_call(
        functools.partial(_net2_kernel, n=n),
        out_shape=jax.ShapeDtypeStruct((n, 10), jnp.float32),
        grid=(1,),
        in_specs=[full_spec(a) for a in inputs],
        out_specs=pl.BlockSpec((n, 10), lambda i: (0, 0)),
        compiler_params=pltpu.CompilerParams(
            dimension_semantics=("arbitrary",)),
    )(*inputs)


# ------------------------------- parameters ----------------------------------

def _init_conv_bn(key, cout, cin, k):
    kw_, kb, kg, kbeta, km, kv = jax.random.split(key, 6)
    w = 0.1 * jax.random.normal(kw_, (cout, cin, k, k), jnp.float32)
    b = 0.05 * jax.random.normal(kb, (cout,), jnp.float32)
    gamma = 1.0 + 0.05 * jax.random.normal(kg, (cout,), jnp.float32)
    beta = 0.05 * jax.random.normal(kbeta, (cout,), jnp.float32)
    mean = 0.05 * jax.random.normal(km, (cout,), jnp.float32)
    var = 1.0 + 0.1 * jnp.abs(jax.random.normal(kv, (cout,), jnp.float32))
    return (w, b, gamma, beta, mean, var)


def init_params(key):
    ks = jax.random.split(key, 8)
    return {
        "c1a": _init_conv_bn(ks[0], 8, 1, 3),
        "c1b": _init_conv_bn(ks[1], 8, 8, 3),
        "c1c": _init_conv_bn(ks[2], 8, 8, 3),
        "c2a": _init_conv_bn(ks[3], 16, 8, 3),
        "c2b": _init_conv_bn(ks[4], 16, 16, 3),
        "c3a": _init_conv_bn(ks[5], 10, 16, 1),
        "c3b_w": 0.1 * jax.random.normal(ks[6], (10, 10, 7, 7), jnp.float32),
        "c3b_b": 0.05 * jax.random.normal(ks[7], (10,), jnp.float32),
    }


# ------------------------- pure-JAX reference (check) ------------------------

def _ref_forward(x, params):
    def conv(x, w, b):
        y = lax.conv_general_dilated(x, w, (1, 1), 'VALID',
                                     dimension_numbers=('NCHW', 'OIHW', 'NCHW'))
        return y + b[None, :, None, None]

    def block(x, p):
        w, b, g, beta, mean, var = p
        y = jax.nn.relu(conv(x, w, b))
        s = g / jnp.sqrt(var + BN_EPS)
        t = beta - mean * s
        return y * s[None, :, None, None] + t[None, :, None, None]

    x = block(x, params['c1a'])
    x = block(x, params['c1b'])
    x = block(x, params['c1c'])
    x = lax.reduce_window(x, -jnp.inf, lax.max, (1, 1, 2, 2), (1, 1, 2, 2), 'VALID')
    x = block(x, params['c2a'])
    x = block(x, params['c2b'])
    x = block(x, params['c3a'])
    x = conv(x, params['c3b_w'], params['c3b_b'])
    return jax.nn.log_softmax(x.reshape(-1, 10), axis=-1)


if __name__ == "__main__":
    key = jax.random.PRNGKey(0)
    k_x, k_p = jax.random.split(key)
    x = jax.random.normal(k_x, (2, 1, 28, 28), jnp.float32)   # MNIST-shaped
    params = init_params(k_p)

    out = jax.jit(net2_forward)(x, params)
    out = jax.block_until_ready(out)

    assert out.shape == (2, 10), out.shape
    assert bool(jnp.all(jnp.isfinite(out)))
    assert bool(jnp.allclose(jnp.sum(jnp.exp(out), axis=-1), 1.0, atol=1e-4))

    ref = _ref_forward(x, params)
    max_err = float(jnp.max(jnp.abs(out - ref)))
    assert max_err < 0.15, f"mismatch vs reference: {max_err}"

    print("KERNEL_OK")
</pallas_src>

<mosaic_0001>
module attributes {stable_mosaic.version = 11 : i64} {
  func.func @_net2_kernel(%arg0: i32, %arg1: memref<56x28xf32, #tpu.memory_space<vmem>>, %arg2: memref<3x28x208xbf16, #tpu.memory_space<vmem>>, %arg3: memref<3x208xf32, #tpu.memory_space<vmem>>, %arg4: memref<3x208x192xbf16, #tpu.memory_space<vmem>>, %arg5: memref<3x192xf32, #tpu.memory_space<vmem>>, %arg6: memref<3x192x176xbf16, #tpu.memory_space<vmem>>, %arg7: memref<3x176xf32, #tpu.memory_space<vmem>>, %arg8: memref<22x49xf32, #tpu.memory_space<vmem>>, %arg9: memref<3x168x144xbf16, #tpu.memory_space<vmem>>, %arg10: memref<3x144xf32, #tpu.memory_space<vmem>>, %arg11: memref<3x144x112xbf16, #tpu.memory_space<vmem>>, %arg12: memref<3x112xf32, #tpu.memory_space<vmem>>, %arg13: memref<112x70xbf16, #tpu.memory_space<vmem>>, %arg14: memref<3x70xf32, #tpu.memory_space<vmem>>, %arg15: memref<7x70x10xbf16, #tpu.memory_space<vmem>>, %arg16: memref<1x10xf32, #tpu.memory_space<vmem>>, %arg17: memref<2x12xf32, #tpu.memory_space<vmem>>, %arg18: memref<2x10xf32, #tpu.memory_space<vmem>>) attributes {dimension_semantics = [#tpu.dimension_semantics<arbitrary>], iteration_bounds = array<i64: 1>, scalar_prefetch = 0 : i64, scratch_operands = 0 : i64, tpu.core_type = #tpu.core_type<tc>, window_params = [{pipeline_mode = #tpu.pipeline_mode<synchronous>, transform_indices = @transform_0, window_bounds = array<i64: 56, 28>}, {pipeline_mode = #tpu.pipeline_mode<synchronous>, transform_indices = @transform_1, window_bounds = array<i64: 3, 28, 208>}, {pipeline_mode = #tpu.pipeline_mode<synchronous>, transform_indices = @transform_2, window_bounds = array<i64: 3, 208>}, {pipeline_mode = #tpu.pipeline_mode<synchronous>, transform_indices = @transform_3, window_bounds = array<i64: 3, 208, 192>}, {pipeline_mode = #tpu.pipeline_mode<synchronous>, transform_indices = @transform_4, window_bounds = array<i64: 3, 192>}, {pipeline_mode = #tpu.pipeline_mode<synchronous>, transform_indices = @transform_5, window_bounds = array<i64: 3, 192, 176>}, {pipeline_mode = #tpu.pipeline_mode<synchronous>, transform_indices = @transform_6, window_bounds = array<i64: 3, 176>}, {pipeline_mode = #tpu.pipeline_mode<synchronous>, transform_indices = @transform_7, window_bounds = array<i64: 22, 49>}, {pipeline_mode = #tpu.pipeline_mode<synchronous>, transform_indices = @transform_8, window_bounds = array<i64: 3, 168, 144>}, {pipeline_mode = #tpu.pipeline_mode<synchronous>, transform_indices = @transform_9, window_bounds = array<i64: 3, 144>}, {pipeline_mode = #tpu.pipeline_mode<synchronous>, transform_indices = @transform_10, window_bounds = array<i64: 3, 144, 112>}, {pipeline_mode = #tpu.pipeline_mode<synchronous>, transform_indices = @transform_11, window_bounds = array<i64: 3, 112>}, {pipeline_mode = #tpu.pipeline_mode<synchronous>, transform_indices = @transform_12, window_bounds = array<i64: 112, 70>}, {pipeline_mode = #tpu.pipeline_mode<synchronous>, transform_indices = @transform_13, window_bounds = array<i64: 3, 70>}, {pipeline_mode = #tpu.pipeline_mode<synchronous>, transform_indices = @transform_14, window_bounds = array<i64: 7, 70, 10>}, {pipeline_mode = #tpu.pipeline_mode<synchronous>, transform_indices = @transform_15, window_bounds = array<i64: 1, 10>}, {pipeline_mode = #tpu.pipeline_mode<synchronous>, transform_indices = @transform_16, window_bounds = array<i64: 2, 12>}, {pipeline_mode = #tpu.pipeline_mode<synchronous>, transform_indices = @transform_17, window_bounds = array<i64: 2, 10>}]} {
    %c0 = arith.constant 0 : index
    %c0_0 = arith.constant 0 : index
    %0 = vector.load %arg1[%c0, %c0_0] : memref<56x28xf32, #tpu.memory_space<vmem>>, vector<56x28xf32>
    %1 = vector.extract_strided_slice %0 {offsets = [0, 0], sizes = [54, 28], strides = [1, 1]} : vector<56x28xf32> to vector<54x28xf32>
    %2 = arith.truncf %1 : vector<54x28xf32> to vector<54x28xbf16>
    %c0_1 = arith.constant 0 : index
    %c0_2 = arith.constant 0 : index
    %c0_3 = arith.constant 0 : index
    %3 = vector.load %arg2[%c0_1, %c0_2, %c0_3] : memref<3x28x208xbf16, #tpu.memory_space<vmem>>, vector<1x28x208xbf16>
    %4 = vector.shape_cast %3 : vector<1x28x208xbf16> to vector<28x208xbf16>
    %cst = arith.constant dense<0.000000e+00> : vector<54x208xf32>
    %5 = tpu.matmul %2, %4, %cst {dimension_numbers = #tpu.dot_dimension_numbers<[1], [0], [0], [1], [0, 0, 1, 1], [], []>} : vector<54x28xbf16>, vector<28x208xbf16>, vector<54x208xf32> -> vector<54x208xf32>
    %6 = vector.extract_strided_slice %0 {offsets = [1, 0], sizes = [54, 28], strides = [1, 1]} : vector<56x28xf32> to vector<54x28xf32>
    %7 = arith.truncf %6 : vector<54x28xf32> to vector<54x28xbf16>
    %c1 = arith.constant 1 : index
    %c0_4 = arith.constant 0 : index
    %c0_5 = arith.constant 0 : index
    %8 = vector.load %arg2[%c1, %c0_4, %c0_5] : memref<3x28x208xbf16, #tpu.memory_space<vmem>>, vector<1x28x208xbf16>
    %9 = vector.shape_cast %8 : vector<1x28x208xbf16> to vector<28x208xbf16>
    %cst_6 = arith.constant dense<0.000000e+00> : vector<54x208xf32>
    %10 = tpu.matmul %7, %9, %cst_6 {dimension_numbers = #tpu.dot_dimension_numbers<[1], [0], [0], [1], [0, 0, 1, 1], [], []>} : vector<54x28xbf16>, vector<28x208xbf16>, vector<54x208xf32> -> vector<54x208xf32>
    %11 = arith.addf %5, %10 : vector<54x208xf32>
    %12 = vector.extract_strided_slice %0 {offsets = [2, 0], sizes = [54, 28], strides = [1, 1]} : vector<56x28xf32> to vector<54x28xf32>
    %13 = arith.truncf %12 : vector<54x28xf32> to vector<54x28xbf16>
    %c2 = arith.constant 2 : index
    %c0_7 = arith.constant 0 : index
    %c0_8 = arith.constant 0 : index
    %14 = vector.load %arg2[%c2, %c0_7, %c0_8] : memref<3x28x208xbf16, #tpu.memory_space<vmem>>, vector<1x28x208xbf16>
    %15 = vector.shape_cast %14 : vector<1x28x208xbf16> to vector<28x208xbf16>
    %cst_9 = arith.constant dense<0.000000e+00> : vector<54x208xf32>
    %16 = tpu.matmul %13, %15, %cst_9 {dimension_numbers = #tpu.dot_dimension_numbers<[1], [0], [0], [1], [0, 0, 1, 1], [], []>} : vector<54x28xbf16>, vector<28x208xbf16>, vector<54x208xf32> -> vector<54x208xf32>
    %17 = arith.addf %11, %16 : vector<54x208xf32>
    %c0_10 = arith.constant 0 : index
    %c0_11 = arith.constant 0 : index
    %18 = vector.load %arg3[%c0_10, %c0_11] : memref<3x208xf32, #tpu.memory_space<vmem>>, vector<1x208xf32>
    %19 = vector.broadcast %18 : vector<1x208xf32> to vector<54x208xf32>
    %20 = arith.addf %17, %19 : vector<54x208xf32>
    %cst_12 = arith.constant 0.000000e+00 : f32
    %21 = vector.broadcast %cst_12 : f32 to vector<54x208xf32>
    %22 = arith.maximumf %20, %21 : vector<54x208xf32>
    %c1_13 = arith.constant 1 : index
    %c0_14 = arith.constant 0 : index
    %23 = vector.load %arg3[%c1_13, %c0_14] : memref<3x208xf32, #tpu.memory_space<vmem>>, vector<1x208xf32>
    %24 = vector.broadcast %23 : vector<1x208xf32> to vector<54x208xf32>
    %25 = arith.mulf %22, %24 : vector<54x208xf32>
    %c2_15 = arith.constant 2 : index
    %c0_16 = arith.constant 0 : index
    %26 = vector.load %arg3[%c2_15, %c0_16] : memref<3x208xf32, #tpu.memory_space<vmem>>, vector<1x208xf32>
    %27 = vector.broadcast %26 : vector<1x208xf32> to vector<54x208xf32>
    %28 = arith.addf %25, %27 : vector<54x208xf32>
    %29 = vector.extract_strided_slice %28 {offsets = [0, 0], sizes = [52, 208], strides = [1, 1]} : vector<54x208xf32> to vector<52x208xf32>
    %30 = arith.truncf %29 : vector<52x208xf32> to vector<52x208xbf16>
    %c0_17 = arith.constant 0 : index
    %c0_18 = arith.constant 0 : index
    %c0_19 = arith.constant 0 : index
    %31 = vector.load %arg4[%c0_17, %c0_18, %c0_19] : memref<3x208x192xbf16, #tpu.memory_space<vmem>>, vector<1x208x192xbf16>
    %32 = vector.shape_cast %31 : vector<1x208x192xbf16> to vector<208x192xbf16>
    %cst_20 = arith.constant dense<0.000000e+00> : vector<52x192xf32>
    %33 = tpu.matmul %30, %32, %cst_20 {dimension_numbers = #tpu.dot_dimension_numbers<[1], [0], [0], [1], [0, 0, 1, 1], [], []>} : vector<52x208xbf16>, vector<208x192xbf16>, vector<52x192xf32> -> vector<52x192xf32>
    %34 = vector.extract_strided_slice %28 {offsets = [1, 0], sizes = [52, 208], strides = [1, 1]} : vector<54x208xf32> to vector<52x208xf32>
    %35 = arith.truncf %34 : vector<52x208xf32> to vector<52x208xbf16>
    %c1_21 = arith.constant 1 : index
    %c0_22 = arith.constant 0 : index
    %c0_23 = arith.constant 0 : index
    %36 = vector.load %arg4[%c1_21, %c0_22, %c0_23] : memref<3x208x192xbf16, #tpu.memory_space<vmem>>, vector<1x208x192xbf16>
    %37 = vector.shape_cast %36 : vector<1x208x192xbf16> to vector<208x192xbf16>
    %cst_24 = arith.constant dense<0.000000e+00> : vector<52x192xf32>
    %38 = tpu.matmul %35, %37, %cst_24 {dimension_numbers = #tpu.dot_dimension_numbers<[1], [0], [0], [1], [0, 0, 1, 1], [], []>} : vector<52x208xbf16>, vector<208x192xbf16>, vector<52x192xf32> -> vector<52x192xf32>
    %39 = arith.addf %33, %38 : vector<52x192xf32>
    %40 = vector.extract_strided_slice %28 {offsets = [2, 0], sizes = [52, 208], strides = [1, 1]} : vector<54x208xf32> to vector<52x208xf32>
    %41 = arith.truncf %40 : vector<52x208xf32> to vector<52x208xbf16>
    %c2_25 = arith.constant 2 : index
    %c0_26 = arith.constant 0 : index
    %c0_27 = arith.constant 0 : index
    %42 = vector.load %arg4[%c2_25, %c0_26, %c0_27] : memref<3x208x192xbf16, #tpu.memory_space<vmem>>, vector<1x208x192xbf16>
    %43 = vector.shape_cast %42 : vector<1x208x192xbf16> to vector<208x192xbf16>
    %cst_28 = arith.constant dense<0.000000e+00> : vector<52x192xf32>
    %44 = tpu.matmul %41, %43, %cst_28 {dimension_numbers = #tpu.dot_dimension_numbers<[1], [0], [0], [1], [0, 0, 1, 1], [], []>} : vector<52x208xbf16>, vector<208x192xbf16>, vector<52x192xf32> -> vector<52x192xf32>
    %45 = arith.addf %39, %44 : vector<52x192xf32>
    %c0_29 = arith.constant 0 : index
    %c0_30 = arith.constant 0 : index
    %46 = vector.load %arg5[%c0_29, %c0_30] : memref<3x192xf32, #tpu.memory_space<vmem>>, vector<1x192xf32>
    %47 = vector.broadcast %46 : vector<1x192xf32> to vector<52x192xf32>
    %48 = arith.addf %45, %47 : vector<52x192xf32>
    %cst_31 = arith.constant 0.000000e+00 : f32
    %49 = vector.broadcast %cst_31 : f32 to vector<52x192xf32>
    %50 = arith.maximumf %48, %49 : vector<52x192xf32>
    %c1_32 = arith.constant 1 : index
    %c0_33 = arith.constant 0 : index
    %51 = vector.load %arg5[%c1_32, %c0_33] : memref<3x192xf32, #tpu.memory_space<vmem>>, vector<1x192xf32>
    %52 = vector.broadcast %51 : vector<1x192xf32> to vector<52x192xf32>
    %53 = arith.mulf %50, %52 : vector<52x192xf32>
    %c2_34 = arith.constant 2 : index
    %c0_35 = arith.constant 0 : index
    %54 = vector.load %arg5[%c2_34, %c0_35] : memref<3x192xf32, #tpu.memory_space<vmem>>, vector<1x192xf32>
    %55 = vector.broadcast %54 : vector<1x192xf32> to vector<52x192xf32>
    %56 = arith.addf %53, %55 : vector<52x192xf32>
    %57 = vector.extract_strided_slice %56 {offsets = [0, 0], sizes = [50, 192], strides = [1, 1]} : vector<52x192xf32> to vector<50x192xf32>
    %58 = arith.truncf %57 : vector<50x192xf32> to vector<50x192xbf16>
    %c0_36 = arith.constant 0 : index
    %c0_37 = arith.constant 0 : index
    %c0_38 = arith.constant 0 : index
    %59 = vector.load %arg6[%c0_36, %c0_37, %c0_38] : memref<3x192x176xbf16, #tpu.memory_space<vmem>>, vector<1x192x176xbf16>
    %60 = vector.shape_cast %59 : vector<1x192x176xbf16> to vector<192x176xbf16>
    %cst_39 = arith.constant dense<0.000000e+00> : vector<50x176xf32>
    %61 = tpu.matmul %58, %60, %cst_39 {dimension_numbers = #tpu.dot_dimension_numbers<[1], [0], [0], [1], [0, 0, 1, 1], [], []>} : vector<50x192xbf16>, vector<192x176xbf16>, vector<50x176xf32> -> vector<50x176xf32>
    %62 = vector.extract_strided_slice %56 {offsets = [1, 0], sizes = [50, 192], strides = [1, 1]} : vector<52x192xf32> to vector<50x192xf32>
    %63 = arith.truncf %62 : vector<50x192xf32> to vector<50x192xbf16>
    %c1_40 = arith.constant 1 : index
    %c0_41 = arith.constant 0 : index
    %c0_42 = arith.constant 0 : index
    %64 = vector.load %arg6[%c1_40, %c0_41, %c0_42] : memref<3x192x176xbf16, #tpu.memory_space<vmem>>, vector<1x192x176xbf16>
    %65 = vector.shape_cast %64 : vector<1x192x176xbf16> to vector<192x176xbf16>
    %cst_43 = arith.constant dense<0.000000e+00> : vector<50x176xf32>
    %66 = tpu.matmul %63, %65, %cst_43 {dimension_numbers = #tpu.dot_dimension_numbers<[1], [0], [0], [1], [0, 0, 1, 1], [], []>} : vector<50x192xbf16>, vector<192x176xbf16>, vector<50x176xf32> -> vector<50x176xf32>
    %67 = arith.addf %61, %66 : vector<50x176xf32>
    %68 = vector.extract_strided_slice %56 {offsets = [2, 0], sizes = [50, 192], strides = [1, 1]} : vector<52x192xf32> to vector<50x192xf32>
    %69 = arith.truncf %68 : vector<50x192xf32> to vector<50x192xbf16>
    %c2_44 = arith.constant 2 : index
    %c0_45 = arith.constant 0 : index
    %c0_46 = arith.constant 0 : index
    %70 = vector.load %arg6[%c2_44, %c0_45, %c0_46] : memref<3x192x176xbf16, #tpu.memory_space<vmem>>, vector<1x192x176xbf16>
    %71 = vector.shape_cast %70 : vector<1x192x176xbf16> to vector<192x176xbf16>
    %cst_47 = arith.constant dense<0.000000e+00> : vector<50x176xf32>
    %72 = tpu.matmul %69, %71, %cst_47 {dimension_numbers = #tpu.dot_dimension_numbers<[1], [0], [0], [1], [0, 0, 1, 1], [], []>} : vector<50x192xbf16>, vector<192x176xbf16>, vector<50x176xf32> -> vector<50x176xf32>
    %73 = arith.addf %67, %72 : vector<50x176xf32>
    %c0_48 = arith.constant 0 : index
    %c0_49 = arith.constant 0 : index
    %74 = vector.load %arg7[%c0_48, %c0_49] : memref<3x176xf32, #tpu.memory_space<vmem>>, vector<1x176xf32>
    %75 = vector.broadcast %74 : vector<1x176xf32> to vector<50x176xf32>
    %76 = arith.addf %73, %75 : vector<50x176xf32>
    %cst_50 = arith.constant 0.000000e+00 : f32
    %77 = vector.broadcast %cst_50 : f32 to vector<50x176xf32>
    %78 = arith.maximumf %76, %77 : vector<50x176xf32>
    %c1_51 = arith.constant 1 : index
    %c0_52 = arith.constant 0 : index
    %79 = vector.load %arg7[%c1_51, %c0_52] : memref<3x176xf32, #tpu.memory_space<vmem>>, vector<1x176xf32>
    %80 = vector.broadcast %79 : vector<1x176xf32> to vector<50x176xf32>
    %81 = arith.mulf %78, %80 : vector<50x176xf32>
    %c2_53 = arith.constant 2 : index
    %c0_54 = arith.constant 0 : index
    %82 = vector.load %arg7[%c2_53, %c0_54] : memref<3x176xf32, #tpu.memory_space<vmem>>, vector<1x176xf32>
    %83 = vector.broadcast %82 : vector<1x176xf32> to vector<50x176xf32>
    %84 = arith.addf %81, %83 : vector<50x176xf32>
    %85 = vector.extract_strided_slice %84 {offsets = [0, 0], sizes = [49, 176], strides = [1, 1]} : vector<50x176xf32> to vector<49x176xf32>
    %86 = vector.extract_strided_slice %84 {offsets = [1, 0], sizes = [49, 176], strides = [1, 1]} : vector<50x176xf32> to vector<49x176xf32>
    %87 = arith.maximumf %85, %86 : vector<49x176xf32>
    %88 = vector.extract_strided_slice %87 {offsets = [0, 0], sizes = [49, 168], strides = [1, 1]} : vector<49x176xf32> to vector<49x168xf32>
    %89 = vector.extract_strided_slice %87 {offsets = [0, 8], sizes = [49, 168], strides = [1, 1]} : vector<49x176xf32> to vector<49x168xf32>
    %90 = arith.maximumf %88, %89 : vector<49x168xf32>
    %c0_55 = arith.constant 0 : index
    %c0_56 = arith.constant 0 : index
    %91 = vector.load %arg8[%c0_55, %c0_56] : memref<22x49xf32, #tpu.memory_space<vmem>>, vector<22x49xf32>
    %cst_57 = arith.constant dense<0.000000e+00> : vector<22x168xf32>
    %92 = tpu.matmul %91, %90, %cst_57 {dimension_numbers = #tpu.dot_dimension_numbers<[1], [0], [0], [1], [0, 0, 1, 1], [], []>} : vector<22x49xf32>, vector<49x168xf32>, vector<22x168xf32> -> vector<22x168xf32>
    %93 = vector.extract_strided_slice %92 {offsets = [0, 0], sizes = [20, 168], strides = [1, 1]} : vector<22x168xf32> to vector<20x168xf32>
    %94 = arith.truncf %93 : vector<20x168xf32> to vector<20x168xbf16>
    %c0_58 = arith.constant 0 : index
    %c0_59 = arith.constant 0 : index
    %c0_60 = arith.constant 0 : index
    %95 = vector.load %arg9[%c0_58, %c0_59, %c0_60] : memref<3x168x144xbf16, #tpu.memory_space<vmem>>, vector<1x168x144xbf16>
    %96 = vector.shape_cast %95 : vector<1x168x144xbf16> to vector<168x144xbf16>
    %cst_61 = arith.constant dense<0.000000e+00> : vector<20x144xf32>
    %97 = tpu.matmul %94, %96, %cst_61 {dimension_numbers = #tpu.dot_dimension_numbers<[1], [0], [0], [1], [0, 0, 1, 1], [], []>} : vector<20x168xbf16>, vector<168x144xbf16>, vector<20x144xf32> -> vector<20x144xf32>
    %98 = vector.extract_strided_slice %92 {offsets = [1, 0], sizes = [20, 168], strides = [1, 1]} : vector<22x168xf32> to vector<20x168xf32>
    %99 = arith.truncf %98 : vector<20x168xf32> to vector<20x168xbf16>
    %c1_62 = arith.constant 1 : index
    %c0_63 = arith.constant 0 : index
    %c0_64 = arith.constant 0 : index
    %100 = vector.load %arg9[%c1_62, %c0_63, %c0_64] : memref<3x168x144xbf16, #tpu.memory_space<vmem>>, vector<1x168x144xbf16>
    %101 = vector.shape_cast %100 : vector<1x168x144xbf16> to vector<168x144xbf16>
    %cst_65 = arith.constant dense<0.000000e+00> : vector<20x144xf32>
    %102 = tpu.matmul %99, %101, %cst_65 {dimension_numbers = #tpu.dot_dimension_numbers<[1], [0], [0], [1], [0, 0, 1, 1], [], []>} : vector<20x168xbf16>, vector<168x144xbf16>, vector<20x144xf32> -> vector<20x144xf32>
    %103 = arith.addf %97, %102 : vector<20x144xf32>
    %104 = vector.extract_strided_slice %92 {offsets = [2, 0], sizes = [20, 168], strides = [1, 1]} : vector<22x168xf32> to vector<20x168xf32>
    %105 = arith.truncf %104 : vector<20x168xf32> to vector<20x168xbf16>
    %c2_66 = arith.constant 2 : index
    %c0_67 = arith.constant 0 : index
    %c0_68 = arith.constant 0 : index
    %106 = vector.load %arg9[%c2_66, %c0_67, %c0_68] : memref<3x168x144xbf16, #tpu.memory_space<vmem>>, vector<1x168x144xbf16>
    %107 = vector.shape_cast %106 : vector<1x168x144xbf16> to vector<168x144xbf16>
    %cst_69 = arith.constant dense<0.000000e+00> : vector<20x144xf32>
    %108 = tpu.matmul %105, %107, %cst_69 {dimension_numbers = #tpu.dot_dimension_numbers<[1], [0], [0], [1], [0, 0, 1, 1], [], []>} : vector<20x168xbf16>, vector<168x144xbf16>, vector<20x144xf32> -> vector<20x144xf32>
    %109 = arith.addf %103, %108 : vector<20x144xf32>
    %c0_70 = arith.constant 0 : index
    %c0_71 = arith.constant 0 : index
    %110 = vector.load %arg10[%c0_70, %c0_71] : memref<3x144xf32, #tpu.memory_space<vmem>>, vector<1x144xf32>
    %111 = vector.broadcast %110 : vector<1x144xf32> to vector<20x144xf32>
    %112 = arith.addf %109, %111 : vector<20x144xf32>
    %cst_72 = arith.constant 0.000000e+00 : f32
    %113 = vector.broadcast %cst_72 : f32 to vector<20x144xf32>
    %114 = arith.maximumf %112, %113 : vector<20x144xf32>
    %c1_73 = arith.constant 1 : index
    %c0_74 = arith.constant 0 : index
    %115 = vector.load %arg10[%c1_73, %c0_74] : memref<3x144xf32, #tpu.memory_space<vmem>>, vector<1x144xf32>
    %116 = vector.broadcast %115 : vector<1x144xf32> to vector<20x144xf32>
    %117 = arith.mulf %114, %116 : vector<20x144xf32>
    %c2_75 = arith.constant 2 : index
    %c0_76 = arith.constant 0 : index
    %118 = vector.load %arg10[%c2_75, %c0_76] : memref<3x144xf32, #tpu.memory_space<vmem>>, vector<1x144xf32>
    %119 = vector.broadcast %118 : vector<1x144xf32> to vector<20x144xf32>
    %120 = arith.addf %117, %119 : vector<20x144xf32>
    %121 = vector.extract_strided_slice %120 {offsets = [0, 0], sizes = [18, 144], strides = [1, 1]} : vector<20x144xf32> to vector<18x144xf32>
    %122 = arith.truncf %121 : vector<18x144xf32> to vector<18x144xbf16>
    %c0_77 = arith.constant 0 : index
    %c0_78 = arith.constant 0 : index
    %c0_79 = arith.constant 0 : index
    %123 = vector.load %arg11[%c0_77, %c0_78, %c0_79] : memref<3x144x112xbf16, #tpu.memory_space<vmem>>, vector<1x144x112xbf16>
    %124 = vector.shape_cast %123 : vector<1x144x112xbf16> to vector<144x112xbf16>
    %cst_80 = arith.constant dense<0.000000e+00> : vector<18x112xf32>
    %125 = tpu.matmul %122, %124, %cst_80 {dimension_numbers = #tpu.dot_dimension_numbers<[1], [0], [0], [1], [0, 0, 1, 1], [], []>} : vector<18x144xbf16>, vector<144x112xbf16>, vector<18x112xf32> -> vector<18x112xf32>
    %126 = vector.extract_strided_slice %120 {offsets = [1, 0], sizes = [18, 144], strides = [1, 1]} : vector<20x144xf32> to vector<18x144xf32>
    %127 = arith.truncf %126 : vector<18x144xf32> to vector<18x144xbf16>
    %c1_81 = arith.constant 1 : index
    %c0_82 = arith.constant 0 : index
    %c0_83 = arith.constant 0 : index
    %128 = vector.load %arg11[%c1_81, %c0_82, %c0_83] : memref<3x144x112xbf16, #tpu.memory_space<vmem>>, vector<1x144x112xbf16>
    %129 = vector.shape_cast %128 : vector<1x144x112xbf16> to vector<144x112xbf16>
    %cst_84 = arith.constant dense<0.000000e+00> : vector<18x112xf32>
    %130 = tpu.matmul %127, %129, %cst_84 {dimension_numbers = #tpu.dot_dimension_numbers<[1], [0], [0], [1], [0, 0, 1, 1], [], []>} : vector<18x144xbf16>, vector<144x112xbf16>, vector<18x112xf32> -> vector<18x112xf32>
    %131 = arith.addf %125, %130 : vector<18x112xf32>
    %132 = vector.extract_strided_slice %120 {offsets = [2, 0], sizes = [18, 144], strides = [1, 1]} : vector<20x144xf32> to vector<18x144xf32>
    %133 = arith.truncf %132 : vector<18x144xf32> to vector<18x144xbf16>
    %c2_85 = arith.constant 2 : index
    %c0_86 = arith.constant 0 : index
    %c0_87 = arith.constant 0 : index
    %134 = vector.load %arg11[%c2_85, %c0_86, %c0_87] : memref<3x144x112xbf16, #tpu.memory_space<vmem>>, vector<1x144x112xbf16>
    %135 = vector.shape_cast %134 : vector<1x144x112xbf16> to vector<144x112xbf16>
    %cst_88 = arith.constant dense<0.000000e+00> : vector<18x112xf32>
    %136 = tpu.matmul %133, %135, %cst_88 {dimension_numbers = #tpu.dot_dimension_numbers<[1], [0], [0], [1], [0, 0, 1, 1], [], []>} : vector<18x144xbf16>, vector<144x112xbf16>, vector<18x112xf32> -> vector<18x112xf32>
    %137 = arith.addf %131, %136 : vector<18x112xf32>
    %c0_89 = arith.constant 0 : index
    %c0_90 = arith.constant 0 : index
    %138 = vector.load %arg12[%c0_89, %c0_90] : memref<3x112xf32, #tpu.memory_space<vmem>>, vector<1x112xf32>
    %139 = vector.broadcast %138 : vector<1x112xf32> to vector<18x112xf32>
    %140 = arith.addf %137, %139 : vector<18x112xf32>
    %cst_91 = arith.constant 0.000000e+00 : f32
    %141 = vector.broadcast %cst_91 : f32 to vector<18x112xf32>
    %142 = arith.maximumf %140, %141 : vector<18x112xf32>
    %c1_92 = arith.constant 1 : index
    %c0_93 = arith.constant 0 : index
    %143 = vector.load %arg12[%c1_92, %c0_93] : memref<3x112xf32, #tpu.memory_space<vmem>>, vector<1x112xf32>
    %144 = vector.broadcast %143 : vector<1x112xf32> to vector<18x112xf32>
    %145 = arith.mulf %142, %144 : vector<18x112xf32>
    %c2_94 = arith.constant 2 : index
    %c0_95 = arith.constant 0 : index
    %146 = vector.load %arg12[%c2_94, %c0_95] : memref<3x112xf32, #tpu.memory_space<vmem>>, vector<1x112xf32>
    %147 = vector.broadcast %146 : vector<1x112xf32> to vector<18x112xf32>
    %148 = arith.addf %145, %147 : vector<18x112xf32>
    %149 = arith.truncf %148 : vector<18x112xf32> to vector<18x112xbf16>
    %c0_96 = arith.constant 0 : index
    %c0_97 = arith.constant 0 : index
    %150 = vector.load %arg13[%c0_96, %c0_97] : memref<112x70xbf16, #tpu.memory_space<vmem>>, vector<112x70xbf16>
    %cst_98 = arith.constant dense<0.000000e+00> : vector<18x70xf32>
    %151 = tpu.matmul %149, %150, %cst_98 {dimension_numbers = #tpu.dot_dimension_numbers<[1], [0], [0], [1], [0, 0, 1, 1], [], []>} : vector<18x112xbf16>, vector<112x70xbf16>, vector<18x70xf32> -> vector<18x70xf32>
    %c0_99 = arith.constant 0 : index
    %c0_100 = arith.constant 0 : index
    %152 = vector.load %arg14[%c0_99, %c0_100] : memref<3x70xf32, #tpu.memory_space<vmem>>, vector<1x70xf32>
    %153 = vector.broadcast %152 : vector<1x70xf32> to vector<18x70xf32>
    %154 = arith.addf %151, %153 : vector<18x70xf32>
    %cst_101 = arith.constant 0.000000e+00 : f32
    %155 = vector.broadcast %cst_101 : f32 to vector<18x70xf32>
    %156 = arith.maximumf %154, %155 : vector<18x70xf32>
    %c1_102 = arith.constant 1 : index
    %c0_103 = arith.constant 0 : index
    %157 = vector.load %arg14[%c1_102, %c0_103] : memref<3x70xf32, #tpu.memory_space<vmem>>, vector<1x70xf32>
    %158 = vector.broadcast %157 : vector<1x70xf32> to vector<18x70xf32>
    %159 = arith.mulf %156, %158 : vector<18x70xf32>
    %c2_104 = arith.constant 2 : index
    %c0_105 = arith.constant 0 : index
    %160 = vector.load %arg14[%c2_104, %c0_105] : memref<3x70xf32, #tpu.memory_space<vmem>>, vector<1x70xf32>
    %161 = vector.broadcast %160 : vector<1x70xf32> to vector<18x70xf32>
    %162 = arith.addf %159, %161 : vector<18x70xf32>
    %163 = vector.extract_strided_slice %162 {offsets = [0, 0], sizes = [12, 70], strides = [1, 1]} : vector<18x70xf32> to vector<12x70xf32>
    %164 = arith.truncf %163 : vector<12x70xf32> to vector<12x70xbf16>
    %c0_106 = arith.constant 0 : index
    %c0_107 = arith.constant 0 : index
    %c0_108 = arith.constant 0 : index
    %165 = vector.load %arg15[%c0_106, %c0_107, %c0_108] : memref<7x70x10xbf16, #tpu.memory_space<vmem>>, vector<1x70x10xbf16>
    %166 = vector.shape_cast %165 : vector<1x70x10xbf16> to vector<70x10xbf16>
    %cst_109 = arith.constant dense<0.000000e+00> : vector<12x10xf32>
    %167 = tpu.matmul %164, %166, %cst_109 {dimension_numbers = #tpu.dot_dimension_numbers<[1], [0], [0], [1], [0, 0, 1, 1], [], []>} : vector<12x70xbf16>, vector<70x10xbf16>, vector<12x10xf32> -> vector<12x10xf32>
    %168 = vector.extract_strided_slice %162 {offsets = [1, 0], sizes = [12, 70], strides = [1, 1]} : vector<18x70xf32> to vector<12x70xf32>
    %169 = arith.truncf %168 : vector<12x70xf32> to vector<12x70xbf16>
    %c1_110 = arith.constant 1 : index
    %c0_111 = arith.constant 0 : index
    %c0_112 = arith.constant 0 : index
    %170 = vector.load %arg15[%c1_110, %c0_111, %c0_112] : memref<7x70x10xbf16, #tpu.memory_space<vmem>>, vector<1x70x10xbf16>
    %171 = vector.shape_cast %170 : vector<1x70x10xbf16> to vector<70x10xbf16>
    %cst_113 = arith.constant dense<0.000000e+00> : vector<12x10xf32>
    %172 = tpu.matmul %169, %171, %cst_113 {dimension_numbers = #tpu.dot_dimension_numbers<[1], [0], [0], [1], [0, 0, 1, 1], [], []>} : vector<12x70xbf16>, vector<70x10xbf16>, vector<12x10xf32> -> vector<12x10xf32>
    %173 = arith.addf %167, %172 : vector<12x10xf32>
    %174 = vector.extract_strided_slice %162 {offsets = [2, 0], sizes = [12, 70], strides = [1, 1]} : vector<18x70xf32> to vector<12x70xf32>
    %175 = arith.truncf %174 : vector<12x70xf32> to vector<12x70xbf16>
    %c2_114 = arith.constant 2 : index
    %c0_115 = arith.constant 0 : index
    %c0_116 = arith.constant 0 : index
    %176 = vector.load %arg15[%c2_114, %c0_115, %c0_116] : memref<7x70x10xbf16, #tpu.memory_space<vmem>>, vector<1x70x10xbf16>
    %177 = vector.shape_cast %176 : vector<1x70x10xbf16> to vector<70x10xbf16>
    %cst_117 = arith.constant dense<0.000000e+00> : vector<12x10xf32>
    %178 = tpu.matmul %175, %177, %cst_117 {dimension_numbers = #tpu.dot_dimension_numbers<[1], [0], [0], [1], [0, 0, 1, 1], [], []>} : vector<12x70xbf16>, vector<70x10xbf16>, vector<12x10xf32> -> vector<12x10xf32>
    %179 = arith.addf %173, %178 : vector<12x10xf32>
    %180 = vector.extract_strided_slice %162 {offsets = [3, 0], sizes = [12, 70], strides = [1, 1]} : vector<18x70xf32> to vector<12x70xf32>
    %181 = arith.truncf %180 : vector<12x70xf32> to vector<12x70xbf16>
    %c3 = arith.constant 3 : index
    %c0_118 = arith.constant 0 : index
    %c0_119 = arith.constant 0 : index
    %182 = vector.load %arg15[%c3, %c0_118, %c0_119] : memref<7x70x10xbf16, #tpu.memory_space<vmem>>, vector<1x70x10xbf16>
    %183 = vector.shape_cast %182 : vector<1x70x10xbf16> to vector<70x10xbf16>
    %cst_120 = arith.constant dense<0.000000e+00> : vector<12x10xf32>
    %184 = tpu.matmul %181, %183, %cst_120 {dimension_numbers = #tpu.dot_dimension_numbers<[1], [0], [0], [1], [0, 0, 1, 1], [], []>} : vector<12x70xbf16>, vector<70x10xbf16>, vector<12x10xf32> -> vector<12x10xf32>
    %185 = arith.addf %179, %184 : vector<12x10xf32>
    %186 = vector.extract_strided_slice %162 {offsets = [4, 0], sizes = [12, 70], strides = [1, 1]} : vector<18x70xf32> to vector<12x70xf32>
    %187 = arith.truncf %186 : vector<12x70xf32> to vector<12x70xbf16>
    %c4 = arith.constant 4 : index
    %c0_121 = arith.constant 0 : index
    %c0_122 = arith.constant 0 : index
    %188 = vector.load %arg15[%c4, %c0_121, %c0_122] : memref<7x70x10xbf16, #tpu.memory_space<vmem>>, vector<1x70x10xbf16>
    %189 = vector.shape_cast %188 : vector<1x70x10xbf16> to vector<70x10xbf16>
    %cst_123 = arith.constant dense<0.000000e+00> : vector<12x10xf32>
    %190 = tpu.matmul %187, %189, %cst_123 {dimension_numbers = #tpu.dot_dimension_numbers<[1], [0], [0], [1], [0, 0, 1, 1], [], []>} : vector<12x70xbf16>, vector<70x10xbf16>, vector<12x10xf32> -> vector<12x10xf32>
    %191 = arith.addf %185, %190 : vector<12x10xf32>
    %192 = vector.extract_strided_slice %162 {offsets = [5, 0], sizes = [12, 70], strides = [1, 1]} : vector<18x70xf32> to vector<12x70xf32>
    %193 = arith.truncf %192 : vector<12x70xf32> to vector<12x70xbf16>
    %c5 = arith.constant 5 : index
    %c0_124 = arith.constant 0 : index
    %c0_125 = arith.constant 0 : index
    %194 = vector.load %arg15[%c5, %c0_124, %c0_125] : memref<7x70x10xbf16, #tpu.memory_space<vmem>>, vector<1x70x10xbf16>
    %195 = vector.shape_cast %194 : vector<1x70x10xbf16> to vector<70x10xbf16>
    %cst_126 = arith.constant dense<0.000000e+00> : vector<12x10xf32>
    %196 = tpu.matmul %193, %195, %cst_126 {dimension_numbers = #tpu.dot_dimension_numbers<[1], [0], [0], [1], [0, 0, 1, 1], [], []>} : vector<12x70xbf16>, vector<70x10xbf16>, vector<12x10xf32> -> vector<12x10xf32>
    %197 = arith.addf %191, %196 : vector<12x10xf32>
    %198 = vector.extract_strided_slice %162 {offsets = [6, 0], sizes = [12, 70], strides = [1, 1]} : vector<18x70xf32> to vector<12x70xf32>
    %199 = arith.truncf %198 : vector<12x70xf32> to vector<12x70xbf16>
    %c6 = arith.constant 6 : index
    %c0_127 = arith.constant 0 : index
    %c0_128 = arith.constant 0 : index
    %200 = vector.load %arg15[%c6, %c0_127, %c0_128] : memref<7x70x10xbf16, #tpu.memory_space<vmem>>, vector<1x70x10xbf16>
    %201 = vector.shape_cast %200 : vector<1x70x10xbf16> to vector<70x10xbf16>
    %cst_129 = arith.constant dense<0.000000e+00> : vector<12x10xf32>
    %202 = tpu.matmul %199, %201, %cst_129 {dimension_numbers = #tpu.dot_dimension_numbers<[1], [0], [0], [1], [0, 0, 1, 1], [], []>} : vector<12x70xbf16>, vector<70x10xbf16>, vector<12x10xf32> -> vector<12x10xf32>
    %203 = arith.addf %197, %202 : vector<12x10xf32>
    %c0_130 = arith.constant 0 : index
    %c0_131 = arith.constant 0 : index
    %204 = vector.load %arg17[%c0_130, %c0_131] : memref<2x12xf32, #tpu.memory_space<vmem>>, vector<2x12xf32>
    %cst_132 = arith.constant dense<0.000000e+00> : vector<2x10xf32>
    %205 = tpu.matmul %204, %203, %cst_132 {dimension_numbers = #tpu.dot_dimension_numbers<[1], [0], [0], [1], [0, 0, 1, 1], [], []>} : vector<2x12xf32>, vector<12x10xf32>, vector<2x10xf32> -> vector<2x10xf32>
    %c0_133 = arith.constant 0 : index
    %c0_134 = arith.constant 0 : index
    %206 = vector.load %arg16[%c0_133, %c0_134] : memref<1x10xf32, #tpu.memory_space<vmem>>, vector<1x10xf32>
    %207 = vector.broadcast %206 : vector<1x10xf32> to vector<2x10xf32>
    %208 = arith.addf %205, %207 : vector<2x10xf32>
    %cst_135 = arith.constant dense<0xFF800000> : vector<2xf32>
    %209 = vector.multi_reduction <maximumf>, %208, %cst_135 [1] : vector<2x10xf32> to vector<2xf32>
    %210 = vector.shape_cast %209 : vector<2xf32> to vector<2x1xf32>
    %211 = vector.broadcast %210 : vector<2x1xf32> to vector<2x10xf32>
    %212 = arith.subf %208, %211 : vector<2x10xf32>
    %213 = math.exp %212 : vector<2x10xf32>
    %cst_136 = arith.constant dense<0.000000e+00> : vector<2xf32>
    %214 = vector.multi_reduction <add>, %213, %cst_136 [1] : vector<2x10xf32> to vector<2xf32>
    %215 = vector.shape_cast %214 : vector<2xf32> to vector<2x1xf32>
    %216 = math.log %215 : vector<2x1xf32>
    %217 = vector.broadcast %216 : vector<2x1xf32> to vector<2x10xf32>
    %218 = arith.subf %212, %217 : vector<2x10xf32>
    %c0_137 = arith.constant 0 : index
    %c0_138 = arith.constant 0 : index
    %219 = vector.load %arg18[%c0_137, %c0_138] : memref<2x10xf32, #tpu.memory_space<vmem>>, vector<2x10xf32>
    tpu.vector_store %arg18[%c0_137, %c0_138], %218 {strides = array<i32>} : memref<2x10xf32, #tpu.memory_space<vmem>>, vector<2x10xf32>,
    return
  }
  func.func @transform_0(%arg0: i32) -> (i32, i32) {
    %c0_i32 = arith.constant 0 : i32
    %c0_i32_0 = arith.constant 0 : i32
    %c0_i32_1 = arith.constant 0 : i32
    return %c0_i32, %c0_i32_0 : i32, i32
  }
  func.func @transform_1(%arg0: i32) -> (i32, i32, i32) {
    %c0_i32 = arith.constant 0 : i32
    %c0_i32_0 = arith.constant 0 : i32
    %c0_i32_1 = arith.constant 0 : i32
    %c0_i32_2 = arith.constant 0 : i32
    return %c0_i32, %c0_i32_0, %c0_i32_1 : i32, i32, i32
  }
  func.func @transform_2(%arg0: i32) -> (i32, i32) {
    %c0_i32 = arith.constant 0 : i32
    %c0_i32_0 = arith.constant 0 : i32
    %c0_i32_1 = arith.constant 0 : i32
    return %c0_i32, %c0_i32_0 : i32, i32
  }
  func.func @transform_3(%arg0: i32) -> (i32, i32, i32) {
    %c0_i32 = arith.constant 0 : i32
    %c0_i32_0 = arith.constant 0 : i32
    %c0_i32_1 = arith.constant 0 : i32
    %c0_i32_2 = arith.constant 0 : i32
    return %c0_i32, %c0_i32_0, %c0_i32_1 : i32, i32, i32
  }
  func.func @transform_4(%arg0: i32) -> (i32, i32) {
    %c0_i32 = arith.constant 0 : i32
    %c0_i32_0 = arith.constant 0 : i32
    %c0_i32_1 = arith.constant 0 : i32
    return %c0_i32, %c0_i32_0 : i32, i32
  }
  func.func @transform_5(%arg0: i32) -> (i32, i32, i32) {
    %c0_i32 = arith.constant 0 : i32
    %c0_i32_0 = arith.constant 0 : i32
    %c0_i32_1 = arith.constant 0 : i32
    %c0_i32_2 = arith.constant 0 : i32
    return %c0_i32, %c0_i32_0, %c0_i32_1 : i32, i32, i32
  }
  func.func @transform_6(%arg0: i32) -> (i32, i32) {
    %c0_i32 = arith.constant 0 : i32
    %c0_i32_0 = arith.constant 0 : i32
    %c0_i32_1 = arith.constant 0 : i32
    return %c0_i32, %c0_i32_0 : i32, i32
  }
  func.func @transform_7(%arg0: i32) -> (i32, i32) {
    %c0_i32 = arith.constant 0 : i32
    %c0_i32_0 = arith.constant 0 : i32
    %c0_i32_1 = arith.constant 0 : i32
    return %c0_i32, %c0_i32_0 : i32, i32
  }
  func.func @transform_8(%arg0: i32) -> (i32, i32, i32) {
    %c0_i32 = arith.constant 0 : i32
    %c0_i32_0 = arith.constant 0 : i32
    %c0_i32_1 = arith.constant 0 : i32
    %c0_i32_2 = arith.constant 0 : i32
    return %c0_i32, %c0_i32_0, %c0_i32_1 : i32, i32, i32
  }
  func.func @transform_9(%arg0: i32) -> (i32, i32) {
    %c0_i32 = arith.constant 0 : i32
    %c0_i32_0 = arith.constant 0 : i32
    %c0_i32_1 = arith.constant 0 : i32
    return %c0_i32, %c0_i32_0 : i32, i32
  }
  func.func @transform_10(%arg0: i32) -> (i32, i32, i32) {
    %c0_i32 = arith.constant 0 : i32
    %c0_i32_0 = arith.constant 0 : i32
    %c0_i32_1 = arith.constant 0 : i32
    %c0_i32_2 = arith.constant 0 : i32
    return %c0_i32, %c0_i32_0, %c0_i32_1 : i32, i32, i32
  }
  func.func @transform_11(%arg0: i32) -> (i32, i32) {
    %c0_i32 = arith.constant 0 : i32
    %c0_i32_0 = arith.constant 0 : i32
    %c0_i32_1 = arith.constant 0 : i32
    return %c0_i32, %c0_i32_0 : i32, i32
  }
  func.func @transform_12(%arg0: i32) -> (i32, i32) {
    %c0_i32 = arith.constant 0 : i32
    %c0_i32_0 = arith.constant 0 : i32
    %c0_i32_1 = arith.constant 0 : i32
    return %c0_i32, %c0_i32_0 : i32, i32
  }
  func.func @transform_13(%arg0: i32) -> (i32, i32) {
    %c0_i32 = arith.constant 0 : i32
    %c0_i32_0 = arith.constant 0 : i32
    %c0_i32_1 = arith.constant 0 : i32
    return %c0_i32, %c0_i32_0 : i32, i32
  }
  func.func @transform_14(%arg0: i32) -> (i32, i32, i32) {
    %c0_i32 = arith.constant 0 : i32
    %c0_i32_0 = arith.constant 0 : i32
    %c0_i32_1 = arith.constant 0 : i32
    %c0_i32_2 = arith.constant 0 : i32
    return %c0_i32, %c0_i32_0, %c0_i32_1 : i32, i32, i32
  }
  func.func @transform_15(%arg0: i32) -> (i32, i32) {
    %c0_i32 = arith.constant 0 : i32
    %c0_i32_0 = arith.constant 0 : i32
    %c0_i32_1 = arith.constant 0 : i32
    return %c0_i32, %c0_i32_0 : i32, i32
  }
  func.func @transform_16(%arg0: i32) -> (i32, i32) {
    %c0_i32 = arith.constant 0 : i32
    %c0_i32_0 = arith.constant 0 : i32
    %c0_i32_1 = arith.constant 0 : i32
    return %c0_i32, %c0_i32_0 : i32, i32
  }
  func.func @transform_17(%arg0: i32) -> (i32, i32) {
    %c0_i32 = arith.constant 0 : i32
    %c0_i32_0 = arith.constant 0 : i32
    %c0_i32_1 = arith.constant 0 : i32
    return %c0_i32, %c0_i32_0 : i32, i32
  }
}

</mosaic_0001>

<bundles_post_ra>
// kernel: tile.97
= control target key start
LH: loop header
LB: loop body
LE: loop exit
PB: predicated region body
PF: predicated region fallthrough
CT: control target
= control target key end

     0   :  { %s40_s0 = inlined_call_operand.vmem [shape: f32[8], index: 0, kind: input, shape index: {}]   ;;  %s41_s1 = inlined_call_operand.vmem [shape: f32[26,8], index: 1, kind: output, shape index: {}]  }
   0x1   :  { %v4_v0 = vld [vmem:[%s40_s0] ss:$0 sm:$0xff] }
   0x2   :  { %5 = vst [vmem:[%s41_s1] sm:$0xff] %v4_v0  ;;  %12 = vst [vmem:[%s41_s1 + $0x8] sm:$0xff] %v4_v0 }
   0x3   :  { %13 = vst [vmem:[%s41_s1 + $0x10] sm:$0xff] %v4_v0  ;;  %14 = vst [vmem:[%s41_s1 + $0x18] sm:$0xff] %v4_v0 }

// kernel: tile.103
= control target key start
LH: loop header
LB: loop body
LE: loop exit
PB: predicated region body
PF: predicated region fallthrough
CT: control target
= control target key end

     0   :  { %s150_s10 = smov 120   ;;  %s151_s11 = smov 104   ;;  %vm4_vm0 = vcmask 64512   ;;  %vm10_vm1 = vcmask 1048512   ;;  %vm16_vm2 = vcmask 982912   ;;  %vm22_vm3 = vcmask 917312   ;;  %s229_s0 = inlined_call_operand.vmem [shape: f32[26,8], index: 0, kind: input, shape index: {}]   ;;  %s230_s1 = inlined_call_operand.vmem [shape: f32[1,208], index: 1, kind: output, shape index: {}]  }
   0x1   :  { %v119_v0 = vld [vmem:[%s229_s0 + $0xf] sm:$0x1]   ;;  %v121_v1 = vld [vmem:[%s229_s0 + $0xd] sm:$0x1]   ;;  %v120_v2 = vld [vmem:[%s229_s0 + $0xe] sm:$0x1]  }
   0x2   :  { %8 = vrot.lane.b32.xlu0 %v119_v0, %s150_s10  ;;  %20 = vrot.lane.b32.xlu1 %v121_v1, %s151_s11  ;;  %v122_v3 = vld [vmem:[%s229_s0 + $0xc] sm:$0x1]   ;;  %s152_s16 = smov 112   ;;  %s153_s17 = smov 96   ;;  %v123_v4 = vld [vmem:[%s229_s0 + $0xb] sm:$0x1]  }
   0x3   :  { %v124_v5 = vld [vmem:[%s229_s0 + $0xa] sm:$0x1]   ;;  %s43_s22 = smov 3  ;;  %s50_s23 = smov 3  ;;  %vm28_vm4 = vcmask 851712   ;;  %vm34_vm5 = vcmask 786112  }
   0x4   :  { %s154_s24 = smov 88   ;;  %s155_s25 = smov 80   ;;  %v125_v6 = vld [vmem:[%s229_s0 + $0x9] ss:$16 sm:%s43_s22]   ;;  %v126_v7 = vld [vmem:[%s229_s0 + $0x8] ss:$16 sm:%s50_s23]  }
   0x5   :  { %s57_s30 = smov 3  ;;  %s64_s2 = smov 3  ;;  %vm40_vm6 = vcmask 720512   ;;  %vm47_vm7 = vcmask 654912   ;;  %vm54_vm8 = vcmask 589312   ;;  %vm61_vm9 = vcmask 523712  }
   0x6   :  { %14 = vrot.lane.b32.xlu0 %v120_v2, %s152_s16  ;;  %26 = vrot.lane.b32.xlu1 %v122_v3, %s153_s17  ;;  %s2_s3 = smov 3  ;;  %s156_s4 = smov 72   ;;  %v127_v9 = vld [vmem:[%s229_s0 + $0x7] ss:$16 sm:%s57_s30]   ;;  %vm68_vm10 = vcmask 458112   ;;  %vm75_vm11 = vcmask 392512  }
   0x7   :  { %s157_s5 = smov 64   ;;  %v3_v8 = vld [vmem:[%s229_s0] ss:$16 sm:%s2_s3]   ;;  %v128_v10 = vld [vmem:[%s229_s0 + $0x6] ss:$16 sm:%s64_s2]   ;;  %s71_s12 = smov 3 }
   0x8   :  { %5 = vst.msk [vmem:[#allocation0] ss:$8 sm:$0x3] %vm4_vm0, %v3_v8   ;;  %s78_s13 = smov 3  ;;  %s158_s14 = smov 56   ;;  %vm82_vm12 = vcmask 326912  }
   0x9   :  { %s159_s15 = smov 48   ;;  %v129_v11 = vld [vmem:[%s229_s0 + $0x5] ss:$16 sm:%s71_s12]   ;;  %v130_v12 = vld [vmem:[%s229_s0 + $0x4] ss:$16 sm:%s78_s13]   ;;  %s85_s20 = smov 3 }
   0xa   :  { %32 = vrot.lane.b32.xlu0 %v123_v4, %s154_s24  ;;  %38 = vrot.lane.b32.xlu1 %v124_v5, %s155_s25  ;;  %s92_s21 = smov 3  ;;  %s160_s22 = smov 40   ;;  %v131_v13 = vld [vmem:[%s229_s0 + $0x3] ss:$16 sm:%s85_s20]   ;;  %vm89_vm13 = vcmask 261312   ;;  %vm96_vm14 = vcmask 195712  }
   0xb   :  { %s161_s23 = smov 32   ;;  %v132_v14 = vld [vmem:[%s229_s0 + $0x2] ss:$16 sm:%s92_s21]   ;;  %s99_s28 = smov 3  ;;  %vm103_vm15 = vcmask 130112  }
   0xc   :  { %s162_s29 = smov 24   ;;  %s163_s30 = smov 16   ;;  %v133_v15 = vld [vmem:[%s229_s0 + $0x1] ss:$16 sm:%s99_s28]  }
   0xd   :  { %s164_s0 = smov 8  }
   0xe   :  { %45 = vrot.lane.b32.xlu0 %v125_v6, %s156_s4  ;;  %52 = vrot.lane.b32.xlu1 %v126_v7, %s157_s5 }
  0x12   :  { %59 = vrot.lane.b32.xlu0 %v127_v9, %s158_s14  ;;  %66 = vrot.lane.b32.xlu1 %v128_v10, %s159_s15 }
  0x16   :  { %73 = vrot.lane.b32.xlu0 %v129_v11, %s160_s22  ;;  %80 = vrot.lane.b32.xlu1 %v130_v12, %s161_s23 }
  0x1a   :  { %87 = vrot.lane.b32.xlu0 %v131_v13, %s162_s29  ;;  %94 = vrot.lane.b32.xlu1 %v132_v14, %s163_s30 }
  0x1e   :  { %101 = vrot.lane.b32.xlu0 %v133_v15, %s164_s0 }
  0x74   :  { %v9_v16 = vpop.permute.xlu0 %8   ;;  %v21_v17 = vpop.permute.xlu1 %20  }
  0x75   :  { %11 = vst.msk [vmem:[#allocation0] sm:$0x1] %vm10_vm1, %v9_v16  }
  0x78   :  { %v15_v18 = vpop.permute.xlu0 %14   ;;  %v27_v19 = vpop.permute.xlu1 %26  }
  0x79   :  { %17 = vst.msk [vmem:[#allocation0] sm:$0x1] %vm16_vm2, %v15_v18  }
  0x7a   :  { %23 = vst.msk [vmem:[#allocation0] sm:$0x1] %vm22_vm3, %v21_v17  }
  0x7b   :  { %29 = vst.msk [vmem:[#allocation0] sm:$0x1] %vm28_vm4, %v27_v19  }
  0x7c   :  { %v33_v20 = vpop.permute.xlu0 %32   ;;  %v39_v21 = vpop.permute.xlu1 %38  }
  0x7d   :  { %35 = vst.msk [vmem:[#allocation0] sm:$0x1] %vm34_vm5, %v33_v20  }
  0x7e   :  { %41 = vst.msk [vmem:[#allocation0] sm:$0x1] %vm40_vm6, %v39_v21  }
  0x80   :  { %v46_v22 = vpop.permute.xlu0 %45   ;;  %v53_v23 = vpop.permute.xlu1 %52  }
  0x81   :  { %48 = vst.msk [vmem:[#allocation0] ss:$8 sm:$0x3] %vm47_vm7, %v46_v22  }
  0x82   :  { %55 = vst.msk [vmem:[#allocation0] ss:$8 sm:$0x3] %vm54_vm8, %v53_v23  }
  0x84   :  { %v60_v24 = vpop.permute.xlu0 %59   ;;  %v67_v25 = vpop.permute.xlu1 %66  }
  0x85   :  { %62 = vst.msk [vmem:[#allocation0] ss:$8 sm:$0x3] %vm61_vm9, %v60_v24  }
  0x86   :  { %69 = vst.msk [vmem:[#allocation0] ss:$8 sm:$0x3] %vm68_vm10, %v67_v25  }
  0x88   :  { %v74_v26 = vpop.permute.xlu0 %73   ;;  %v81_v27 = vpop.permute.xlu1 %80  }
  0x89   :  { %76 = vst.msk [vmem:[#allocation0] ss:$8 sm:$0x3] %vm75_vm11, %v74_v26  }
  0x8a   :  { %83 = vst.msk [vmem:[#allocation0] ss:$8 sm:$0x3] %vm82_vm12, %v81_v27  }
  0x8c   :  { %v88_v28 = vpop.permute.xlu0 %87   ;;  %v95_v29 = vpop.permute.xlu1 %94  }
  0x8d   :  { %90 = vst.msk [vmem:[#allocation0] ss:$8 sm:$0x3] %vm89_vm13, %v88_v28  }
  0x8e   :  { %97 = vst.msk [vmem:[#allocation0] ss:$8 sm:$0x3] %vm96_vm14, %v95_v29  }
  0x90   :  { %v102_v30 = vpop.permute.xlu0 %101  }
  0x91   :  { %104 = vst.msk [vmem:[#allocation0] ss:$8 sm:$0x3] %vm103_vm15, %v102_v30  }
  0x98   :  { %v109_v31 = vld [vmem:[#allocation0] sm:$0x1]  ;;  %v114_v32 = vld [vmem:[#allocation0 + $0x8] sm:$0x1] }
  0x99   :  { %112 = vst [vmem:[%s230_s1] sm:$0x1] %v109_v31  ;;  %134 = vst [vmem:[%s230_s1 + $0x1] sm:$0x1] %v114_v32 }

// kernel: tile.93
= control target key start
LH: loop header
LB: loop body
LE: loop exit
PB: predicated region body
PF: predicated region fallthrough
CT: control target
= control target key end

     0   :  { %2 = vsyncpa [#allocation1], 0  ;;  %s51_s6 = smov [#allocation0]   ;;  %s77_s0 = inlined_call_operand.hbm [shape: f32[8], index: 0, kind: input, shape index: {}]   ;;  %s78_s1 = inlined_call_operand.vmem [shape: f32[26,8], index: 1, kind: output, shape index: {}]  }
   0x1   :  { %s9_s7 = sshll.u32 %s51_s6, 4  ;;  %s10_s7 = int_to_ptr.vmem [resolvable:$true] %s9_s7 }
   0x2   :  { %s37_s8 = scalar_lea.vmem %s10_s7, 16  ;;  %s41_s9 = scalar_lea.vmem %s10_s7, 32 }
   0x3   :  { %p38_p0 = scmp.ne.s32.totalorder %s10_s7, %s37_s8  ;;  %p42_p1 = scmp.lt.s32.totalorder %s10_s7, %s10_s7 }
   0x4   :  { %p43_p2 = scmp.lt.s32.totalorder %s41_s9, %s37_s8 }
   0x6   :  { %p44_p3 = por %p43_p2, %p42_p1 }
   0x8   :  { %p45_p4 = pnand %p44_p3, %p38_p0 }
   0xa   :  { %48 = shalt.err (!%p45_p4)
}
   0xb   :  { %12 = dma.hbm_to_vmem [thread:$0]  %s77_s0, 16, %s10_s7, [#allocation1]  }
   0xc   :  { %49 = dma.done.wait [#allocation1], 16  }
   0xd   :  { %50 = vsyncadd [#allocation1], 4294967280  ;;  %v16_v0 = vld [vmem:[#allocation0] ss:$0 sm:$0xff] }
   0xe   :  { %17 = vst [vmem:[%s78_s1] sm:$0xff] %v16_v0  ;;  %25 = vst [vmem:[%s78_s1 + $0x8] sm:$0xff] %v16_v0 }
   0xf   :  { %26 = vst [vmem:[%s78_s1 + $0x10] sm:$0xff] %v16_v0  ;;  %27 = vst [vmem:[%s78_s1 + $0x18] sm:$0xff] %v16_v0 }
  0x10   :  { %24 = vsyncpa [#allocation1], 1 }

// kernel: tile.112
= control target key start
LH: loop header
LB: loop body
LE: loop exit
PB: predicated region body
PF: predicated region fallthrough
CT: control target
= control target key end

     0   :  { %s34_s0 = inlined_call_operand.vmem [shape: f32[8], index: 0, kind: input, shape index: {}]   ;;  %s35_s1 = inlined_call_operand.vmem [shape: f32[24,8], index: 1, kind: output, shape index: {}]  }
   0x1   :  { %v4_v0 = vld [vmem:[%s34_s0] ss:$0 sm:$0xff] }
   0x2   :  { %5 = vst [vmem:[%s35_s1] sm:$0xff] %v4_v0  ;;  %10 = vst [vmem:[%s35_s1 + $0x8] sm:$0xff] %v4_v0 }
   0x3   :  { %11 = vst [vmem:[%s35_s1 + $0x10] sm:$0xff] %v4_v0 }

// kernel: tile.118
= control target key start
LH: loop header
LB: loop body
LE: loop exit
PB: predicated region body
PF: predicated region fallthrough
CT: control target
= control target key end

     0   :  { %s148_s10 = smov 120   ;;  %s149_s11 = smov 104   ;;  %vm4_vm0 = vcmask 64512   ;;  %vm10_vm1 = vcmask 1048512   ;;  %vm16_vm2 = vcmask 982912   ;;  %vm22_vm3 = vcmask 917312   ;;  %s227_s0 = inlined_call_operand.vmem [shape: f32[24,8], index: 0, kind: input, shape index: {}]   ;;  %s228_s1 = inlined_call_operand.vmem [shape: f32[1,192], index: 1, kind: output, shape index: {}]  }
   0x1   :  { %v117_v0 = vld [vmem:[%s227_s0 + $0xf] sm:$0x1]   ;;  %v119_v1 = vld [vmem:[%s227_s0 + $0xd] sm:$0x1]   ;;  %v118_v2 = vld [vmem:[%s227_s0 + $0xe] sm:$0x1]  }
   0x2   :  { %8 = vrot.lane.b32.xlu0 %v117_v0, %s148_s10  ;;  %20 = vrot.lane.b32.xlu1 %v119_v1, %s149_s11  ;;  %v120_v3 = vld [vmem:[%s227_s0 + $0xc] sm:$0x1]   ;;  %s150_s16 = smov 112   ;;  %s151_s17 = smov 96   ;;  %v121_v4 = vld [vmem:[%s227_s0 + $0xb] sm:$0x1]  }
   0x3   :  { %v122_v5 = vld [vmem:[%s227_s0 + $0xa] sm:$0x1]   ;;  %s152_s22 = smov 88   ;;  %s153_s23 = smov 80   ;;  %v123_v6 = vld [vmem:[%s227_s0 + $0x9] sm:$0x1]  }
   0x4   :  { %v124_v7 = vld [vmem:[%s227_s0 + $0x8] sm:$0x1]   ;;  %s55_s28 = smov 3  ;;  %s62_s29 = smov 3  ;;  %vm28_vm4 = vcmask 851712   ;;  %vm34_vm5 = vcmask 786112  }
   0x5   :  { %s2_s30 = smov 3  ;;  %s154_s4 = smov 72   ;;  %v125_v9 = vld [vmem:[%s227_s0 + $0x7] ss:$16 sm:%s55_s28]   ;;  %v126_v10 = vld [vmem:[%s227_s0 + $0x6] ss:$16 sm:%s62_s29]  }
   0x6   :  { %14 = vrot.lane.b32.xlu0 %v118_v2, %s150_s16  ;;  %26 = vrot.lane.b32.xlu1 %v120_v3, %s151_s17  ;;  %v3_v8 = vld [vmem:[%s227_s0] ss:$16 sm:%s2_s30]   ;;  %s155_s5 = smov 64   ;;  %s69_s10 = smov 3  ;;  %vm40_vm6 = vcmask 720512   ;;  %vm46_vm7 = vcmask 654912  }
   0x7   :  { %5 = vst.msk [vmem:[#allocation0] ss:$8 sm:$0x3] %vm4_vm0, %v3_v8   ;;  %s76_s11 = smov 3  ;;  %s156_s12 = smov 56   ;;  %vm52_vm8 = vcmask 589312  }
   0x8   :  { %s157_s13 = smov 48   ;;  %v127_v11 = vld [vmem:[%s227_s0 + $0x5] ss:$16 sm:%s69_s10]   ;;  %v128_v12 = vld [vmem:[%s227_s0 + $0x4] ss:$16 sm:%s76_s11]   ;;  %s83_s18 = smov 3 }
   0x9   :  { %s90_s19 = smov 3  ;;  %s158_s20 = smov 40   ;;  %v129_v13 = vld [vmem:[%s227_s0 + $0x3] ss:$16 sm:%s83_s18]   ;;  %vm59_vm9 = vcmask 523712   ;;  %vm66_vm10 = vcmask 458112  }
   0xa   :  { %32 = vrot.lane.b32.xlu0 %v121_v4, %s152_s22  ;;  %38 = vrot.lane.b32.xlu1 %v122_v5, %s153_s23  ;;  %s159_s21 = smov 32   ;;  %v130_v14 = vld [vmem:[%s227_s0 + $0x2] ss:$16 sm:%s90_s19]   ;;  %s97_s26 = smov 3  ;;  %vm73_vm11 = vcmask 392512   ;;  %vm80_vm12 = vcmask 326912  }
   0xb   :  { %s160_s27 = smov 24   ;;  %s161_s28 = smov 16   ;;  %v131_v15 = vld [vmem:[%s227_s0 + $0x1] ss:$16 sm:%s97_s26]   ;;  %vm87_vm13 = vcmask 261312   ;;  %vm94_vm14 = vcmask 195712  }
   0xc   :  { %s162_s0 = smov 8   ;;  %vm101_vm15 = vcmask 130112  }
   0xe   :  { %44 = vrot.lane.b32.xlu0 %v123_v6, %s154_s4  ;;  %50 = vrot.lane.b32.xlu1 %v124_v7, %s155_s5 }
  0x12   :  { %57 = vrot.lane.b32.xlu0 %v125_v9, %s156_s12  ;;  %64 = vrot.lane.b32.xlu1 %v126_v10, %s157_s13 }
  0x16   :  { %71 = vrot.lane.b32.xlu0 %v127_v11, %s158_s20  ;;  %78 = vrot.lane.b32.xlu1 %v128_v12, %s159_s21 }
  0x1a   :  { %85 = vrot.lane.b32.xlu0 %v129_v13, %s160_s27  ;;  %92 = vrot.lane.b32.xlu1 %v130_v14, %s161_s28 }
  0x1e   :  { %99 = vrot.lane.b32.xlu0 %v131_v15, %s162_s0 }
  0x74   :  { %v9_v16 = vpop.permute.xlu0 %8   ;;  %v21_v17 = vpop.permute.xlu1 %20  }
  0x75   :  { %11 = vst.msk [vmem:[#allocation0] sm:$0x1] %vm10_vm1, %v9_v16  }
  0x78   :  { %v15_v18 = vpop.permute.xlu0 %14   ;;  %v27_v19 = vpop.permute.xlu1 %26  }
  0x79   :  { %17 = vst.msk [vmem:[#allocation0] sm:$0x1] %vm16_vm2, %v15_v18  }
  0x7a   :  { %23 = vst.msk [vmem:[#allocation0] sm:$0x1] %vm22_vm3, %v21_v17  }
  0x7b   :  { %29 = vst.msk [vmem:[#allocation0] sm:$0x1] %vm28_vm4, %v27_v19  }
  0x7c   :  { %v33_v20 = vpop.permute.xlu0 %32   ;;  %v39_v21 = vpop.permute.xlu1 %38  }
  0x7d   :  { %35 = vst.msk [vmem:[#allocation0] sm:$0x1] %vm34_vm5, %v33_v20  }
  0x7e   :  { %41 = vst.msk [vmem:[#allocation0] sm:$0x1] %vm40_vm6, %v39_v21  }
  0x80   :  { %v45_v22 = vpop.permute.xlu0 %44   ;;  %v51_v23 = vpop.permute.xlu1 %50  }
  0x81   :  { %47 = vst.msk [vmem:[#allocation0] sm:$0x1] %vm46_vm7, %v45_v22  }
  0x82   :  { %53 = vst.msk [vmem:[#allocation0] sm:$0x1] %vm52_vm8, %v51_v23  }
  0x84   :  { %v58_v24 = vpop.permute.xlu0 %57   ;;  %v65_v25 = vpop.permute.xlu1 %64  }
  0x85   :  { %60 = vst.msk [vmem:[#allocation0] ss:$8 sm:$0x3] %vm59_vm9, %v58_v24  }
  0x86   :  { %67 = vst.msk [vmem:[#allocation0] ss:$8 sm:$0x3] %vm66_vm10, %v65_v25  }
  0x88   :  { %v72_v26 = vpop.permute.xlu0 %71   ;;  %v79_v27 = vpop.permute.xlu1 %78  }
  0x89   :  { %74 = vst.msk [vmem:[#allocation0] ss:$8 sm:$0x3] %vm73_vm11, %v72_v26  }
  0x8a   :  { %81 = vst.msk [vmem:[#allocation0] ss:$8 sm:$0x3] %vm80_vm12, %v79_v27  }
  0x8c   :  { %v86_v28 = vpop.permute.xlu0 %85   ;;  %v93_v29 = vpop.permute.xlu1 %92  }
  0x8d   :  { %88 = vst.msk [vmem:[#allocation0] ss:$8 sm:$0x3] %vm87_vm13, %v86_v28  }
  0x8e   :  { %95 = vst.msk [vmem:[#allocation0] ss:$8 sm:$0x3] %vm94_vm14, %v93_v29  }
  0x90   :  { %v100_v30 = vpop.permute.xlu0 %99  }
  0x91   :  { %102 = vst.msk [vmem:[#allocation0] ss:$8 sm:$0x3] %vm101_vm15, %v100_v30  }
  0x98   :  { %v107_v31 = vld [vmem:[#allocation0] sm:$0x1]  ;;  %v112_v32 = vld [vmem:[#allocation0 + $0x8] sm:$0x1] }
  0x99   :  { %110 = vst [vmem:[%s228_s1] sm:$0x1] %v107_v31  ;;  %132 = vst [vmem:[%s228_s1 + $0x1] sm:$0x1] %v112_v32 }

// kernel: tile.108
= control target key start
LH: loop header
LB: loop body
LE: loop exit
PB: predicated region body
PF: predicated region fallthrough
CT: control target
= control target key end

     0   :  { %2 = vsyncpa [#allocation1], 0  ;;  %s48_s6 = smov [#allocation0]   ;;  %s71_s0 = inlined_call_operand.hbm [shape: f32[8], index: 0, kind: input, shape index: {}]   ;;  %s72_s1 = inlined_call_operand.vmem [shape: f32[24,8], index: 1, kind: output, shape index: {}]  }
   0x1   :  { %s9_s7 = sshll.u32 %s48_s6, 4  ;;  %s10_s7 = int_to_ptr.vmem [resolvable:$true] %s9_s7 }
   0x2   :  { %s34_s8 = scalar_lea.vmem %s10_s7, 16  ;;  %s38_s9 = scalar_lea.vmem %s10_s7, 32 }
   0x3   :  { %p35_p0 = scmp.ne.s32.totalorder %s10_s7, %s34_s8  ;;  %p39_p1 = scmp.lt.s32.totalorder %s10_s7, %s10_s7 }
   0x4   :  { %p40_p2 = scmp.lt.s32.totalorder %s38_s9, %s34_s8 }
   0x6   :  { %p41_p3 = por %p40_p2, %p39_p1 }
   0x8   :  { %p42_p4 = pnand %p41_p3, %p35_p0 }
   0xa   :  { %45 = shalt.err (!%p42_p4)
}
   0xb   :  { %12 = dma.hbm_to_vmem [thread:$0]  %s71_s0, 16, %s10_s7, [#allocation1]  }
   0xc   :  { %46 = dma.done.wait [#allocation1], 16  }
   0xd   :  { %47 = vsyncadd [#allocation1], 4294967280  ;;  %v16_v0 = vld [vmem:[#allocation0] ss:$0 sm:$0xff] }
   0xe   :  { %17 = vst [vmem:[%s72_s1] sm:$0xff] %v16_v0  ;;  %23 = vst [vmem:[%s72_s1 + $0x8] sm:$0xff] %v16_v0 }
   0xf   :  { %24 = vst [vmem:[%s72_s1 + $0x10] sm:$0xff] %v16_v0 }
  0x10   :  { %22 = vsyncpa [#allocation1], 1 }

// kernel: tile.133
= control target key start
LH: loop header
LB: loop body
LE: loop exit
PB: predicated region body
PF: predicated region fallthrough
CT: control target
= control target key end

     0   :  { %s146_s10 = smov 120   ;;  %s147_s11 = smov 104   ;;  %vm4_vm0 = vcmask 64512   ;;  %vm10_vm1 = vcmask 1048512   ;;  %vm16_vm2 = vcmask 982912   ;;  %vm22_vm3 = vcmask 917312   ;;  %s225_s0 = inlined_call_operand.vmem [shape: f32[22,8], index: 0, kind: input, shape index: {}]   ;;  %s226_s1 = inlined_call_operand.vmem [shape: f32[1,176], index: 1, kind: output, shape index: {}]  }
   0x1   :  { %v115_v0 = vld [vmem:[%s225_s0 + $0xf] sm:$0x1]   ;;  %v117_v1 = vld [vmem:[%s225_s0 + $0xd] sm:$0x1]   ;;  %v116_v2 = vld [vmem:[%s225_s0 + $0xe] sm:$0x1]  }
   0x2   :  { %8 = vrot.lane.b32.xlu0 %v115_v0, %s146_s10  ;;  %20 = vrot.lane.b32.xlu1 %v117_v1, %s147_s11  ;;  %v118_v3 = vld [vmem:[%s225_s0 + $0xc] sm:$0x1]   ;;  %s148_s16 = smov 112   ;;  %s149_s17 = smov 96   ;;  %v119_v4 = vld [vmem:[%s225_s0 + $0xb] sm:$0x1]  }
   0x3   :  { %v120_v5 = vld [vmem:[%s225_s0 + $0xa] sm:$0x1]   ;;  %s150_s22 = smov 88   ;;  %s151_s23 = smov 80   ;;  %v121_v6 = vld [vmem:[%s225_s0 + $0x9] sm:$0x1]  }
   0x4   :  { %v122_v7 = vld [vmem:[%s225_s0 + $0x8] sm:$0x1]   ;;  %s2_s28 = smov 3  ;;  %s152_s2 = smov 72   ;;  %v123_v9 = vld [vmem:[%s225_s0 + $0x7] sm:$0x1]  }
   0x5   :  { %v3_v8 = vld [vmem:[%s225_s0] ss:$16 sm:%s2_s28]   ;;  %s153_s3 = smov 64   ;;  %v124_v10 = vld [vmem:[%s225_s0 + $0x6] sm:$0x1]   ;;  %s67_s8 = smov 3 }
   0x6   :  { %14 = vrot.lane.b32.xlu0 %v116_v2, %s148_s16  ;;  %26 = vrot.lane.b32.xlu1 %v118_v3, %s149_s17  ;;  %5 = vst.msk [vmem:[#allocation0] ss:$8 sm:$0x3] %vm4_vm0, %v3_v8   ;;  %s74_s9 = smov 3  ;;  %s154_s10 = smov 56   ;;  %vm28_vm4 = vcmask 851712  }
   0x7   :  { %s155_s11 = smov 48   ;;  %v125_v11 = vld [vmem:[%s225_s0 + $0x5] ss:$16 sm:%s67_s8]   ;;  %v126_v12 = vld [vmem:[%s225_s0 + $0x4] ss:$16 sm:%s74_s9]   ;;  %s81_s16 = smov 3 }
   0x8   :  { %s88_s17 = smov 3  ;;  %s156_s18 = smov 40   ;;  %v127_v13 = vld [vmem:[%s225_s0 + $0x3] ss:$16 sm:%s81_s16]   ;;  %vm34_vm5 = vcmask 786112   ;;  %vm40_vm6 = vcmask 720512  }
   0x9   :  { %s157_s19 = smov 32   ;;  %v128_v14 = vld [vmem:[%s225_s0 + $0x2] ss:$16 sm:%s88_s17]   ;;  %s95_s24 = smov 3  ;;  %vm46_vm7 = vcmask 654912   ;;  %vm52_vm8 = vcmask 589312  }
   0xa   :  { %32 = vrot.lane.b32.xlu0 %v119_v4, %s150_s22  ;;  %38 = vrot.lane.b32.xlu1 %v120_v5, %s151_s23  ;;  %s158_s25 = smov 24   ;;  %s159_s26 = smov 16   ;;  %v129_v15 = vld [vmem:[%s225_s0 + $0x1] ss:$16 sm:%s95_s24]   ;;  %vm58_vm9 = vcmask 523712   ;;  %vm64_vm10 = vcmask 458112  }
   0xb   :  { %s160_s0 = smov 8   ;;  %vm71_vm11 = vcmask 392512   ;;  %vm78_vm12 = vcmask 326912   ;;  %vm85_vm13 = vcmask 261312   ;;  %vm92_vm14 = vcmask 195712  }
   0xc   :  { %vm99_vm15 = vcmask 130112  }
   0xe   :  { %44 = vrot.lane.b32.xlu0 %v121_v6, %s152_s2  ;;  %50 = vrot.lane.b32.xlu1 %v122_v7, %s153_s3 }
  0x12   :  { %56 = vrot.lane.b32.xlu0 %v123_v9, %s154_s10  ;;  %62 = vrot.lane.b32.xlu1 %v124_v10, %s155_s11 }
  0x16   :  { %69 = vrot.lane.b32.xlu0 %v125_v11, %s156_s18  ;;  %76 = vrot.lane.b32.xlu1 %v126_v12, %s157_s19 }
  0x1a   :  { %83 = vrot.lane.b32.xlu0 %v127_v13, %s158_s25  ;;  %90 = vrot.lane.b32.xlu1 %v128_v14, %s159_s26 }
  0x1e   :  { %97 = vrot.lane.b32.xlu0 %v129_v15, %s160_s0 }
  0x74   :  { %v9_v16 = vpop.permute.xlu0 %8   ;;  %v21_v17 = vpop.permute.xlu1 %20  }
  0x75   :  { %11 = vst.msk [vmem:[#allocation0] sm:$0x1] %vm10_vm1, %v9_v16  }
  0x78   :  { %v15_v18 = vpop.permute.xlu0 %14   ;;  %v27_v19 = vpop.permute.xlu1 %26  }
  0x79   :  { %17 = vst.msk [vmem:[#allocation0] sm:$0x1] %vm16_vm2, %v15_v18  }
  0x7a   :  { %23 = vst.msk [vmem:[#allocation0] sm:$0x1] %vm22_vm3, %v21_v17  }
  0x7b   :  { %29 = vst.msk [vmem:[#allocation0] sm:$0x1] %vm28_vm4, %v27_v19  }
  0x7c   :  { %v33_v20 = vpop.permute.xlu0 %32   ;;  %v39_v21 = vpop.permute.xlu1 %38  }
  0x7d   :  { %35 = vst.msk [vmem:[#allocation0] sm:$0x1] %vm34_vm5, %v33_v20  }
  0x7e   :  { %41 = vst.msk [vmem:[#allocation0] sm:$0x1] %vm40_vm6, %v39_v21  }
  0x80   :  { %v45_v22 = vpop.permute.xlu0 %44   ;;  %v51_v23 = vpop.permute.xlu1 %50  }
  0x81   :  { %47 = vst.msk [vmem:[#allocation0] sm:$0x1] %vm46_vm7, %v45_v22  }
  0x82   :  { %53 = vst.msk [vmem:[#allocation0] sm:$0x1] %vm52_vm8, %v51_v23  }
  0x84   :  { %v57_v24 = vpop.permute.xlu0 %56   ;;  %v63_v25 = vpop.permute.xlu1 %62  }
  0x85   :  { %59 = vst.msk [vmem:[#allocation0] sm:$0x1] %vm58_vm9, %v57_v24  }
  0x86   :  { %65 = vst.msk [vmem:[#allocation0] sm:$0x1] %vm64_vm10, %v63_v25  }
  0x88   :  { %v70_v26 = vpop.permute.xlu0 %69   ;;  %v77_v27 = vpop.permute.xlu1 %76  }
  0x89   :  { %72 = vst.msk [vmem:[#allocation0] ss:$8 sm:$0x3] %vm71_vm11, %v70_v26  }
  0x8a   :  { %79 = vst.msk [vmem:[#allocation0] ss:$8 sm:$0x3] %vm78_vm12, %v77_v27  }
  0x8c   :  { %v84_v28 = vpop.permute.xlu0 %83   ;;  %v91_v29 = vpop.permute.xlu1 %90  }
  0x8d   :  { %86 = vst.msk [vmem:[#allocation0] ss:$8 sm:$0x3] %vm85_vm13, %v84_v28  }
  0x8e   :  { %93 = vst.msk [vmem:[#allocation0] ss:$8 sm:$0x3] %vm92_vm14, %v91_v29  }
  0x90   :  { %v98_v30 = vpop.permute.xlu0 %97  }
  0x91   :  { %100 = vst.msk [vmem:[#allocation0] ss:$8 sm:$0x3] %vm99_vm15, %v98_v30  }
  0x98   :  { %v105_v31 = vld [vmem:[#allocation0] sm:$0x1]  ;;  %v110_v32 = vld [vmem:[#allocation0 + $0x8] sm:$0x1] }
  0x99   :  { %108 = vst [vmem:[%s226_s1] sm:$0x1] %v105_v31  ;;  %130 = vst [vmem:[%s226_s1 + $0x1] sm:$0x1] %v110_v32 }

// kernel: tile.127
= control target key start
LH: loop header
LB: loop body
LE: loop exit
PB: predicated region body
PF: predicated region fallthrough
CT: control target
= control target key end

     0   :  { %s34_s0 = inlined_call_operand.vmem [shape: f32[8], index: 0, kind: input, shape index: {}]   ;;  %s35_s1 = inlined_call_operand.vmem [shape: f32[22,8], index: 1, kind: output, shape index: {}]  }
   0x1   :  { %v4_v0 = vld [vmem:[%s34_s0] ss:$0 sm:$0xff] }
   0x2   :  { %5 = vst [vmem:[%s35_s1] sm:$0xff] %v4_v0  ;;  %10 = vst [vmem:[%s35_s1 + $0x8] sm:$0xff] %v4_v0 }
   0x3   :  { %11 = vst [vmem:[%s35_s1 + $0x10] sm:$0xff] %v4_v0 }

// kernel: tile.123
= control target key start
LH: loop header
LB: loop body
LE: loop exit
PB: predicated region body
PF: predicated region fallthrough
CT: control target
= control target key end

     0   :  { %2 = vsyncpa [#allocation1], 0  ;;  %s48_s6 = smov [#allocation0]   ;;  %s71_s0 = inlined_call_operand.hbm [shape: f32[8], index: 0, kind: input, shape index: {}]   ;;  %s72_s1 = inlined_call_operand.vmem [shape: f32[22,8], index: 1, kind: output, shape index: {}]  }
   0x1   :  { %s9_s7 = sshll.u32 %s48_s6, 4  ;;  %s10_s7 = int_to_ptr.vmem [resolvable:$true] %s9_s7 }
   0x2   :  { %s34_s8 = scalar_lea.vmem %s10_s7, 16  ;;  %s38_s9 = scalar_lea.vmem %s10_s7, 32 }
   0x3   :  { %p35_p0 = scmp.ne.s32.totalorder %s10_s7, %s34_s8  ;;  %p39_p1 = scmp.lt.s32.totalorder %s10_s7, %s10_s7 }
   0x4   :  { %p40_p2 = scmp.lt.s32.totalorder %s38_s9, %s34_s8 }
   0x6   :  { %p41_p3 = por %p40_p2, %p39_p1 }
   0x8   :  { %p42_p4 = pnand %p41_p3, %p35_p0 }
   0xa   :  { %45 = shalt.err (!%p42_p4)
}
   0xb   :  { %12 = dma.hbm_to_vmem [thread:$0]  %s71_s0, 16, %s10_s7, [#allocation1]  }
   0xc   :  { %46 = dma.done.wait [#allocation1], 16  }
   0xd   :  { %47 = vsyncadd [#allocation1], 4294967280  ;;  %v16_v0 = vld [vmem:[#allocation0] ss:$0 sm:$0xff] }
   0xe   :  { %17 = vst [vmem:[%s72_s1] sm:$0xff] %v16_v0  ;;  %23 = vst [vmem:[%s72_s1 + $0x8] sm:$0xff] %v16_v0 }
   0xf   :  { %24 = vst [vmem:[%s72_s1 + $0x10] sm:$0xff] %v16_v0 }
  0x10   :  { %22 = vsyncpa [#allocation1], 1 }

// kernel: tile.142
= control target key start
LH: loop header
LB: loop body
LE: loop exit
PB: predicated region body
PF: predicated region fallthrough
CT: control target
= control target key end

     0   :  { %s28_s0 = inlined_call_operand.vmem [shape: f32[16], index: 0, kind: input, shape index: {}]   ;;  %s29_s1 = inlined_call_operand.vmem [shape: f32[9,16], index: 1, kind: output, shape index: {}]  }
   0x1   :  { %v4_v0 = vld [vmem:[%s28_s0] ss:$0 sm:$0xff] }
   0x2   :  { %5 = vst [vmem:[%s29_s1] sm:$0xff] %v4_v0  ;;  %8 = vst [vmem:[%s29_s1 + $0x8] sm:$0xff] %v4_v0 }

// kernel: tile.148
= control target key start
LH: loop header
LB: loop body
LE: loop exit
PB: predicated region body
PF: predicated region fallthrough
CT: control target
= control target key end

     0   :  { %s77_s10 = smov 112   ;;  %s78_s11 = smov 80   ;;  %vm4_vm0 = vcmask 130048   ;;  %vm10_vm1 = vcmask 1048448   ;;  %vm16_vm2 = vcmask 917248   ;;  %vm22_vm3 = vcmask 786048   ;;  %s124_s0 = inlined_call_operand.vmem [shape: f32[9,16], index: 0, kind: input, shape index: {}]   ;;  %s125_s1 = inlined_call_operand.vmem [shape: f32[1,144], index: 1, kind: output, shape index: {}]  }
   0x1   :  { %v62_v0 = vld [vmem:[%s124_s0 + $0x7] sm:$0x1]   ;;  %v64_v1 = vld [vmem:[%s124_s0 + $0x5] sm:$0x1]   ;;  %v63_v2 = vld [vmem:[%s124_s0 + $0x6] sm:$0x1]  }
   0x2   :  { %8 = vrot.lane.b32.xlu0 %v62_v0, %s77_s10  ;;  %20 = vrot.lane.b32.xlu1 %v64_v1, %s78_s11  ;;  %v65_v3 = vld [vmem:[%s124_s0 + $0x4] sm:$0x1]   ;;  %s2_s16 = smov 3  ;;  %s79_s19 = smov 96   ;;  %v66_v5 = vld [vmem:[%s124_s0 + $0x3] sm:$0x1]  }
   0x3   :  { %v3_v4 = vld [vmem:[%s124_s0] ss:$8 sm:%s2_s16]   ;;  %s80_s20 = smov 64   ;;  %v67_v6 = vld [vmem:[%s124_s0 + $0x2] sm:$0x1]   ;;  %s81_s25 = smov 48  }
   0x4   :  { %5 = vst.msk [vmem:[#allocation0] ss:$8 sm:$0x3] %vm4_vm0, %v3_v4   ;;  %s82_s26 = smov 32   ;;  %v68_v7 = vld [vmem:[%s124_s0 + $0x1] sm:$0x1]  }
   0x5   :  { %s83_s0 = smov 16   ;;  %vm28_vm4 = vcmask 654848   ;;  %vm34_vm5 = vcmask 523648   ;;  %vm40_vm6 = vcmask 392448   ;;  %vm46_vm7 = vcmask 261248  }
   0x6   :  { %14 = vrot.lane.b32.xlu0 %v63_v2, %s79_s19  ;;  %26 = vrot.lane.b32.xlu1 %v65_v3, %s80_s20 }
   0xa   :  { %32 = vrot.lane.b32.xlu0 %v66_v5, %s81_s25  ;;  %38 = vrot.lane.b32.xlu1 %v67_v6, %s82_s26 }
   0xb   :  { %v57_v8 = vld [vmem:[#allocation0 + $0x8] sm:$0x1] }
   0xc   :  { %69 = vst [vmem:[%s125_s1 + $0x1] sm:$0x1] %v57_v8 }
   0xe   :  { %44 = vrot.lane.b32.xlu0 %v68_v7, %s83_s0 }
  0x74   :  { %v9_v9 = vpop.permute.xlu0 %8   ;;  %v21_v10 = vpop.permute.xlu1 %20  }
  0x75   :  { %11 = vst.msk [vmem:[#allocation0] sm:$0x1] %vm10_vm1, %v9_v9  }
  0x78   :  { %v15_v11 = vpop.permute.xlu0 %14   ;;  %v27_v12 = vpop.permute.xlu1 %26  }
  0x79   :  { %17 = vst.msk [vmem:[#allocation0] sm:$0x1] %vm16_vm2, %v15_v11  }
  0x7a   :  { %23 = vst.msk [vmem:[#allocation0] sm:$0x1] %vm22_vm3, %v21_v10  }
  0x7b   :  { %29 = vst.msk [vmem:[#allocation0] sm:$0x1] %vm28_vm4, %v27_v12  }
  0x7c   :  { %v33_v13 = vpop.permute.xlu0 %32   ;;  %v39_v14 = vpop.permute.xlu1 %38  }
  0x7d   :  { %35 = vst.msk [vmem:[#allocation0] sm:$0x1] %vm34_vm5, %v33_v13  }
  0x7e   :  { %41 = vst.msk [vmem:[#allocation0] sm:$0x1] %vm40_vm6, %v39_v14  }
  0x80   :  { %v45_v15 = vpop.permute.xlu0 %44  }
  0x81   :  { %47 = vst.msk [vmem:[#allocation0] sm:$0x1] %vm46_vm7, %v45_v15  }
  0x88   :  { %v52_v16 = vld [vmem:[#allocation0] sm:$0x1] }
  0x89   :  { %55 = vst [vmem:[%s125_s1] sm:$0x1] %v52_v16 }

// kernel: tile.138
= control target key start
LH: loop header
LB: loop body
LE: loop exit
PB: predicated region body
PF: predicated region fallthrough
CT: control target
= control target key end

     0   :  { %2 = vsyncpa [#allocation1], 0  ;;  %s45_s6 = smov [#allocation0]   ;;  %s65_s0 = inlined_call_operand.hbm [shape: f32[16], index: 0, kind: input, shape index: {}]   ;;  %s66_s1 = inlined_call_operand.vmem [shape: f32[9,16], index: 1, kind: output, shape index: {}]  }
   0x1   :  { %s9_s7 = sshll.u32 %s45_s6, 4  ;;  %s10_s7 = int_to_ptr.vmem [resolvable:$true] %s9_s7 }
   0x2   :  { %s31_s8 = scalar_lea.vmem %s10_s7, 16  ;;  %s35_s9 = scalar_lea.vmem %s10_s7, 32 }
   0x3   :  { %p32_p0 = scmp.ne.s32.totalorder %s10_s7, %s31_s8  ;;  %p36_p1 = scmp.lt.s32.totalorder %s10_s7, %s10_s7 }
   0x4   :  { %p37_p2 = scmp.lt.s32.totalorder %s35_s9, %s31_s8 }
   0x6   :  { %p38_p3 = por %p37_p2, %p36_p1 }
   0x8   :  { %p39_p4 = pnand %p38_p3, %p32_p0 }
   0xa   :  { %42 = shalt.err (!%p39_p4)
}
   0xb   :  { %12 = dma.hbm_to_vmem [thread:$0]  %s65_s0, 16, %s10_s7, [#allocation1]  }
   0xc   :  { %43 = dma.done.wait [#allocation1], 16  }
   0xd   :  { %44 = vsyncadd [#allocation1], 4294967280  ;;  %v16_v0 = vld [vmem:[#allocation0] ss:$0 sm:$0xff] }
   0xe   :  { %17 = vst [vmem:[%s66_s1] sm:$0xff] %v16_v0  ;;  %21 = vst [vmem:[%s66_s1 + $0x8] sm:$0xff] %v16_v0 }
   0xf   :  { %20 = vsyncpa [#allocation1], 1 }

// kernel: tile.157
= control target key start
LH: loop header
LB: loop body
LE: loop exit
PB: predicated region body
PF: predicated region fallthrough
CT: control target
= control target key end

     0   :  { %s22_s0 = inlined_call_operand.vmem [shape: f32[16], index: 0, kind: input, shape index: {}]   ;;  %s23_s1 = inlined_call_operand.vmem [shape: f32[7,16], index: 1, kind: output, shape index: {}]  }
   0x1   :  { %v4_v0 = vld [vmem:[%s22_s0] ss:$0 sm:$0xff] }
   0x2   :  { %5 = vst [vmem:[%s23_s1] sm:$0xff] %v4_v0 }

// kernel: tile.163
= control target key start
LH: loop header
LB: loop body
LE: loop exit
PB: predicated region body
PF: predicated region fallthrough
CT: control target
= control target key end

     0   :  { %s61_s10 = smov 96   ;;  %s62_s11 = smov 64   ;;  %vm3_vm0 = vcmask 130048   ;;  %vm9_vm1 = vcmask 917248   ;;  %vm15_vm2 = vcmask 786048   ;;  %vm21_vm3 = vcmask 654848   ;;  %s101_s0 = inlined_call_operand.vmem [shape: f32[7,16], index: 0, kind: input, shape index: {}]   ;;  %s102_s1 = inlined_call_operand.vmem [shape: f32[1,112], index: 1, kind: output, shape index: {}]  }
   0x1   :  { %v49_v0 = vld [vmem:[%s101_s0 + $0x6] sm:$0x1]   ;;  %v51_v1 = vld [vmem:[%s101_s0 + $0x4] sm:$0x1]   ;;  %v50_v2 = vld [vmem:[%s101_s0 + $0x5] sm:$0x1]  }
   0x2   :  { %7 = vrot.lane.b32.xlu0 %v49_v0, %s61_s10  ;;  %19 = vrot.lane.b32.xlu1 %v51_v1, %s62_s11  ;;  %v52_v3 = vld [vmem:[%s101_s0 + $0x3] sm:$0x1]   ;;  %v2_v4 = vld [vmem:[%s101_s0] sm:$0x1]   ;;  %s63_s18 = smov 80   ;;  %s64_s19 = smov 48  }
   0x3   :  { %4 = vst.msk [vmem:[#allocation0] sm:$0x1] %vm3_vm0, %v2_v4   ;;  %v53_v5 = vld [vmem:[%s101_s0 + $0x2] sm:$0x1]   ;;  %v54_v6 = vld [vmem:[%s101_s0 + $0x1] sm:$0x1]  }
   0x4   :  { %s65_s0 = smov 32   ;;  %s66_s24 = smov 16   ;;  %vm27_vm4 = vcmask 523648   ;;  %vm33_vm5 = vcmask 392448   ;;  %vm39_vm6 = vcmask 261248  }
   0x6   :  { %13 = vrot.lane.b32.xlu0 %v50_v2, %s63_s18  ;;  %25 = vrot.lane.b32.xlu1 %v52_v3, %s64_s19 }
   0xa   :  { %31 = vrot.lane.b32.xlu0 %v53_v5, %s65_s0  ;;  %37 = vrot.lane.b32.xlu1 %v54_v6, %s66_s24 }
  0x74   :  { %v8_v7 = vpop.permute.xlu0 %7   ;;  %v20_v8 = vpop.permute.xlu1 %19  }
  0x75   :  { %10 = vst.msk [vmem:[#allocation0] sm:$0x1] %vm9_vm1, %v8_v7  }
  0x78   :  { %v14_v9 = vpop.permute.xlu0 %13   ;;  %v26_v10 = vpop.permute.xlu1 %25  }
  0x79   :  { %16 = vst.msk [vmem:[#allocation0] sm:$0x1] %vm15_vm2, %v14_v9  }
  0x7a   :  { %22 = vst.msk [vmem:[#allocation0] sm:$0x1] %vm21_vm3, %v20_v8  }
  0x7b   :  { %28 = vst.msk [vmem:[#allocation0] sm:$0x1] %vm27_vm4, %v26_v10  }
  0x7c   :  { %v32_v11 = vpop.permute.xlu0 %31   ;;  %v38_v12 = vpop.permute.xlu1 %37  }
  0x7d   :  { %34 = vst.msk [vmem:[#allocation0] sm:$0x1] %vm33_vm5, %v32_v11  }
  0x7e   :  { %40 = vst.msk [vmem:[#allocation0] sm:$0x1] %vm39_vm6, %v38_v12  }
  0x85   :  { %v45_v13 = vld [vmem:[#allocation0] sm:$0x1] }
  0x86   :  { %48 = vst [vmem:[%s102_s1] sm:$0x1] %v45_v13 }

// kernel: tile.153
= control target key start
LH: loop header
LB: loop body
LE: loop exit
PB: predicated region body
PF: predicated region fallthrough
CT: control target
= control target key end

     0   :  { %2 = vsyncpa [#allocation1], 0  ;;  %s42_s6 = smov [#allocation0]   ;;  %s59_s0 = inlined_call_operand.hbm [shape: f32[16], index: 0, kind: input, shape index: {}]   ;;  %s60_s1 = inlined_call_operand.vmem [shape: f32[7,16], index: 1, kind: output, shape index: {}]  }
   0x1   :  { %s9_s7 = sshll.u32 %s42_s6, 4  ;;  %s10_s7 = int_to_ptr.vmem [resolvable:$true] %s9_s7 }
   0x2   :  { %s28_s8 = scalar_lea.vmem %s10_s7, 16  ;;  %s32_s9 = scalar_lea.vmem %s10_s7, 32 }
   0x3   :  { %p29_p0 = scmp.ne.s32.totalorder %s10_s7, %s28_s8  ;;  %p33_p1 = scmp.lt.s32.totalorder %s10_s7, %s10_s7 }
   0x4   :  { %p34_p2 = scmp.lt.s32.totalorder %s32_s9, %s28_s8 }
   0x6   :  { %p35_p3 = por %p34_p2, %p33_p1 }
   0x8   :  { %p36_p4 = pnand %p35_p3, %p29_p0 }
   0xa   :  { %39 = shalt.err (!%p36_p4)
}
   0xb   :  { %12 = dma.hbm_to_vmem [thread:$0]  %s59_s0, 16, %s10_s7, [#allocation1]  }
   0xc   :  { %40 = dma.done.wait [#allocation1], 16  }
   0xd   :  { %41 = vsyncadd [#allocation1], 4294967280  ;;  %v16_v0 = vld [vmem:[#allocation0] ss:$0 sm:$0xff] }
   0xe   :  { %17 = vst [vmem:[%s60_s1] sm:$0xff] %v16_v0 }
   0xf   :  { %18 = vsyncpa [#allocation1], 1 }

// kernel: tile.178
= control target key start
LH: loop header
LB: loop body
LE: loop exit
PB: predicated region body
PF: predicated region fallthrough
CT: control target
= control target key end

     0   :  { %s61_s10 = smov 60   ;;  %s62_s11 = smov 40   ;;  %vm3_vm0 = vcmask 80896   ;;  %vm9_vm1 = vcmask 572896   ;;  %vm15_vm2 = vcmask 490896   ;;  %vm21_vm3 = vcmask 408896   ;;  %s101_s0 = inlined_call_operand.vmem [shape: f32[7,10], index: 0, kind: input, shape index: {}]   ;;  %s102_s1 = inlined_call_operand.vmem [shape: f32[1,70], index: 1, kind: output, shape index: {}]  }
   0x1   :  { %v49_v0 = vld [vmem:[%s101_s0 + $0x6] sm:$0x1]   ;;  %v51_v1 = vld [vmem:[%s101_s0 + $0x4] sm:$0x1]   ;;  %v50_v2 = vld [vmem:[%s101_s0 + $0x5] sm:$0x1]  }
   0x2   :  { %7 = vrot.lane.b32.xlu0 %v49_v0, %s61_s10  ;;  %19 = vrot.lane.b32.xlu1 %v51_v1, %s62_s11  ;;  %v52_v3 = vld [vmem:[%s101_s0 + $0x3] sm:$0x1]   ;;  %v2_v4 = vld [vmem:[%s101_s0] sm:$0x1]   ;;  %s63_s18 = smov 50   ;;  %s64_s19 = smov 30  }
   0x3   :  { %4 = vst.msk [vmem:[#allocation0] sm:$0x1] %vm3_vm0, %v2_v4   ;;  %v53_v5 = vld [vmem:[%s101_s0 + $0x2] sm:$0x1]   ;;  %v54_v6 = vld [vmem:[%s101_s0 + $0x1] sm:$0x1]  }
   0x4   :  { %s65_s0 = smov 20   ;;  %s66_s24 = smov 10   ;;  %vm27_vm4 = vcmask 326896   ;;  %vm33_vm5 = vcmask 244896   ;;  %vm39_vm6 = vcmask 162896  }
   0x6   :  { %13 = vrot.lane.b32.xlu0 %v50_v2, %s63_s18  ;;  %25 = vrot.lane.b32.xlu1 %v52_v3, %s64_s19 }
   0xa   :  { %31 = vrot.lane.b32.xlu0 %v53_v5, %s65_s0  ;;  %37 = vrot.lane.b32.xlu1 %v54_v6, %s66_s24 }
  0x74   :  { %v8_v7 = vpop.permute.xlu0 %7   ;;  %v20_v8 = vpop.permute.xlu1 %19  }
  0x75   :  { %10 = vst.msk [vmem:[#allocation0] sm:$0x1] %vm9_vm1, %v8_v7  }
  0x78   :  { %v14_v9 = vpop.permute.xlu0 %13   ;;  %v26_v10 = vpop.permute.xlu1 %25  }
  0x79   :  { %16 = vst.msk [vmem:[#allocation0] sm:$0x1] %vm15_vm2, %v14_v9  }
  0x7a   :  { %22 = vst.msk [vmem:[#allocation0] sm:$0x1] %vm21_vm3, %v20_v8  }
  0x7b   :  { %28 = vst.msk [vmem:[#allocation0] sm:$0x1] %vm27_vm4, %v26_v10  }
  0x7c   :  { %v32_v11 = vpop.permute.xlu0 %31   ;;  %v38_v12 = vpop.permute.xlu1 %37  }
  0x7d   :  { %34 = vst.msk [vmem:[#allocation0] sm:$0x1] %vm33_vm5, %v32_v11  }
  0x7e   :  { %40 = vst.msk [vmem:[#allocation0] sm:$0x1] %vm39_vm6, %v38_v12  }
  0x85   :  { %v45_v13 = vld [vmem:[#allocation0] sm:$0x1] }
  0x86   :  { %48 = vst [vmem:[%s102_s1] sm:$0x1] %v45_v13 }

// kernel: tile.172
= control target key start
LH: loop header
LB: loop body
LE: loop exit
PB: predicated region body
PF: predicated region fallthrough
CT: control target
= control target key end

     0   :  { %s22_s0 = inlined_call_operand.vmem [shape: f32[10], index: 0, kind: input, shape index: {}]   ;;  %s23_s1 = inlined_call_operand.vmem [shape: f32[7,10], index: 1, kind: output, shape index: {}]  }
   0x1   :  { %v4_v0 = vld [vmem:[%s22_s0] ss:$0 sm:$0xff] }
   0x2   :  { %5 = vst [vmem:[%s23_s1] sm:$0xff] %v4_v0 }

// kernel: tile.168
= control target key start
LH: loop header
LB: loop body
LE: loop exit
PB: predicated region body
PF: predicated region fallthrough
CT: control target
= control target key end

     0   :  { %2 = vsyncpa [#allocation1], 0  ;;  %s42_s6 = smov [#allocation0]   ;;  %s59_s0 = inlined_call_operand.hbm [shape: f32[10], index: 0, kind: input, shape index: {}]   ;;  %s60_s1 = inlined_call_operand.vmem [shape: f32[7,10], index: 1, kind: output, shape index: {}]  }
   0x1   :  { %s9_s7 = sshll.u32 %s42_s6, 4  ;;  %s10_s7 = int_to_ptr.vmem [resolvable:$true] %s9_s7 }
   0x2   :  { %s28_s8 = scalar_lea.vmem %s10_s7, 16  ;;  %s32_s9 = scalar_lea.vmem %s10_s7, 32 }
   0x3   :  { %p29_p0 = scmp.ne.s32.totalorder %s10_s7, %s28_s8  ;;  %p33_p1 = scmp.lt.s32.totalorder %s10_s7, %s10_s7 }
   0x4   :  { %p34_p2 = scmp.lt.s32.totalorder %s32_s9, %s28_s8 }
   0x6   :  { %p35_p3 = por %p34_p2, %p33_p1 }
   0x8   :  { %p36_p4 = pnand %p35_p3, %p29_p0 }
   0xa   :  { %39 = shalt.err (!%p36_p4)
}
   0xb   :  { %12 = dma.hbm_to_vmem [thread:$0]  %s59_s0, 16, %s10_s7, [#allocation1]  }
   0xc   :  { %40 = dma.done.wait [#allocation1], 16  }
   0xd   :  { %41 = vsyncadd [#allocation1], 4294967280  ;;  %v16_v0 = vld [vmem:[#allocation0] ss:$0 sm:$0xff] }
   0xe   :  { %17 = vst [vmem:[%s60_s1] sm:$0xff] %v16_v0 }
   0xf   :  { %18 = vsyncpa [#allocation1], 1 }

// kernel: net2_forward.1
= control target key start
LH: loop header
LB: loop body
LE: loop exit
PB: predicated region body
PF: predicated region fallthrough
CT: control target
= control target key end

     0   :  { %s7665_s0 = inlined_call_operand.vmem [shape: f32[56,28], index: 0, kind: input, shape index: {}]   ;;  %s7666_s1 = inlined_call_operand.vmem [shape: bf16[3,28,208], index: 1, kind: input, shape index: {}]   ;;  %s7667_s2 = inlined_call_operand.vmem [shape: f32[3,208], index: 2, kind: input, shape index: {}]   ;;  %s7668_s3 = inlined_call_operand.vmem [shape: bf16[3,208,192], index: 3, kind: input, shape index: {}]   ;;  %s7669_s4 = inlined_call_operand.vmem [shape: f32[3,192], index: 4, kind: input, shape index: {}]   ;;  %s7670_s5 = inlined_call_operand.vmem [shape: bf16[3,192,176], index: 5, kind: input, shape index: {}]   ;;  %s7671_s6 = inlined_call_operand.vmem [shape: f32[3,176], index: 6, kind: input, shape index: {}]   ;;  %s7672_s7 = inlined_call_operand.vmem [shape: f32[22,49], index: 7, kind: input, shape index: {}]   ;;  %s7673_s8 = inlined_call_operand.vmem [shape: bf16[3,168,144], index: 8, kind: input, shape index: {}]   ;;  %s7674_s9 = inlined_call_operand.vmem [shape: f32[3,144], index: 9, kind: input, shape index: {}]   ;;  %s7675_s10 = inlined_call_operand.vmem [shape: bf16[3,144,112], index: 10, kind: input, shape index: {}]   ;;  %s7676_s11 = inlined_call_operand.vmem [shape: f32[3,112], index: 11, kind: input, shape index: {}]   ;;  %s7677_s12 = inlined_call_operand.vmem [shape: bf16[112,70], index: 12, kind: input, shape index: {}]   ;;  %s7678_s13 = inlined_call_operand.vmem [shape: f32[3,70], index: 13, kind: input, shape index: {}]   ;;  %s7679_s14 = inlined_call_operand.vmem [shape: bf16[7,70,10], index: 14, kind: input, shape index: {}]   ;;  %s7680_s15 = inlined_call_operand.vmem [shape: f32[1,10], index: 15, kind: input, shape index: {}]   ;;  %s7681_s16 = inlined_call_operand.vmem [shape: f32[2,12], index: 16, kind: input, shape index: {}]   ;;  %s7682_s17 = inlined_call_operand.hbm [shape: f32[2,10], index: 17, kind: output, shape index: {}]  }
   0x1   :  { %7685 = sst [smem:[#allocation5_spill]] %s7665_s0 }
   0x2   :  { %7686 = sst [smem:[#allocation6_spill]] %s7666_s1 }
   0x3   :  { %s7687_s26 = sld [smem:[#allocation6_spill]]  ;;  %vm141_vm0 = vcmask 1045504   ;;  %v5873_v3 = vmov 0   ;;  %vm128_vm1 = vcmask 228352   ;;  %vm78_vm2 = vsmask.f32 7424 }
   0x4   :  { %180 = vmatprep.mubr.bf16.mxu0 %v5873_v3  ;;  %283 = vmatprep.mubr.bf16.mxu1 %v5873_v3  ;;  %s7688_s29 = sld [smem:[#allocation5_spill]]  ;;  %vm331_vm3 = vcmask 1046528   ;;  %v5459_v53 = vld [vmem:[%s7668_s3 + $0x74] ss:$8 sps:$4 sm:$0xff]   ;;  %v5457_v54 = vld [vmem:[%s7668_s3 + $0x70] ss:$8 sps:$4 sm:$0xff]  }
   0x5   :  { %v5462_v55 = vld [vmem:[%s7668_s3 + $0x64] ss:$8 sps:$4 sm:$0xff]   ;;  %v5460_v56 = vld [vmem:[%s7668_s3 + $0x60] ss:$8 sps:$4 sm:$0xff]   ;;  %v5465_v57 = vld [vmem:[%s7668_s3 + $0x54] ss:$8 sps:$4 sm:$0xff]  }
   0x6   :  { %v5463_v58 = vld [vmem:[%s7668_s3 + $0x50] ss:$8 sps:$4 sm:$0xff]   ;;  %v5468_v59 = vld [vmem:[%s7668_s3 + $0x144] ss:$8 sps:$4 sm:$0xff]   ;;  %v5466_v61 = vld [vmem:[%s7668_s3 + $0x140] ss:$8 sps:$4 sm:$0xff]  }
   0x7   :  { %v5471_v60 = vld [vmem:[%s7668_s3 + $0x44] ss:$8 sps:$4 sm:$0xff]   ;;  %v5469_v62 = vld [vmem:[%s7668_s3 + $0x40] ss:$8 sps:$4 sm:$0xff]   ;;  %v5474_v63 = vld [vmem:[%s7668_s3 + $0x134] ss:$8 sps:$4 sm:$0xff]  }
   0x9   :  { %v5439_v0 = vld [vmem:[%s7687_s26 + $0x34] ss:$8 sps:$4 sm:$0x3f]   ;;  %v5443_v2 = vld [vmem:[%s7687_s26 + $0x30] ss:$8 sps:$4 sm:$0x3f]  }
   0xa   :  { %4643 = vmatprep.subr.msk.bf16.mxu0 %vm141_vm0, %v5439_v0  ;;  %v5441_v1 = vld [vmem:[%s7687_s26 + $0x14] ss:$8 sps:$4 sm:$0x3f]   ;;  %v5444_v4 = vld [vmem:[%s7687_s26 + $0x10] ss:$8 sps:$4 sm:$0x3f]  }
   0xb   :  { %v5445_v5 = vld [vmem:[%s7687_s26 + $0x24] ss:$8 sps:$4 sm:$0xff]   ;;  %4652 = vmatprep.subr.msk.bf16.mxu1 %vm141_vm0, %v5441_v1  ;;  %v143_v6 = vsel %vm141_vm0, %v5443_v2, 0  ;;  %v246_v8 = vsel %vm141_vm0, %v5444_v4, 0  ;;  %v5449_v9 = vld [vmem:[%s7687_s26 + $0x20] ss:$8 sps:$4 sm:$0xff]  }
   0xc   :  { %v5447_v7 = vld [vmem:[%s7687_s26 + $0x4] ss:$8 sps:$4 sm:$0xff]   ;;  %161 = vmatpush1.bf16.msra.mxu0 %v143_v6  ;;  %v5450_v10 = vld [vmem:[%s7687_s26] ss:$8 sps:$4 sm:$0xff]   ;;  %264 = vmatpush1.bf16.msra.mxu1 %v246_v8  ;;  %v60_v13 = vld [vmem:[%s7688_s29 + $0x10] sm:$0xff] }
   0xd   :  { %v58_v11 = vld [vmem:[%s7688_s29] sm:$0xff]  ;;  %162 = vmatprep.subr.bf16.mxu0 %v5445_v5  ;;  %v59_v12 = vld [vmem:[%s7688_s29 + $0x8] sm:$0xff]  ;;  %v61_v14 = vld [vmem:[%s7688_s29 + $0x18] sm:$0xff]  ;;  %265 = vmatprep.subr.bf16.mxu1 %v5447_v7 }
   0xe   :  { %v65_v15 = vpack.c.bf16 %v59_v12, %v58_v11  ;;  %v66_v16 = vpack.c.bf16 %v61_v14, %v60_v13  ;;  %v62_v17 = vld [vmem:[%s7688_s29 + $0x20] sm:$0xff]  ;;  %v63_v18 = vld [vmem:[%s7688_s29 + $0x28] sm:$0xff]  ;;  %v5451_v19 = vld [vmem:[%s7687_s26 + $0x54] ss:$8 sps:$4 sm:$0x3f]  }
   0xf   :  { %v67_v23 = vpack.c.bf16 %v63_v18, %v62_v17  ;;  %v5453_v24 = vld [vmem:[%s7687_s26 + $0x50] ss:$8 sps:$4 sm:$0x3f]   ;;  %v5456_v28 = vld [vmem:[%s7687_s26 + $0x44] ss:$8 sps:$4 sm:$0xff]  }
  0x10   :  { %163 = vmatpush1.bf16.msra.mxu0 %v5449_v9  ;;  %v80_v20 = vshrl.u32 %v65_v15, 16  ;;  %v82_v21 = vshll.u32 %v65_v15, 16  ;;  %v87_v22 = vshll.u32 %v66_v16, 16  ;;  %266 = vmatpush1.bf16.msra.mxu1 %v5450_v10  ;;  %v64_v27 = vld [vmem:[%s7688_s29 + $0x30] sm:$0xff]  ;;  %v91_v30 = vshrl.u32 %v66_v16, 16 }
  0x11   :  { %4665 = vmatprep.subr.msk.bf16.mxu0 %vm141_vm0, %v5451_v19  ;;  %v95_v31 = vshll.u32 %v67_v23, 16  ;;  %v370_v32 = vsel %vm141_vm0, %v5453_v24, 0  ;;  %v5454_v34 = vld [vmem:[%s7687_s26 + $0x40] ss:$8 sps:$4 sm:$0xff]   ;;  %v68_v37 = vpack.c.bf16 %v64_v27, %v64_v27  ;;  %v99_v39 = vshrl.u32 %v67_v23, 16  ;;  %824 = vmatprep.subr.bf16.mxu1 %v5468_v59 }
  0x12   :  { %v84_v25 = vrot.slane %v82_v21, 1  ;;  %v89_v26 = vrot.slane %v87_v22, 1  ;;  %v332_v46 = vrot.slane %v65_v15, 1  ;;  %v333_v47 = vrot.slane %v66_v16, 1  ;;  %v5477_v0 = vld [vmem:[%s7668_s3 + $0x34] ss:$8 sps:$4 sm:$0xff]  }
  0x13   :  { %4653 = vmatmul.mubr.msk.bf16.vlgmr.msra.gmra.mxu1 %vm128_vm1, %v65_v15  ;;  %v97_v36 = vrot.slane %v95_v31, 1  ;;  %v103_v40 = vshll.u32 %v68_v37, 16  ;;  %v107_v44 = vshrl.u32 %v68_v37, 16  ;;  %v335_v49 = vrot.slane %v67_v23, 1  ;;  %v5472_v1 = vld [vmem:[%s7668_s3 + $0x130] ss:$8 sps:$4 sm:$0xff]  }
  0x14   :  { %v85_v29 = vor.u32 %v84_v25, %v80_v20  ;;  %293 = vmatprep.mubr.bf16.mxu1 %v5873_v3  ;;  %v93_v35 = vor.u32 %v91_v30, %v89_v26  ;;  %v334_v48 = vsel %vm331_vm3, %v332_v46, %v333_v47  ;;  %v337_v51 = vrot.slane %v68_v37, 1  ;;  %825 = vmatpush1.bf16.msra.mxu1 %v5466_v61  ;;  %v5475_v2 = vld [vmem:[%s7668_s3 + $0x30] ss:$8 sps:$4 sm:$0xff]   ;;  %v5480_v4 = vld [vmem:[%s7668_s3 + $0x124] ss:$8 sps:$4 sm:$0xff]  }
  0x15   :  { %v101_v41 = vor.u32 %v99_v39, %v97_v36  ;;  %v105_v42 = vrot.slane %v103_v40, 1  ;;  %v336_v50 = vsel %vm331_vm3, %v333_v47, %v335_v49  ;;  %826 = vmatprep.subr.bf16.mxu1 %v5474_v63  ;;  %v5483_v5 = vld [vmem:[%s7668_s3 + $0x24] ss:$8 sps:$4 sm:$0xff]   ;;  %v5478_v6 = vld [vmem:[%s7668_s3 + $0x120] ss:$8 sps:$4 sm:$0xff]  }
  0x16   :  { %v90_v33 = vsel %vm78_vm2, %v85_v29, %v89_v26  ;;  %v98_v38 = vsel %vm78_vm2, %v93_v35, %v97_v36  ;;  %v338_v52 = vsel %vm331_vm3, %v335_v49, %v337_v51  ;;  %v5481_v7 = vld [vmem:[%s7668_s3 + $0x20] ss:$8 sps:$4 sm:$0xff]   ;;  %v5486_v8 = vld [vmem:[%s7668_s3 + $0x114] ss:$8 sps:$4 sm:$0xff]   ;;  %v5484_v10 = vld [vmem:[%s7668_s3 + $0x110] ss:$8 sps:$4 sm:$0xff]  }
  0x17   :  { %4644 = vmatmul.mubr.msk.bf16.vlgmr.msra.gmra.mxu0 %vm128_vm1, %v90_v33  ;;  %v106_v43 = vsel %vm78_vm2, %v101_v41, %v105_v42  ;;  %v109_v45 = vor.u32 %v107_v44, %v105_v42  ;;  %v5489_v9 = vld [vmem:[%s7668_s3 + $0x14] ss:$8 sps:$4 sm:$0xff]   ;;  %v5487_v11 = vld [vmem:[%s7668_s3 + $0x10] ss:$8 sps:$4 sm:$0xff]   ;;  %v5492_v12 = vld [vmem:[%s7668_s3 + $0x104] ss:$8 sps:$4 sm:$0xff]  }
  0x18   :  { %190 = vmatprep.mubr.bf16.mxu0 %v5873_v3  ;;  %388 = vmatpush1.bf16.msra.mxu0 %v370_v32  ;;  %v5495_v13 = vld [vmem:[%s7668_s3 + $0x4] ss:$8 sps:$4 sm:$0xff]   ;;  %v5490_v14 = vld [vmem:[%s7668_s3 + $0x100] ss:$8 sps:$4 sm:$0xff]   ;;  %v5496_v18 = vld [vmem:[%s7668_s3 + $0xf0] ss:$8 sps:$4 sm:$0xff]  }
  0x19   :  { %389 = vmatprep.subr.bf16.mxu0 %v5456_v28  ;;  %827 = vmatpush1.bf16.msra.mxu1 %v5472_v1  ;;  %v5493_v15 = vld [vmem:[%s7668_s3] ss:$8 sps:$4 sm:$0xff]   ;;  %v5501_v17 = vld [vmem:[%s7668_s3 + $0xc4] ss:$8 sps:$4 sm:$0xff]   ;;  %v5507_v21 = vld [vmem:[%s7668_s3 + $0xb4] ss:$8 sps:$4 sm:$0xff]  }
  0x1a   :  { %828 = vmatprep.subr.bf16.mxu1 %v5480_v4  ;;  %v5499_v19 = vld [vmem:[%s7668_s3 + $0xc0] ss:$8 sps:$4 sm:$0xff]   ;;  %v5504_v20 = vld [vmem:[%s7668_s3 + $0xe4] ss:$8 sps:$4 sm:$0xff]   ;;  %v5510_v24 = vld [vmem:[%s7668_s3 + $0xd4] ss:$8 sps:$4 sm:$0xff]  }
  0x1b   :  { %4654 = vmatmul.mubr.msk.bf16.gmra.mxu1 %vm128_vm1, %v66_v16  ;;  %v5498_v16 = vld [vmem:[%s7668_s3 + $0xf4] ss:$8 sps:$4 sm:$0xff]   ;;  %v5502_v22 = vld [vmem:[%s7668_s3 + $0xe0] ss:$8 sps:$4 sm:$0xff]   ;;  %v5513_v25 = vld [vmem:[%s7668_s3 + $0xa4] ss:$8 sps:$4 sm:$0xff]  }
  0x1c   :  { %390 = vmatpush1.bf16.msra.mxu0 %v5454_v34  ;;  %303 = vmatprep.mubr.bf16.mxu1 %v5873_v3  ;;  %v5508_v26 = vld [vmem:[%s7668_s3 + $0xd0] ss:$8 sps:$4 sm:$0xff]   ;;  %v5511_v27 = vld [vmem:[%s7668_s3 + $0xa0] ss:$8 sps:$4 sm:$0xff]   ;;  %v5516_v28 = vld [vmem:[%s7668_s3 + $0x194] ss:$8 sps:$4 sm:$0xff]  }
  0x1d   :  { %1033 = vmatprep.subr.bf16.mxu0 %v5459_v53  ;;  %829 = vmatpush1.bf16.msra.mxu1 %v5478_v6  ;;  %v5519_v29 = vld [vmem:[%s7668_s3 + $0x94] ss:$8 sps:$4 sm:$0xff]   ;;  %v5514_v30 = vld [vmem:[%s7668_s3 + $0x190] ss:$8 sps:$4 sm:$0xff]   ;;  %v5522_v32 = vld [vmem:[%s7668_s3 + $0x184] ss:$8 sps:$4 sm:$0xff]  }
  0x1e   :  { %830 = vmatprep.subr.bf16.mxu1 %v5486_v8  ;;  %v5517_v31 = vld [vmem:[%s7668_s3 + $0x90] ss:$8 sps:$4 sm:$0xff]   ;;  %v5525_v33 = vld [vmem:[%s7668_s3 + $0x84] ss:$8 sps:$4 sm:$0xff]   ;;  %v5520_v34 = vld [vmem:[%s7668_s3 + $0x180] ss:$8 sps:$4 sm:$0xff]  }
  0x1f   :  { %4645 = vmatmul.mubr.msk.bf16.gmra.mxu0 %vm128_vm1, %v98_v38  ;;  %v5523_v35 = vld [vmem:[%s7668_s3 + $0x80] ss:$8 sps:$4 sm:$0xff]   ;;  %v5528_v36 = vld [vmem:[%s7668_s3 + $0x174] ss:$8 sps:$4 sm:$0xff]   ;;  %v5531_v38 = vld [vmem:[%s7668_s3 + $0x164] ss:$8 sps:$4 sm:$0xff]  }
  0x20   :  { %200 = vmatprep.mubr.bf16.mxu0 %v5873_v3  ;;  %v5529_v39 = vld [vmem:[%s7668_s3 + $0x160] ss:$8 sps:$4 sm:$0xff]   ;;  %v5534_v40 = vld [vmem:[%s7668_s3 + $0x154] ss:$8 sps:$4 sm:$0xff]   ;;  %v5532_v41 = vld [vmem:[%s7668_s3 + $0x150] ss:$8 sps:$4 sm:$0xff]  }
  0x21   :  { %831 = vmatpush1.bf16.msra.mxu1 %v5484_v10  ;;  %v5537_v42 = vld [vmem:[%s7668_s3 + $0x214] ss:$8 sps:$4 sm:$0xff]  }
  0x22   :  { %832 = vmatprep.subr.bf16.mxu1 %v5492_v12 }
  0x23   :  { %4655 = vmatmul.mubr.msk.bf16.gmra.mxu1 %vm128_vm1, %v67_v23  ;;  %v5505_v23 = vld [vmem:[%s7668_s3 + $0xb0] ss:$8 sps:$4 sm:$0xff]  }
  0x24   :  { %313 = vmatprep.mubr.bf16.mxu1 %v5873_v3 }
  0x25   :  { %833 = vmatpush1.bf16.msra.mxu1 %v5490_v14 }
  0x26   :  { %834 = vmatprep.subr.bf16.mxu1 %v5498_v16 }
  0x27   :  { %4646 = vmatmul.mubr.msk.bf16.gmra.mxu0 %vm128_vm1, %v106_v43 }
  0x28   :  { %210 = vmatprep.mubr.bf16.mxu0 %v5873_v3 }
  0x29   :  { %835 = vmatpush1.bf16.msra.mxu1 %v5496_v18 }
  0x2a   :  { %836 = vmatprep.subr.bf16.mxu1 %v5504_v20 }
  0x2b   :  { %4656 = vmatmul.mubr.msk.bf16.gmra.mxu1 %vm128_vm1, %v68_v37  ;;  %v5526_v37 = vld [vmem:[%s7668_s3 + $0x170] ss:$8 sps:$4 sm:$0xff]  }
  0x2d   :  { %837 = vmatpush1.bf16.msra.mxu1 %v5502_v22 }
  0x2e   :  { %838 = vmatprep.subr.bf16.mxu1 %v5510_v24 }
  0x2f   :  { %4647 = vmatmul.mubr.msk.bf16.gmra.mxu0 %vm128_vm1, %v109_v45 }
  0x30   :  { %407 = vmatprep.mubr.bf16.mxu0 %v5873_v3 }
  0x31   :  { %839 = vmatpush1.bf16.msra.mxu1 %v5508_v26 }
  0x32   :  { %846 = vmatprep.subr.bf16.mxu1 %v5516_v28 }
  0x35   :  { %847 = vmatpush2.bf16.msra.mxu1 %v5514_v30 }
  0x36   :  { %848 = vmatprep.subr.bf16.mxu1 %v5522_v32 }
  0x37   :  { %4666 = vmatmul.mubr.msk.bf16.vlgmr.msra.gmra.mxu0 %vm128_vm1, %v334_v48 }
  0x38   :  { %417 = vmatprep.mubr.bf16.mxu0 %v5873_v3  ;;  %1034 = vmatpush1.bf16.msra.mxu0 %v5457_v54 }
  0x39   :  { %1035 = vmatprep.subr.bf16.mxu0 %v5462_v55  ;;  %849 = vmatpush2.bf16.msra.mxu1 %v5520_v34 }
  0x3a   :  { %850 = vmatprep.subr.bf16.mxu1 %v5528_v36 }
  0x3c   :  { %1036 = vmatpush1.bf16.msra.mxu0 %v5460_v56 }
  0x3d   :  { %1037 = vmatprep.subr.bf16.mxu0 %v5465_v57  ;;  %851 = vmatpush2.bf16.msra.mxu1 %v5526_v37 }
  0x3e   :  { %852 = vmatprep.subr.bf16.mxu1 %v5531_v38 }
  0x3f   :  { %4667 = vmatmul.mubr.msk.bf16.gmra.mxu0 %vm128_vm1, %v336_v50 }
  0x40   :  { %427 = vmatprep.mubr.bf16.mxu0 %v5873_v3  ;;  %1038 = vmatpush1.bf16.msra.mxu0 %v5463_v58 }
  0x41   :  { %1039 = vmatprep.subr.bf16.mxu0 %v5471_v60  ;;  %853 = vmatpush2.bf16.msra.mxu1 %v5529_v39 }
  0x42   :  { %854 = vmatprep.subr.bf16.mxu1 %v5534_v40 }
  0x44   :  { %1040 = vmatpush1.bf16.msra.mxu0 %v5469_v62 }
  0x45   :  { %1041 = vmatprep.subr.bf16.mxu0 %v5477_v0  ;;  %855 = vmatpush2.bf16.msra.mxu1 %v5532_v41 }
  0x46   :  { %1299 = vmatprep.subr.bf16.mxu1 %v5537_v42 }
  0x47   :  { %4668 = vmatmul.mubr.msk.bf16.gmra.mxu0 %vm128_vm1, %v338_v52 }
  0x48   :  { %437 = vmatprep.mubr.bf16.mxu0 %v5873_v3  ;;  %1042 = vmatpush1.bf16.msra.mxu0 %v5475_v2 }
  0x49   :  { %1043 = vmatprep.subr.bf16.mxu0 %v5483_v5 }
  0x4c   :  { %1044 = vmatpush1.bf16.msra.mxu0 %v5481_v7 }
  0x4d   :  { %1045 = vmatprep.subr.bf16.mxu0 %v5489_v9 }
  0x4f   :  { %4669 = vmatmul.mubr.msk.bf16.gmra.mxu0 %vm128_vm1, %v337_v51 }
  0x50   :  { %1046 = vmatpush1.bf16.msra.mxu0 %v5487_v11 }
  0x51   :  { %1047 = vmatprep.subr.bf16.mxu0 %v5495_v13 }
  0x54   :  { %1048 = vmatpush1.bf16.msra.mxu0 %v5493_v15 }
  0x55   :  { %1055 = vmatprep.subr.bf16.mxu0 %v5501_v17 }
  0x58   :  { %1056 = vmatpush2.bf16.msra.mxu0 %v5499_v19 }
  0x59   :  { %1057 = vmatprep.subr.bf16.mxu0 %v5507_v21 }
  0x5c   :  { %1058 = vmatpush2.bf16.msra.mxu0 %v5505_v23 }
  0x5d   :  { %1059 = vmatprep.subr.bf16.mxu0 %v5513_v25 }
  0x60   :  { %1060 = vmatpush2.bf16.msra.mxu0 %v5511_v27 }
  0x61   :  { %1061 = vmatprep.subr.bf16.mxu0 %v5519_v29 }
  0x64   :  { %1062 = vmatpush2.bf16.msra.mxu0 %v5517_v31 }
  0x65   :  { %1063 = vmatprep.subr.bf16.mxu0 %v5525_v33 }
  0x68   :  { %1064 = vmatpush2.bf16.msra.mxu0 %v5523_v35 }
  0x69   :  { %22 = vsyncpa [#allocation3], 0  ;;  %v462_v1 = vlaneseq  ;;  %v460_v14 = vld [vmem:[%s7667_s2] ss:$4 sm:$0x3]  ;;  %vm811_vm4 = vcmask 654336  }
  0x6a   :  { %v4670_v26 = vld [vmem:[%s7667_s2 + $0x1] ss:$4 sm:$0x3]  ;;  %v4671_v34 = vld [vmem:[%s7667_s2 + $0x2] ss:$4 sm:$0x3] }
  0x6b   :  { %v463_v7 = vshrl.u32 %v462_v1, 7  ;;  %vm1721_vm5 = vcmask 523264   ;;  %vm2477_vm6 = vcmask 982016   ;;  %vm2526_vm7 = vcmask 1040384  }
  0x6c   :  { %vm2516_vm8 = vcmask 400384   ;;  %vm2807_vm9 = vcmask 1043456   ;;  %vm2800_vm10 = vcmask 326656   ;;  %vm3428_vm11 = vcmask 130048  }
  0x6d   :  { %v6248_v11 = vsub.s32 0, %v463_v7  ;;  %v6253_v15 = vsub.s32 1, %v463_v7  ;;  %vm3821_vm12 = vcmask 916480   ;;  %vm3953_vm13 = vcmask 1042432  }
  0x6e   :  { %vm5876_vm14 = vmmov 0   ;;  %vm3949_vm15 = vcmask 572416   ;;  %vm4442_vm0 = vcmask 1044480   ;;  %vm4346_vm1 = vsmask.f32 5376 }
  0x6f   :  { %v6256_v18 = vrot.slane %v460_v14, %v6248_v11  ;;  %v6259_v22 = vrot.slane %v460_v14, %v6253_v15  ;;  %v6267_v33 = vrot.slane %v4670_v26, %v6248_v11  ;;  %v6273_v37 = vrot.slane %v4670_v26, %v6253_v15 }
  0xd3   :  { %v285_v43 = vpop.f32.mrf.mxu1 }
  0xd5   :  { %v287_v44 = vpop.f32.mrf.mxu1 }
  0xd7   :  { %v182_v45 = vpop.f32.mrf.mxu0  ;;  %v289_v46 = vpop.f32.mrf.mxu1 }
  0xd8   :  { %v286_v17 = vadd.f32 %v285_v43, %v182_v45  ;;  %v6277_v43 = vrot.slane %v4671_v34, %v6248_v11 }
  0xd9   :  { %v184_v47 = vpop.f32.mrf.mxu0  ;;  %v291_v48 = vpop.f32.mrf.mxu1 }
  0xda   :  { %v288_v20 = vadd.f32 %v287_v44, %v184_v47 }
  0xdb   :  { %v186_v49 = vpop.f32.mrf.mxu0  ;;  %v295_v50 = vpop.f32.mrf.mxu1 }
  0xdc   :  { %v290_v24 = vadd.f32 %v289_v46, %v186_v49 }
  0xdd   :  { %v188_v51 = vpop.f32.mrf.mxu0  ;;  %v297_v52 = vpop.f32.mrf.mxu1 }
  0xde   :  { %v292_v29 = vadd.f32 %v291_v48, %v188_v51  ;;  %v6282_v48 = vrot.slane %v4671_v34, %v6253_v15 }
  0xdf   :  { %v192_v53 = vpop.f32.mrf.mxu0  ;;  %v299_v54 = vpop.f32.mrf.mxu1 }
  0xe0   :  { %v296_v40 = vadd.f32 %v295_v50, %v192_v53 }
  0xe1   :  { %v194_v55 = vpop.f32.mrf.mxu0  ;;  %v6220_v56 = vpop.f32.mrf.mxu1 }
  0xe2   :  { %v298_v42 = vadd.f32 %v297_v52, %v194_v55 }
  0xe3   :  { %v196_v57 = vpop.f32.mrf.mxu0  ;;  %v6222_v58 = vpop.f32.mrf.mxu1 }
  0xe4   :  { %v300_v46 = vadd.f32 %v299_v54, %v196_v57 }
  0xe5   :  { %v6224_v59 = vpop.f32.mrf.mxu0  ;;  %v6226_v60 = vpop.f32.mrf.mxu1 }
  0xe7   :  { %v6228_v61 = vpop.f32.mrf.mxu0  ;;  %v6230_v62 = vpop.f32.mrf.mxu1 }
  0xe9   :  { %v6232_v63 = vpop.f32.mrf.mxu0  ;;  %v6234_v0 = vpop.f32.mrf.mxu1 }
  0xeb   :  { %v6236_v2 = vpop.f32.mrf.mxu0  ;;  %v6238_v4 = vpop.f32.mrf.mxu1 }
  0xed   :  { %v6240_v5 = vpop.f32.mrf.mxu0  ;;  %v6242_v6 = vpop.f32.mrf.mxu1 }
  0xef   :  { %v6244_v8 = vpop.f32.mrf.mxu0  ;;  %v319_v9 = vpop.f32.mrf.mxu1 }
  0xf1   :  { %v6246_v10 = vpop.f32.mrf.mxu0  ;;  %v320_v12 = vpop.f32.mrf.mxu1 }
  0xf3   :  { %v216_v13 = vpop.f32.mrf.mxu0 }
  0xf4   :  { %v302_v13 = vadd.f32 %v6220_v56, %v6224_v59  ;;  %v308_v56 = vadd.f32 %v6226_v60, %v6232_v63  ;;  %v312_v60 = vadd.f32 %v6234_v0, %v6240_v5 }
  0xf5   :  { %v217_v16 = vpop.f32.mrf.mxu0 }
  0xf7   :  { %v409_v19 = vpop.f32.mrf.mxu0 }
  0xf8   :  { %v446_v21 = vadd.f32 %v409_v19, %v286_v17  ;;  %v306_v19 = vadd.f32 %v6222_v58, %v6228_v61 }
  0xf9   :  { %v411_v23 = vpop.f32.mrf.mxu0 }
  0xfa   :  { %v472_v25 = vadd.f32 %v6256_v18, %v446_v21  ;;  %v447_v27 = vadd.f32 %v411_v23, %v288_v20 }
  0xfb   :  { %v413_v28 = vpop.f32.mrf.mxu0 }
  0xfc   :  { %v473_v30 = vadd.f32 %v6259_v22, %v447_v27  ;;  %v448_v31 = vadd.f32 %v413_v28, %v290_v24  ;;  %v486_v32 = vmax.f32 %v472_v25, 0.0 }
  0xfd   :  { %v415_v35 = vpop.f32.mrf.mxu0 }
  0xfe   :  { %v487_v36 = vmax.f32 %v473_v30, 0.0  ;;  %v474_v38 = vadd.f32 %v6256_v18, %v448_v31  ;;  %v449_v39 = vadd.f32 %v415_v35, %v292_v29  ;;  %v513_v47 = vmul.f32 %v6267_v33, %v486_v32 }
  0xff   :  { %v419_v41 = vpop.f32.mrf.mxu0  ;;  %v310_v31 = vadd.f32 %v6230_v62, %v6236_v2 }
 0x100   :  { %v488_v44 = vmax.f32 %v474_v38, 0.0  ;;  %v475_v45 = vadd.f32 %v6259_v22, %v449_v39  ;;  %v450_v49 = vadd.f32 %v419_v41, %v296_v40  ;;  %v514_v1 = vmul.f32 %v6273_v37, %v487_v36 }
 0x101   :  { %v421_v51 = vpop.f32.mrf.mxu0  ;;  %v540_v14 = vadd.f32 %v6277_v43, %v513_v47 }
 0x102   :  { %v515_v50 = vmul.f32 %v6267_v33, %v488_v44  ;;  %v489_v53 = vmax.f32 %v475_v45, 0.0  ;;  %v451_v52 = vadd.f32 %v421_v51, %v298_v42  ;;  %v476_v55 = vadd.f32 %v6256_v18, %v450_v49 }
 0x103   :  { %v423_v7 = vpop.f32.mrf.mxu0  ;;  %v541_v20 = vadd.f32 %v6282_v48, %v514_v1  ;;  %v316_v42 = vadd.f32 %v6238_v4, %v6244_v8 }
 0x104   :  { %v542_v9 = vadd.f32 %v6277_v43, %v515_v50  ;;  %v516_v54 = vmul.f32 %v6273_v37, %v489_v53  ;;  %v477_v57 = vadd.f32 %v6259_v22, %v451_v52  ;;  %v452_v12 = vadd.f32 %v423_v7, %v300_v46 }
 0x105   :  { %v490_v16 = vmax.f32 %v476_v55, 0.0  ;;  %v425_v17 = vpop.f32.mrf.mxu0  ;;  %v318_v46 = vadd.f32 %v6242_v6, %v6246_v10 }
 0x106   :  { %v543_v21 = vadd.f32 %v6282_v48, %v516_v54  ;;  %v478_v23 = vadd.f32 %v6256_v18, %v452_v12  ;;  %v6298_v24 = vpack.c.bf16 %v542_v9, %v540_v14  ;;  %v491_v25 = vmax.f32 %v477_v57, 0.0 }
 0x107   :  { %v453_v26 = vadd.f32 %v425_v17, %v302_v13  ;;  %v429_v27 = vpop.f32.mrf.mxu0  ;;  %v517_v58 = vmul.f32 %v6267_v33, %v490_v16 }
 0x108   :  { %v492_v59 = vmax.f32 %v478_v23, 0.0  ;;  %v454_v28 = vadd.f32 %v429_v27, %v306_v19  ;;  %v6302_v29 = vpack.c.bf16 %v543_v21, %v541_v20  ;;  %v518_v63 = vmul.f32 %v6273_v37, %v491_v25 }
 0x109   :  { %v479_v61 = vadd.f32 %v6259_v22, %v453_v26  ;;  %v431_v30 = vpop.f32.mrf.mxu0  ;;  %v618_v39 = vshll.u32 %v6298_v24, 16  ;;  %v544_v44 = vadd.f32 %v6277_v43, %v517_v58  ;;  %v616_v7 = vshrl.u32 %v6298_v24, 16 }
 0x10a   :  { %v519_v32 = vmul.f32 %v6267_v33, %v492_v59  ;;  %v480_v34 = vadd.f32 %v6256_v18, %v454_v28  ;;  %v455_v35 = vadd.f32 %v431_v30, %v308_v56  ;;  %4754 = vmatprep.mubr.msk.bf16.mxu0 %vm811_vm4, %v6302_v29  ;;  %v630_v45 = vshll.u32 %v6302_v29, 16 }
 0x10b   :  { %v493_v36 = vmax.f32 %v479_v61, 0.0  ;;  %v433_v38 = vpop.f32.mrf.mxu0  ;;  %1066 = vmatmul.mubr.bf16.vlgmr.msra.gmra.mxu0 %v6298_v24  ;;  %v545_v1 = vadd.f32 %v6282_v48, %v518_v63  ;;  %v620_v9 = vrot.slane %v618_v39, 1  ;;  %v628_v21 = vshrl.u32 %v6302_v29, 16 }
 0x10c   :  { %v546_v62 = vadd.f32 %v6277_v43, %v519_v32  ;;  %v494_v2 = vmax.f32 %v480_v34, 0.0  ;;  %v481_v40 = vadd.f32 %v6259_v22, %v455_v35  ;;  %v456_v41 = vadd.f32 %v433_v38, %v310_v31  ;;  %v5535_v35 = vld [vmem:[%s7668_s3 + $0x210] ss:$8 sps:$4 sm:$0xff]  }
 0x10d   :  { %v520_v0 = vmul.f32 %v6273_v37, %v493_v36  ;;  %v435_v5 = vpop.f32.mrf.mxu0  ;;  %v632_v57 = vrot.slane %v630_v45, 1  ;;  %v621_v61 = vor.u32 %v620_v9, %v616_v7  ;;  %v5540_v36 = vld [vmem:[%s7668_s3 + $0x204] ss:$8 sps:$4 sm:$0xff]  }
 0x10e   :  { %v495_v47 = vmax.f32 %v481_v40, 0.0  ;;  %v482_v49 = vadd.f32 %v6256_v18, %v456_v41  ;;  %v457_v51 = vadd.f32 %v435_v5, %v312_v60  ;;  %v521_v4 = vmul.f32 %v6267_v33, %v494_v2 }
 0x10f   :  { %v547_v50 = vadd.f32 %v6282_v48, %v520_v0  ;;  %v439_v8 = vpop.f32.mrf.mxu0  ;;  %v6330_v53 = vpack.c.bf16 %v546_v62, %v544_v44  ;;  %v633_v58 = vor.u32 %v632_v57, %v628_v21  ;;  %v5550_v21 = vld [vmem:[%s7668_s3 + $0x1c0] ss:$8 sps:$4 sm:$0xff]  }
 0x110   :  { %v496_v52 = vmax.f32 %v482_v49, 0.0  ;;  %v483_v55 = vadd.f32 %v6259_v22, %v457_v51  ;;  %v458_v6 = vadd.f32 %v439_v8, %v316_v42  ;;  %v522_v13 = vmul.f32 %v6273_v37, %v495_v47  ;;  %v5541_v49 = vld [vmem:[%s7668_s3 + $0x1f0] ss:$8 sps:$4 sm:$0xff]  }
 0x111   :  { %v441_v10 = vpop.f32.mrf.mxu0  ;;  %v6334_v54 = vpack.c.bf16 %v547_v50, %v545_v1  ;;  %v623_v12 = vshll.u32 %v6330_v53, 16  ;;  %v548_v19 = vadd.f32 %v6277_v43, %v521_v4  ;;  %v639_v0 = vshrl.u32 %v6330_v53, 16  ;;  %v5546_v4 = vld [vmem:[%s7668_s3 + $0x1e4] ss:$8 sps:$4 sm:$0xff]  }
 0x112   :  { %v523_v14 = vmul.f32 %v6267_v33, %v496_v52  ;;  %v497_v16 = vmax.f32 %v483_v55, 0.0  ;;  %v459_v17 = vadd.f32 %v441_v10, %v318_v46  ;;  %v484_v20 = vadd.f32 %v6256_v18, %v458_v6  ;;  %v5544_v6 = vld [vmem:[%s7668_s3 + $0x1e0] ss:$8 sps:$4 sm:$0xff]   ;;  %v5549_v10 = vld [vmem:[%s7668_s3 + $0x1d4] ss:$8 sps:$4 sm:$0xff]  }
 0x113   :  { %4755 = vmatprep.mubr.msk.bf16.mxu0 %vm811_vm4, %v6334_v54  ;;  %v635_v23 = vshll.u32 %v6334_v54, 16  ;;  %v443_v25 = vpop.f32.mrf.mxu0  ;;  %v625_v59 = vrot.slane %v623_v12, 1  ;;  %v549_v31 = vadd.f32 %v6282_v48, %v522_v13  ;;  %v5547_v13 = vld [vmem:[%s7668_s3 + $0x1d0] ss:$8 sps:$4 sm:$0xff]  }
 0x114   :  { %v550_v26 = vadd.f32 %v6277_v43, %v523_v14  ;;  %v524_v27 = vmul.f32 %v6273_v37, %v497_v16  ;;  %v485_v56 = vadd.f32 %v6259_v22, %v459_v17  ;;  %1076 = vmatmul.mubr.bf16.gmra.mxu0 %v6330_v53  ;;  %v498_v28 = vmax.f32 %v484_v20, 0.0  ;;  %v5552_v17 = vld [vmem:[%s7668_s3 + $0x1c4] ss:$8 sps:$4 sm:$0xff]  }
 0x115   :  { %v637_v18 = vrot.slane %v635_v23, 1  ;;  %v444_v30 = vpop.f32.mrf.mxu0  ;;  %v626_v39 = vsel %vm78_vm2, %v621_v61, %v625_v59  ;;  %v641_v51 = vor.u32 %v639_v0, %v625_v59  ;;  %v5555_v23 = vld [vmem:[%s7668_s3 + $0x1b4] ss:$8 sps:$4 sm:$0xff]   ;;  %v1142_v59 = vrot.slane %v6302_v29, 1  ;;  %v5559_v29 = vld [vmem:[%s7668_s3 + $0x260] ss:$8 sps:$4 sm:$0xff]  }
 0x116   :  { %v551_v32 = vadd.f32 %v6282_v48, %v524_v27  ;;  %v499_v34 = vmax.f32 %v485_v56, 0.0  ;;  %v6354_v60 = vpack.c.bf16 %v550_v26, %v548_v19  ;;  %v525_v22 = vmul.f32 %v6267_v33, %v498_v28  ;;  %v5553_v27 = vld [vmem:[%s7668_s3 + $0x1b0] ss:$8 sps:$4 sm:$0xff]   ;;  %v5558_v28 = vld [vmem:[%s7668_s3 + $0x1a4] ss:$8 sps:$4 sm:$0xff]  }
 0x117   :  { %v638_v63 = vsel %vm78_vm2, %v633_v58, %v637_v18  ;;  %v647_v33 = vshrl.u32 %v6334_v54, 16  ;;  %v1143_v26 = vrot.slane %v6334_v54, 1  ;;  %v5556_v54 = vld [vmem:[%s7668_s3 + $0x1a0] ss:$8 sps:$4 sm:$0xff]   ;;  %v5564_v61 = vld [vmem:[%s7668_s3 + $0x254] ss:$8 sps:$4 sm:$0xff]  }
 0x118   :  { %v526_v38 = vmul.f32 %v6273_v37, %v499_v34  ;;  %4724 = vmatprep.mubr.msk.bf16.mxu1 %vm811_vm4, %v638_v63  ;;  %v6364_v62 = vpack.c.bf16 %v551_v32, %v549_v31  ;;  %v643_v2 = vshll.u32 %v6354_v60, 16  ;;  %v552_v40 = vadd.f32 %v6277_v43, %v525_v22  ;;  %v5538_v37 = vld [vmem:[%s7668_s3 + $0x200] ss:$8 sps:$4 sm:$0xff]   ;;  %v5543_v43 = vld [vmem:[%s7668_s3 + $0x1f4] ss:$8 sps:$4 sm:$0xff]  }
 0x119   :  { %857 = vmatmul.mubr.bf16.vlgmr.msra.gmra.mxu1 %v626_v39  ;;  %v649_v44 = vor.u32 %v647_v33, %v637_v18  ;;  %v655_v57 = vshrl.u32 %v6354_v60, 16  ;;  %v1144_v58 = vsel %vm331_vm3, %v1142_v59, %v1143_v26  ;;  %v5561_v18 = vld [vmem:[%s7668_s3 + $0x264] ss:$8 sps:$4 sm:$0xff]   ;;  %v5562_v30 = vld [vmem:[%s7668_s3 + $0x250] ss:$8 sps:$4 sm:$0xff]   ;;  %v1139_v39 = vrot.slane %v6298_v24, 1 }
 0x11a   :  { %v553_v41 = vadd.f32 %v6282_v48, %v526_v38  ;;  %1300 = vmatpush1.bf16.msra.mxu1 %v5535_v35  ;;  %4756 = vmatprep.mubr.msk.bf16.mxu0 %vm811_vm4, %v6364_v62  ;;  %v651_v42 = vshll.u32 %v6364_v62, 16  ;;  %v645_v45 = vrot.slane %v643_v2, 1  ;;  %v6383_v46 = vpack.c.bf16 %v552_v40, %v552_v40  ;;  %v5567_v31 = vld [vmem:[%s7668_s3 + $0x244] ss:$8 sps:$4 sm:$0xff]   ;;  %v5565_v32 = vld [vmem:[%s7668_s3 + $0x240] ss:$8 sps:$4 sm:$0xff]  }
 0x11b   :  { %1301 = vmatprep.subr.bf16.mxu1 %v5540_v36  ;;  %v663_v1 = vshrl.u32 %v6364_v62, 16  ;;  %v5570_v34 = vld [vmem:[%s7668_s3 + $0x234] ss:$8 sps:$4 sm:$0xff]   ;;  %v5568_v35 = vld [vmem:[%s7668_s3 + $0x230] ss:$8 sps:$4 sm:$0xff]   ;;  %v1140_v36 = vrot.slane %v6330_v53, 1 }
 0x11c   :  { %1086 = vmatmul.mubr.bf16.gmra.mxu0 %v6354_v60  ;;  %v6381_v48 = vpack.c.bf16 %v553_v41, %v553_v41  ;;  %v653_v5 = vrot.slane %v651_v42, 1  ;;  %v646_v8 = vsel %vm78_vm2, %v641_v51, %v645_v45  ;;  %v659_v7 = vshll.u32 %v6383_v46, 16  ;;  %v5573_v22 = vld [vmem:[%s7668_s3 + $0x224] ss:$8 sps:$4 sm:$0xff]   ;;  %v5571_v63 = vld [vmem:[%s7668_s3 + $0x220] ss:$8 sps:$4 sm:$0xff]  }
 0x11d   :  { %v657_v14 = vor.u32 %v655_v57, %v645_v45  ;;  %v671_v25 = vshrl.u32 %v6383_v46, 16  ;;  %v1147_v38 = vrot.slane %v6364_v62, 1  ;;  %v1141_v2 = vsel %vm331_vm3, %v1139_v39, %v1140_v36  ;;  %v5576_v42 = vld [vmem:[%s7670_s5 + $0x74] ss:$8 sps:$4 sm:$0xff]   ;;  %v5580_v0 = vld [vmem:[%s7670_s5 + $0x50] ss:$8 sps:$4 sm:$0xff]  }
 0x11e   :  { %1302 = vmatpush1.bf16.msra.mxu1 %v5538_v37  ;;  %4757 = vmatprep.mubr.msk.bf16.mxu0 %vm811_vm4, %v6381_v48  ;;  %v654_v47 = vsel %vm78_vm2, %v649_v44, %v653_v5  ;;  %v667_v50 = vshll.u32 %v6381_v48, 16  ;;  %v665_v52 = vor.u32 %v663_v1, %v653_v5  ;;  %v661_v12 = vrot.slane %v659_v7, 1  ;;  %v5577_v44 = vld [vmem:[%s7670_s5 + $0x60] ss:$8 sps:$4 sm:$0xff]   ;;  %v5583_v5 = vld [vmem:[%s7670_s5 + $0x130] ss:$8 sps:$4 sm:$0xff]  }
 0x11f   :  { %4725 = vmatprep.mubr.msk.bf16.mxu1 %vm811_vm4, %v654_v47  ;;  %1303 = vmatprep.subr.bf16.mxu1 %v5543_v43  ;;  %v674_v16 = vshrl.u32 %v6381_v48, 16  ;;  %v1148_v40 = vsel %vm331_vm3, %v1143_v26, %v1147_v38  ;;  %v1145_v33 = vrot.slane %v6354_v60, 1  ;;  %v1151_v41 = vrot.slane %v6381_v48, 1  ;;  %v5574_v60 = vld [vmem:[%s7670_s5 + $0x70] ss:$8 sps:$4 sm:$0xff]  }
 0x120   :  { %v669_v55 = vrot.slane %v667_v50, 1  ;;  %v662_v19 = vsel %vm78_vm2, %v657_v14, %v661_v12  ;;  %v673_v56 = vor.u32 %v671_v25, %v661_v12  ;;  %v1149_v24 = vrot.slane %v6383_v46, 1  ;;  %v5579_v43 = vld [vmem:[%s7670_s5 + $0x64] ss:$8 sps:$4 sm:$0xff]   ;;  %v5582_v48 = vld [vmem:[%s7670_s5 + $0x54] ss:$8 sps:$4 sm:$0xff]  }
 0x121   :  { %867 = vmatmul.mubr.bf16.gmra.mxu1 %v646_v8  ;;  %v1146_v37 = vsel %vm331_vm3, %v1140_v36, %v1145_v33  ;;  %v1152_v53 = vsel %vm331_vm3, %v1147_v38, %v1151_v41  ;;  %v5585_v45 = vld [vmem:[%s7670_s5 + $0x134] ss:$8 sps:$4 sm:$0xff]   ;;  %v5591_v47 = vld [vmem:[%s7670_s5 + $0x124] ss:$8 sps:$4 sm:$0xff]   ;;  %v5589_v51 = vld [vmem:[%s7670_s5 + $0x120] ss:$8 sps:$4 sm:$0xff]  }
 0x122   :  { %1304 = vmatpush1.bf16.msra.mxu1 %v5541_v49  ;;  %v670_v9 = vsel %vm78_vm2, %v665_v52, %v669_v55  ;;  %v676_v20 = vor.u32 %v674_v16, %v669_v55  ;;  %v1150_v62 = vsel %vm331_vm3, %v1145_v33, %v1149_v24  ;;  %1734 = vmatprep.subr.bf16.mxu0 %v5585_v45  ;;  %v5586_v49 = vld [vmem:[%s7670_s5 + $0x40] ss:$8 sps:$4 sm:$0xff]   ;;  %v5594_v1 = vld [vmem:[%s7670_s5 + $0x34] ss:$8 sps:$4 sm:$0xff]   ;;  %v5595_v8 = vld [vmem:[%s7670_s5 + $0x110] ss:$8 sps:$4 sm:$0xff]  }
 0x123   :  { %4726 = vmatprep.mubr.msk.bf16.mxu1 %vm811_vm4, %v670_v9  ;;  %1305 = vmatprep.subr.bf16.mxu1 %v5546_v4  ;;  %v5597_v50 = vld [vmem:[%s7670_s5 + $0x114] ss:$8 sps:$4 sm:$0xff]   ;;  %v5592_v4 = vld [vmem:[%s7670_s5 + $0x30] ss:$8 sps:$4 sm:$0xff]   ;;  %v5600_v52 = vld [vmem:[%s7670_s5 + $0x24] ss:$8 sps:$4 sm:$0xff]  }
 0x124   :  { %1096 = vmatmul.mubr.bf16.gmra.mxu0 %v6383_v46  ;;  %v5588_v46 = vld [vmem:[%s7670_s5 + $0x44] ss:$8 sps:$4 sm:$0xff]   ;;  %v5598_v7 = vld [vmem:[%s7670_s5 + $0x20] ss:$8 sps:$4 sm:$0xff]   ;;  %v5609_v57 = vld [vmem:[%s7670_s5 + $0xf4] ss:$8 sps:$4 sm:$0xff]  }
 0x125   :  { %1735 = vmatpush1.bf16.msra.mxu0 %v5583_v5  ;;  %v5603_v55 = vld [vmem:[%s7670_s5 + $0x104] ss:$8 sps:$4 sm:$0xff]   ;;  %v5601_v9 = vld [vmem:[%s7670_s5 + $0x100] ss:$8 sps:$4 sm:$0xff]   ;;  %v5619_v25 = vld [vmem:[%s7670_s5 + $0xd0] ss:$8 sps:$4 sm:$0xff]  }
 0x126   :  { %1306 = vmatpush1.bf16.msra.mxu1 %v5544_v6  ;;  %1736 = vmatprep.subr.bf16.mxu0 %v5591_v47  ;;  %v5606_v6 = vld [vmem:[%s7670_s5 + $0x14] ss:$8 sps:$4 sm:$0xff]   ;;  %v5612_v12 = vld [vmem:[%s7670_s5 + $0x4] ss:$8 sps:$4 sm:$0xff]   ;;  %v5610_v14 = vld [vmem:[%s7670_s5] ss:$8 sps:$4 sm:$0xff]  }
 0x127   :  { %1307 = vmatprep.subr.bf16.mxu1 %v5549_v10  ;;  %v5604_v10 = vld [vmem:[%s7670_s5 + $0x10] ss:$8 sps:$4 sm:$0xff]   ;;  %v5615_v16 = vld [vmem:[%s7670_s5 + $0xe4] ss:$8 sps:$4 sm:$0xff]   ;;  %v5622_v26 = vld [vmem:[%s7670_s5 + $0xa0] ss:$8 sps:$4 sm:$0xff]  }
 0x128   :  { %v5625_v59 = vld [vmem:[%s7670_s5 + $0xc0] ss:$8 sps:$4 sm:$0xff]  }
 0x129   :  { %877 = vmatmul.mubr.bf16.gmra.mxu1 %v662_v19  ;;  %1737 = vmatpush1.bf16.msra.mxu0 %v5589_v51  ;;  %v5616_v19 = vld [vmem:[%s7670_s5 + $0xb0] ss:$8 sps:$4 sm:$0xff]  }
 0x12a   :  { %1308 = vmatpush1.bf16.msra.mxu1 %v5547_v13  ;;  %4727 = vmatprep.mubr.msk.bf16.mxu1 %vm811_vm4, %v676_v20  ;;  %v5607_v13 = vld [vmem:[%s7670_s5 + $0xf0] ss:$8 sps:$4 sm:$0xff]   ;;  %v5618_v20 = vld [vmem:[%s7670_s5 + $0xb4] ss:$8 sps:$4 sm:$0xff]  }
 0x12b   :  { %1309 = vmatprep.subr.bf16.mxu1 %v5552_v17  ;;  %1738 = vmatprep.subr.bf16.mxu0 %v5597_v50  ;;  %v5613_v17 = vld [vmem:[%s7670_s5 + $0xe0] ss:$8 sps:$4 sm:$0xff]  }
 0x12d   :  { %1739 = vmatpush1.bf16.msra.mxu0 %v5595_v8 }
 0x12e   :  { %1310 = vmatpush1.bf16.msra.mxu1 %v5550_v21  ;;  %1740 = vmatprep.subr.bf16.mxu0 %v5603_v55  ;;  %v5621_v21 = vld [vmem:[%s7670_s5 + $0xd4] ss:$8 sps:$4 sm:$0xff]  }
 0x12f   :  { %1311 = vmatprep.subr.bf16.mxu1 %v5555_v23  ;;  %v5624_v23 = vld [vmem:[%s7670_s5 + $0xa4] ss:$8 sps:$4 sm:$0xff]  }
 0x131   :  { %887 = vmatmul.mubr.bf16.gmra.mxu1 %v673_v56  ;;  %1741 = vmatpush1.bf16.msra.mxu0 %v5601_v9  ;;  %v5630_v56 = vld [vmem:[%s7670_s5 + $0x94] ss:$8 sps:$4 sm:$0xff]  }
 0x132   :  { %1312 = vmatpush1.bf16.msra.mxu1 %v5553_v27  ;;  %4810 = vmatprep.mubr.msk.bf16.mxu1 %vm811_vm4, %v1144_v58  ;;  %v5627_v27 = vld [vmem:[%s7670_s5 + $0xc4] ss:$8 sps:$4 sm:$0xff]   ;;  %v5633_v58 = vld [vmem:[%s7670_s5 + $0x174] ss:$8 sps:$4 sm:$0xff]  }
 0x133   :  { %1313 = vmatprep.subr.bf16.mxu1 %v5558_v28  ;;  %1742 = vmatprep.subr.bf16.mxu0 %v5609_v57  ;;  %v5628_v28 = vld [vmem:[%s7670_s5 + $0x90] ss:$8 sps:$4 sm:$0xff]  }
 0x135   :  { %1743 = vmatpush1.bf16.msra.mxu0 %v5607_v13 }
 0x136   :  { %1314 = vmatpush1.bf16.msra.mxu1 %v5556_v54  ;;  %1744 = vmatprep.subr.bf16.mxu0 %v5615_v16  ;;  %v5636_v54 = vld [vmem:[%s7670_s5 + $0x84] ss:$8 sps:$4 sm:$0xff]  }
 0x137   :  { %1321 = vmatprep.subr.bf16.mxu1 %v5561_v18  ;;  %v5631_v18 = vld [vmem:[%s7670_s5 + $0x170] ss:$8 sps:$4 sm:$0xff]   ;;  %v4814_v16 = vld [vmem:[%s7669_s4 + $0x1] ss:$4 sm:$0x3] }
 0x139   :  { %1745 = vmatpush1.bf16.msra.mxu0 %v5613_v17 }
 0x13a   :  { %1322 = vmatpush2.bf16.msra.mxu1 %v5559_v29  ;;  %1746 = vmatprep.subr.bf16.mxu0 %v5621_v21  ;;  %v5634_v29 = vld [vmem:[%s7670_s5 + $0x80] ss:$8 sps:$4 sm:$0xff]  }
 0x13b   :  { %1323 = vmatprep.subr.bf16.mxu1 %v5564_v61  ;;  %v5639_v61 = vld [vmem:[%s7670_s5 + $0x164] ss:$8 sps:$4 sm:$0xff]  }
 0x13d   :  { %1747 = vmatpush1.bf16.msra.mxu0 %v5619_v25  ;;  %v6663_v25 = vrot.slane %v4814_v16, %v6248_v11 }
 0x13e   :  { %1324 = vmatpush2.bf16.msra.mxu1 %v5562_v30  ;;  %1748 = vmatprep.subr.bf16.mxu0 %v5627_v27  ;;  %v5637_v30 = vld [vmem:[%s7670_s5 + $0x160] ss:$8 sps:$4 sm:$0xff]  }
 0x13f   :  { %1325 = vmatprep.subr.bf16.mxu1 %v5567_v31  ;;  %v5642_v31 = vld [vmem:[%s7670_s5 + $0x154] ss:$8 sps:$4 sm:$0xff]  }
 0x141   :  { %1749 = vmatpush1.bf16.msra.mxu0 %v5625_v59  ;;  %v4815_v59 = vld [vmem:[%s7669_s4 + $0x2] ss:$4 sm:$0x3] }
 0x142   :  { %1326 = vmatpush2.bf16.msra.mxu1 %v5565_v32  ;;  %1758 = vmatprep.subr.bf16.mxu0 %v5633_v58  ;;  %v5640_v32 = vld [vmem:[%s7670_s5 + $0x150] ss:$8 sps:$4 sm:$0xff]  }
 0x143   :  { %1327 = vmatprep.subr.bf16.mxu1 %v5570_v34  ;;  %v5645_v34 = vld [vmem:[%s7670_s5 + $0x144] ss:$8 sps:$4 sm:$0xff]  }
 0x145   :  { %1759 = vmatpush2.bf16.msra.mxu0 %v5631_v18 }
 0x146   :  { %1328 = vmatpush2.bf16.msra.mxu1 %v5568_v35  ;;  %1760 = vmatprep.subr.bf16.mxu0 %v5639_v61  ;;  %v5643_v35 = vld [vmem:[%s7670_s5 + $0x140] ss:$8 sps:$4 sm:$0xff]  }
 0x147   :  { %1329 = vmatprep.subr.bf16.mxu1 %v5573_v22  ;;  %v5648_v22 = vld [vmem:[%s7670_s5 + $0x1f4] ss:$8 sps:$4 sm:$0xff]  }
 0x149   :  { %1761 = vmatpush2.bf16.msra.mxu0 %v5637_v30 }
 0x14a   :  { %1330 = vmatpush2.bf16.msra.mxu1 %v5571_v63  ;;  %1762 = vmatprep.subr.bf16.mxu0 %v5642_v31 }
 0x14b   :  { %1933 = vmatprep.subr.bf16.mxu1 %v5576_v42 }
 0x14d   :  { %1332 = vmatmul.mubr.bf16.vlgmr.msra.gmra.mxu1 %v1141_v2  ;;  %1763 = vmatpush2.bf16.msra.mxu0 %v5640_v32 }
 0x14e   :  { %4811 = vmatprep.mubr.msk.bf16.mxu1 %vm811_vm4, %v1148_v40  ;;  %1934 = vmatpush1.bf16.msra.mxu1 %v5574_v60 }
 0x14f   :  { %1935 = vmatprep.subr.bf16.mxu1 %v5579_v43  ;;  %1764 = vmatprep.subr.bf16.mxu0 %v5645_v34  ;;  %v6675_v34 = vrot.slane %v4815_v59, %v6248_v11 }
 0x151   :  { %1765 = vmatpush2.bf16.msra.mxu0 %v5643_v35 }
 0x152   :  { %1936 = vmatpush1.bf16.msra.mxu1 %v5577_v44  ;;  %2187 = vmatprep.subr.bf16.mxu0 %v5648_v22 }
 0x153   :  { %1937 = vmatprep.subr.bf16.mxu1 %v5582_v48 }
 0x155   :  { %1342 = vmatmul.mubr.bf16.gmra.mxu1 %v1146_v37 }
 0x156   :  { %4812 = vmatprep.mubr.msk.bf16.mxu1 %vm811_vm4, %v1152_v53  ;;  %1938 = vmatpush1.bf16.msra.mxu1 %v5580_v0 }
 0x157   :  { %1939 = vmatprep.subr.bf16.mxu1 %v5588_v46 }
 0x15a   :  { %1940 = vmatpush1.bf16.msra.mxu1 %v5586_v49 }
 0x15b   :  { %1941 = vmatprep.subr.bf16.mxu1 %v5594_v1 }
 0x15d   :  { %1352 = vmatmul.mubr.bf16.gmra.mxu1 %v1150_v62 }
 0x15e   :  { %4813 = vmatprep.mubr.msk.bf16.mxu1 %vm811_vm4, %v1151_v41  ;;  %1942 = vmatpush1.bf16.msra.mxu1 %v5592_v4 }
 0x15f   :  { %1943 = vmatprep.subr.bf16.mxu1 %v5600_v52 }
 0x162   :  { %1944 = vmatpush1.bf16.msra.mxu1 %v5598_v7 }
 0x163   :  { %1945 = vmatprep.subr.bf16.mxu1 %v5606_v6  ;;  %v1384_v6 = vld [vmem:[%s7669_s4] ss:$4 sm:$0x3] }
 0x164   :  { %v6653_v57 = vrot.slane %v1384_v6, %v6248_v11  ;;  %v6659_v17 = vrot.slane %v1384_v6, %v6253_v15 }
 0x165   :  { %1362 = vmatmul.mubr.bf16.gmra.mxu1 %v1149_v24 }
 0x166   :  { %1946 = vmatpush1.bf16.msra.mxu1 %v5604_v10 }
 0x167   :  { %1947 = vmatprep.subr.bf16.mxu1 %v5612_v12 }
 0x16a   :  { %1948 = vmatpush1.bf16.msra.mxu1 %v5610_v14 }
 0x16b   :  { %1957 = vmatprep.subr.bf16.mxu1 %v5618_v20 }
 0x16e   :  { %1958 = vmatpush2.bf16.msra.mxu1 %v5616_v19 }
 0x16f   :  { %1959 = vmatprep.subr.bf16.mxu1 %v5624_v23 }
 0x172   :  { %1960 = vmatpush2.bf16.msra.mxu1 %v5622_v26 }
 0x173   :  { %1961 = vmatprep.subr.bf16.mxu1 %v5630_v56 }
 0x176   :  { %1962 = vmatpush2.bf16.msra.mxu1 %v5628_v28 }
 0x177   :  { %1963 = vmatprep.subr.bf16.mxu1 %v5636_v54  ;;  %v6670_v54 = vrot.slane %v4814_v16, %v6253_v15 }
 0x17a   :  { %1964 = vmatpush2.bf16.msra.mxu1 %v5634_v29 }
 0x1cb   :  { %v1067_v63 = vpop.f32.mrf.mxu0 }
 0x1cd   :  { %v1069_v36 = vpop.f32.mrf.mxu0 }
 0x1cf   :  { %v1071_v38 = vpop.f32.mrf.mxu0 }
 0x1d1   :  { %v1073_v39 = vpop.f32.mrf.mxu0 }
 0x1d4   :  { %v1077_v2 = vpop.f32.mrf.mxu0 }
 0x1d6   :  { %v1079_v40 = vpop.f32.mrf.mxu0 }
 0x1d8   :  { %v1081_v33 = vpop.f32.mrf.mxu0 }
 0x1d9   :  { %v858_v41 = vpop.f32.mrf.mxu1 }
 0x1da   :  { %v6629_v37 = vpop.f32.mrf.mxu0  ;;  %v1068_v10 = vadd.f32 %v1067_v63, %v858_v41 }
 0x1db   :  { %v860_v53 = vpop.f32.mrf.mxu1 }
 0x1dc   :  { %v6631_v24 = vpop.f32.mrf.mxu0  ;;  %v1070_v13 = vadd.f32 %v1069_v36, %v860_v53 }
 0x1dd   :  { %v862_v62 = vpop.f32.mrf.mxu1 }
 0x1de   :  { %v6633_v60 = vpop.f32.mrf.mxu0  ;;  %v1072_v20 = vadd.f32 %v1071_v38, %v862_v62 }
 0x1df   :  { %v864_v42 = vpop.f32.mrf.mxu1 }
 0x1e0   :  { %v6635_v44 = vpop.f32.mrf.mxu0  ;;  %v1074_v27 = vadd.f32 %v1073_v39, %v864_v42  ;;  %v6680_v39 = vrot.slane %v4815_v59, %v6253_v15 }
 0x1e1   :  { %v868_v43 = vpop.f32.mrf.mxu1 }
 0x1e2   :  { %v6637_v0 = vpop.f32.mrf.mxu0  ;;  %v1078_v31 = vadd.f32 %v1077_v2, %v868_v43 }
 0x1e3   :  { %v870_v48 = vpop.f32.mrf.mxu1 }
 0x1e4   :  { %v6639_v5 = vpop.f32.mrf.mxu0  ;;  %v1080_v22 = vadd.f32 %v1079_v40, %v870_v48 }
 0x1e5   :  { %v872_v45 = vpop.f32.mrf.mxu1 }
 0x1e6   :  { %v6641_v46 = vpop.f32.mrf.mxu0  ;;  %v1082_v62 = vadd.f32 %v1081_v33, %v872_v45 }
 0x1e7   :  { %v874_v47 = vpop.f32.mrf.mxu1 }
 0x1e8   :  { %v1101_v49 = vpop.f32.mrf.mxu0 }
 0x1e9   :  { %v878_v51 = vpop.f32.mrf.mxu1 }
 0x1ea   :  { %v1102_v1 = vpop.f32.mrf.mxu0  ;;  %v1088_v33 = vadd.f32 %v6631_v24, %v878_v51 }
 0x1eb   :  { %v880_v50 = vpop.f32.mrf.mxu1 }
 0x1ed   :  { %v882_v4 = vpop.f32.mrf.mxu1 }
 0x1ef   :  { %v6643_v8 = vpop.f32.mrf.mxu1 }
 0x1f1   :  { %v6645_v52 = vpop.f32.mrf.mxu1 }
 0x1f3   :  { %v6647_v55 = vpop.f32.mrf.mxu1 }
 0x1f5   :  { %v892_v7 = vpop.f32.mrf.mxu1 }
 0x1f7   :  { %v893_v9 = vpop.f32.mrf.mxu1 }
 0x20d   :  { %v1333_v12 = vpop.f32.mrf.mxu1 }
 0x20e   :  { %v1370_v14 = vadd.f32 %v1333_v12, %v1068_v10  ;;  %v1084_v10 = vadd.f32 %v6629_v37, %v874_v47  ;;  %v1094_v37 = vadd.f32 %v6637_v0, %v6643_v8  ;;  %v1100_v8 = vadd.f32 %v6641_v46, %v6647_v55 }
 0x20f   :  { %v1335_v19 = vpop.f32.mrf.mxu1 }
 0x210   :  { %v1396_v21 = vadd.f32 %v6653_v57, %v1370_v14  ;;  %v1371_v23 = vadd.f32 %v1335_v19, %v1070_v13 }
 0x211   :  { %v1337_v26 = vpop.f32.mrf.mxu1 }
 0x212   :  { %v1410_v56 = vmax.f32 %v1396_v21, 0.0  ;;  %v1397_v28 = vadd.f32 %v6659_v17, %v1371_v23  ;;  %v1372_v58 = vadd.f32 %v1337_v26, %v1072_v20  ;;  %v1090_v21 = vadd.f32 %v6633_v60, %v880_v50 }
 0x213   :  { %v1339_v18 = vpop.f32.mrf.mxu1  ;;  %v1092_v23 = vadd.f32 %v6635_v44, %v882_v4  ;;  %v1098_v44 = vadd.f32 %v6639_v5, %v6645_v52 }
 0x214   :  { %v1411_v29 = vmax.f32 %v1397_v28, 0.0  ;;  %v1398_v61 = vadd.f32 %v6653_v57, %v1372_v58  ;;  %v1373_v30 = vadd.f32 %v1339_v18, %v1074_v27  ;;  %v1437_v32 = vmul.f32 %v6663_v25, %v1410_v56 }
 0x215   :  { %v1343_v35 = vpop.f32.mrf.mxu1 }
 0x216   :  { %v1412_v63 = vmax.f32 %v1398_v61, 0.0  ;;  %v1399_v36 = vadd.f32 %v6659_v17, %v1373_v30  ;;  %v1438_v38 = vmul.f32 %v6670_v54, %v1411_v29  ;;  %v1374_v41 = vadd.f32 %v1343_v35, %v1078_v31 }
 0x217   :  { %v1345_v53 = vpop.f32.mrf.mxu1  ;;  %v1464_v49 = vadd.f32 %v6675_v34, %v1437_v32 }
 0x218   :  { %v1439_v2 = vmul.f32 %v6663_v25, %v1412_v63  ;;  %v1413_v42 = vmax.f32 %v1399_v36, 0.0  ;;  %v1375_v43 = vadd.f32 %v1345_v53, %v1080_v22  ;;  %v1400_v1 = vadd.f32 %v6653_v57, %v1374_v41 }
 0x219   :  { %v1347_v40 = vpop.f32.mrf.mxu1  ;;  %v1465_v45 = vadd.f32 %v6680_v39, %v1438_v38 }
 0x21a   :  { %v1466_v48 = vadd.f32 %v6675_v34, %v1439_v2  ;;  %v1440_v7 = vmul.f32 %v6670_v54, %v1413_v42  ;;  %v1401_v9 = vadd.f32 %v6659_v17, %v1375_v43  ;;  %v1376_v6 = vadd.f32 %v1347_v40, %v1082_v62 }
 0x21b   :  { %v1414_v12 = vmax.f32 %v1400_v1, 0.0  ;;  %v1349_v13 = vpop.f32.mrf.mxu1 }
 0x21c   :  { %v6691_v14 = vpack.c.bf16 %v1466_v48, %v1464_v49  ;;  %v1467_v16 = vadd.f32 %v6680_v39, %v1440_v7  ;;  %v1415_v19 = vmax.f32 %v1401_v9, 0.0  ;;  %v1402_v20 = vadd.f32 %v6653_v57, %v1376_v6 }
 0x21d   :  { %v1377_v26 = vadd.f32 %v1349_v13, %v1084_v10  ;;  %v1353_v27 = vpop.f32.mrf.mxu1  ;;  %v1441_v56 = vmul.f32 %v6663_v25, %v1414_v12 }
 0x21e   :  { %v1416_v24 = vmax.f32 %v1402_v20, 0.0  ;;  %v1378_v47 = vadd.f32 %v1353_v27, %v1088_v33  ;;  %v6699_v51 = vpack.c.bf16 %v1467_v16, %v1465_v45  ;;  %v1442_v59 = vmul.f32 %v6670_v54, %v1415_v19 }
 0x21f   :  { %v1403_v28 = vadd.f32 %v6659_v17, %v1377_v26  ;;  %v1355_v58 = vpop.f32.mrf.mxu1  ;;  %v1538_v60 = vshll.u32 %v6691_v14, 16  ;;  %v1468_v35 = vadd.f32 %v6675_v34, %v1441_v56  ;;  %v1536_v55 = vshrl.u32 %v6691_v14, 16 }
 0x220   :  { %v1443_v50 = vmul.f32 %v6663_v25, %v1416_v24  ;;  %v1404_v0 = vadd.f32 %v6653_v57, %v1378_v47  ;;  %v1379_v4 = vadd.f32 %v1355_v58, %v1090_v21  ;;  %4892 = vmatprep.mubr.msk.bf16.mxu1 %vm1721_vm5, %v6699_v51  ;;  %v1550_v61 = vshll.u32 %v6699_v51, 16 }
 0x221   :  { %v1417_v18 = vmax.f32 %v1403_v28, 0.0  ;;  %v1357_v29 = vpop.f32.mrf.mxu1  ;;  %1966 = vmatmul.mubr.bf16.vlgmr.msra.gmra.mxu1 %v6691_v14  ;;  %v1540_v30 = vrot.slane %v1538_v60, 1  ;;  %v1469_v22 = vadd.f32 %v6680_v39, %v1442_v59  ;;  %v1548_v49 = vshrl.u32 %v6699_v51, 16 }
 0x222   :  { %v1470_v5 = vadd.f32 %v6675_v34, %v1443_v50  ;;  %v1418_v52 = vmax.f32 %v1404_v0, 0.0  ;;  %v1405_v31 = vadd.f32 %v6659_v17, %v1379_v4  ;;  %v1380_v32 = vadd.f32 %v1357_v29, %v1092_v23  ;;  %v5646_v50 = vld [vmem:[%s7670_s5 + $0x1f0] ss:$8 sps:$4 sm:$0xff]  }
 0x223   :  { %v1444_v63 = vmul.f32 %v6670_v54, %v1417_v18  ;;  %v1359_v46 = vpop.f32.mrf.mxu1  ;;  %v1552_v53 = vrot.slane %v1550_v61, 1  ;;  %v1541_v48 = vor.u32 %v1540_v30, %v1536_v55  ;;  %v2040_v7 = vrot.slane %v6699_v51, 1  ;;  %v5651_v18 = vld [vmem:[%s7670_s5 + $0x1e4] ss:$8 sps:$4 sm:$0xff]   ;;  %v5654_v55 = vld [vmem:[%s7670_s5 + $0x1d4] ss:$8 sps:$4 sm:$0xff]  }
 0x224   :  { %v1419_v36 = vmax.f32 %v1405_v31, 0.0  ;;  %v1406_v38 = vadd.f32 %v6653_v57, %v1380_v32  ;;  %v1381_v41 = vadd.f32 %v1359_v46, %v1094_v37  ;;  %v1445_v2 = vmul.f32 %v6663_v25, %v1418_v52 }
 0x225   :  { %v1471_v62 = vadd.f32 %v6680_v39, %v1444_v63  ;;  %v1363_v42 = vpop.f32.mrf.mxu1  ;;  %v6724_v43 = vpack.c.bf16 %v1470_v5, %v1468_v35  ;;  %v1553_v19 = vor.u32 %v1552_v53, %v1548_v49  ;;  %v2037_v29 = vrot.slane %v6691_v14, 1 }
 0x226   :  { %v1420_v1 = vmax.f32 %v1406_v38, 0.0  ;;  %v1407_v40 = vadd.f32 %v6659_v17, %v1381_v41  ;;  %v1446_v9 = vmul.f32 %v6670_v54, %v1419_v36  ;;  %v1382_v6 = vadd.f32 %v1363_v42, %v1098_v44 }
 0x227   :  { %v1365_v10 = vpop.f32.mrf.mxu1  ;;  %v6730_v33 = vpack.c.bf16 %v1471_v62, %v1469_v22  ;;  %v1543_v45 = vshll.u32 %v6724_v43, 16  ;;  %v1472_v20 = vadd.f32 %v6675_v34, %v1445_v2  ;;  %v2038_v61 = vrot.slane %v6724_v43, 1 }
 0x228   :  { %v1447_v12 = vmul.f32 %v6663_v25, %v1420_v1  ;;  %v1421_v13 = vmax.f32 %v1407_v40, 0.0  ;;  %v1383_v16 = vadd.f32 %v1365_v10, %v1100_v8  ;;  %v1408_v21 = vadd.f32 %v6653_v57, %v1382_v6  ;;  %v5657_v6 = vld [vmem:[%s7670_s5 + $0x1c4] ss:$8 sps:$4 sm:$0xff]  }
 0x229   :  { %4893 = vmatprep.mubr.msk.bf16.mxu1 %vm1721_vm5, %v6730_v33  ;;  %v1367_v23 = vpop.f32.mrf.mxu1  ;;  %v1555_v26 = vshll.u32 %v6730_v33, 16  ;;  %v1545_v27 = vrot.slane %v1543_v45, 1  ;;  %v2041_v51 = vrot.slane %v6730_v33, 1  ;;  %v1473_v56 = vadd.f32 %v6680_v39, %v1446_v9 }
 0x22a   :  { %v1474_v37 = vadd.f32 %v6675_v34, %v1447_v12  ;;  %v1448_v24 = vmul.f32 %v6670_v54, %v1421_v13  ;;  %v1409_v47 = vadd.f32 %v6659_v17, %v1383_v16  ;;  %1976 = vmatmul.mubr.bf16.gmra.mxu1 %v6724_v43  ;;  %v1422_v57 = vmax.f32 %v1408_v21, 0.0  ;;  %v5660_v21 = vld [vmem:[%s7670_s5 + $0x1b4] ss:$8 sps:$4 sm:$0xff]   ;;  %v5658_v23 = vld [vmem:[%s7670_s5 + $0x1b0] ss:$8 sps:$4 sm:$0xff]  }
 0x22b   :  { %v1368_v59 = vpop.f32.mrf.mxu1  ;;  %v1557_v28 = vrot.slane %v1555_v26, 1  ;;  %v1546_v58 = vsel %vm78_vm2, %v1541_v48, %v1545_v27  ;;  %v6751_v17 = vsel %vm331_vm3, %v2040_v7, %v2041_v51  ;;  %v1559_v52 = vshrl.u32 %v6724_v43, 16  ;;  %v5652_v48 = vld [vmem:[%s7670_s5 + $0x1d0] ss:$8 sps:$4 sm:$0xff]  }
 0x22c   :  { %v1475_v60 = vadd.f32 %v6680_v39, %v1448_v24  ;;  %v1423_v44 = vmax.f32 %v1409_v47, 0.0  ;;  %v1482_v0 = vpack.c.bf16 %v1474_v37, %v1472_v20  ;;  %v1449_v4 = vmul.f32 %v6663_v25, %v1422_v57  ;;  %v5655_v20 = vld [vmem:[%s7670_s5 + $0x1c0] ss:$8 sps:$4 sm:$0xff]   ;;  %v5666_v47 = vld [vmem:[%s7670_s5 + $0x194] ss:$8 sps:$4 sm:$0xff]  }
 0x22d   :  { %v1558_v8 = vsel %vm78_vm2, %v1553_v19, %v1557_v28  ;;  %v1567_v32 = vshrl.u32 %v6730_v33, 16  ;;  %v6768_v35 = vsel %vm331_vm3, %v2037_v29, %v2038_v61  ;;  %v5661_v24 = vld [vmem:[%s7670_s5 + $0x1a0] ss:$8 sps:$4 sm:$0xff]   ;;  %v5669_v59 = vld [vmem:[%s7670_s5 + $0x184] ss:$8 sps:$4 sm:$0xff]  }
 0x22e   :  { %v1450_v30 = vmul.f32 %v6670_v54, %v1423_v44  ;;  %4864 = vmatprep.mubr.msk.bf16.mxu0 %vm1721_vm5, %v1558_v8  ;;  %v6762_v5 = vpack.c.bf16 %v1475_v60, %v1473_v56  ;;  %v1563_v31 = vshll.u32 %v1482_v0, 16  ;;  %v1476_v25 = vadd.f32 %v6675_v34, %v1449_v4  ;;  %v5649_v54 = vld [vmem:[%s7670_s5 + $0x1e0] ss:$8 sps:$4 sm:$0xff]   ;;  %v5664_v56 = vld [vmem:[%s7670_s5 + $0x190] ss:$8 sps:$4 sm:$0xff]  }
 0x22f   :  { %1767 = vmatmul.mubr.bf16.vlgmr.msra.gmra.mxu0 %v1546_v58  ;;  %v2043_v14 = vrot.slane %v1482_v0, 1  ;;  %v1561_v34 = vor.u32 %v1559_v52, %v1545_v27  ;;  %v1569_v53 = vor.u32 %v1567_v32, %v1557_v28  ;;  %v1575_v42 = vshrl.u32 %v1482_v0, 16  ;;  %v5663_v27 = vld [vmem:[%s7670_s5 + $0x1a4] ss:$8 sps:$4 sm:$0xff]   ;;  %v5667_v28 = vld [vmem:[%s7670_s5 + $0x180] ss:$8 sps:$4 sm:$0xff]  }
 0x230   :  { %v1477_v22 = vadd.f32 %v6680_v39, %v1450_v30  ;;  %2188 = vmatpush1.bf16.msra.mxu0 %v5646_v50  ;;  %4894 = vmatprep.mubr.msk.bf16.mxu1 %vm1721_vm5, %v6762_v5  ;;  %v1571_v63 = vshll.u32 %v6762_v5, 16  ;;  %v1565_v46 = vrot.slane %v1563_v31, 1  ;;  %v6780_v36 = vpack.c.bf16 %v1476_v25, %v1476_v25  ;;  %v5672_v58 = vld [vmem:[%s7670_s5 + $0x234] ss:$8 sps:$4 sm:$0xff]   ;;  %v5670_v60 = vld [vmem:[%s7670_s5 + $0x230] ss:$8 sps:$4 sm:$0xff]  }
 0x231   :  { %2189 = vmatprep.subr.bf16.mxu0 %v5651_v18  ;;  %v2045_v39 = vrot.slane %v6762_v5, 1  ;;  %v6784_v38 = vsel %vm331_vm3, %v2038_v61, %v2043_v14  ;;  %v1583_v7 = vshrl.u32 %v6762_v5, 16  ;;  %v5675_v44 = vld [vmem:[%s7670_s5 + $0x224] ss:$8 sps:$4 sm:$0xff]   ;;  %v5673_v50 = vld [vmem:[%s7670_s5 + $0x220] ss:$8 sps:$4 sm:$0xff]  }
 0x232   :  { %1986 = vmatmul.mubr.bf16.gmra.mxu1 %v1482_v0  ;;  %v6786_v41 = vpack.c.bf16 %v1477_v22, %v1477_v22  ;;  %v1573_v62 = vrot.slane %v1571_v63, 1  ;;  %v1566_v2 = vsel %vm78_vm2, %v1561_v34, %v1565_v46  ;;  %v1579_v43 = vshll.u32 %v6780_v36, 16  ;;  %v5678_v0 = vld [vmem:[%s7670_s5 + $0x214] ss:$8 sps:$4 sm:$0xff]   ;;  %v5681_v4 = vld [vmem:[%s7670_s5 + $0x204] ss:$8 sps:$4 sm:$0xff]  }
 0x233   :  { %v6793_v49 = vsel %vm331_vm3, %v2041_v51, %v2045_v39  ;;  %v2047_v1 = vrot.slane %v6780_v36, 1  ;;  %v1577_v10 = vor.u32 %v1575_v42, %v1565_v46  ;;  %v1591_v51 = vshrl.u32 %v6780_v36, 16  ;;  %v5679_v8 = vld [vmem:[%s7670_s5 + $0x200] ss:$8 sps:$4 sm:$0xff]  }
 0x234   :  { %2190 = vmatpush1.bf16.msra.mxu0 %v5649_v54  ;;  %4895 = vmatprep.mubr.msk.bf16.mxu1 %vm1721_vm5, %v6786_v41  ;;  %v1574_v40 = vsel %vm78_vm2, %v1569_v53, %v1573_v62  ;;  %v1587_v9 = vshll.u32 %v6786_v41, 16  ;;  %v1581_v33 = vrot.slane %v1579_v43, 1  ;;  %v1585_v12 = vor.u32 %v1583_v7, %v1573_v62 }
 0x235   :  { %4865 = vmatprep.mubr.msk.bf16.mxu0 %vm1721_vm5, %v1574_v40  ;;  %2191 = vmatprep.subr.bf16.mxu0 %v5654_v55  ;;  %v2048_v45 = vsel %vm331_vm3, %v2043_v14, %v2047_v1  ;;  %v1594_v26 = vshrl.u32 %v6786_v41, 16  ;;  %v2049_v18 = vrot.slane %v6786_v41, 1 }
 0x236   :  { %v1589_v13 = vrot.slane %v1587_v9, 1  ;;  %v1582_v16 = vsel %vm78_vm2, %v1577_v10, %v1581_v33  ;;  %v1593_v57 = vor.u32 %v1591_v51, %v1581_v33 }
 0x237   :  { %1777 = vmatmul.mubr.bf16.gmra.mxu0 %v1566_v2  ;;  %v2050_v29 = vsel %vm331_vm3, %v2045_v39, %v2049_v18 }
 0x238   :  { %2192 = vmatpush1.bf16.msra.mxu0 %v5652_v48  ;;  %v1590_v19 = vsel %vm78_vm2, %v1585_v12, %v1589_v13  ;;  %v1596_v37 = vor.u32 %v1594_v26, %v1589_v13 }
 0x239   :  { %4866 = vmatprep.mubr.msk.bf16.mxu0 %vm1721_vm5, %v1590_v19  ;;  %2193 = vmatprep.subr.bf16.mxu0 %v5657_v6 }
 0x23a   :  { %1996 = vmatmul.mubr.bf16.gmra.mxu1 %v6780_v36 }
 0x23c   :  { %2194 = vmatpush1.bf16.msra.mxu0 %v5655_v20  ;;  %v2272_v20 = vld [vmem:[%s7671_s6] ss:$4 sm:$0x3] }
 0x23d   :  { %2195 = vmatprep.subr.bf16.mxu0 %v5660_v21  ;;  %v6889_v21 = vrot.slane %v2272_v20, %v6248_v11 }
 0x23f   :  { %1787 = vmatmul.mubr.bf16.gmra.mxu0 %v1582_v16 }
 0x240   :  { %2196 = vmatpush1.bf16.msra.mxu0 %v5658_v23  ;;  %4867 = vmatprep.mubr.msk.bf16.mxu0 %vm1721_vm5, %v1596_v37  ;;  %v6895_v37 = vrot.slane %v2272_v20, %v6253_v15 }
 0x241   :  { %2197 = vmatprep.subr.bf16.mxu0 %v5663_v27  ;;  %v4948_v27 = vld [vmem:[%s7671_s6 + $0x1] ss:$4 sm:$0x3] }
 0x244   :  { %2198 = vmatpush1.bf16.msra.mxu0 %v5661_v24 }
 0x245   :  { %2199 = vmatprep.subr.bf16.mxu0 %v5666_v47 }
 0x247   :  { %1797 = vmatmul.mubr.bf16.gmra.mxu0 %v1593_v57 }
 0x248   :  { %2200 = vmatpush1.bf16.msra.mxu0 %v5664_v56  ;;  %4944 = vmatprep.mubr.msk.bf16.mxu0 %vm1721_vm5, %v6751_v17  ;;  %v5676_v17 = vld [vmem:[%s7670_s5 + $0x210] ss:$8 sps:$4 sm:$0xff]   ;;  %v6899_v56 = vrot.slane %v4948_v27, %v6248_v11 }
 0x249   :  { %2201 = vmatprep.subr.bf16.mxu0 %v5669_v59 }
 0x24c   :  { %2202 = vmatpush1.bf16.msra.mxu0 %v5667_v28 }
 0x24d   :  { %2211 = vmatprep.subr.bf16.mxu0 %v5672_v58 }
 0x250   :  { %2212 = vmatpush2.bf16.msra.mxu0 %v5670_v60  ;;  %v4949_v60 = vld [vmem:[%s7671_s6 + $0x2] ss:$4 sm:$0x3]  ;;  %s5874_s6 = smov 120  }
 0x251   :  { %2213 = vmatprep.subr.bf16.mxu0 %v5675_v44  ;;  %v6906_v44 = vrot.slane %v4948_v27, %v6253_v15 }
 0x254   :  { %2214 = vmatpush2.bf16.msra.mxu0 %v5673_v50 }
 0x255   :  { %2215 = vmatprep.subr.bf16.mxu0 %v5678_v0 }
 0x258   :  { %2216 = vmatpush2.bf16.msra.mxu0 %v5676_v17 }
 0x259   :  { %2217 = vmatprep.subr.bf16.mxu0 %v5681_v4 }
 0x25c   :  { %2218 = vmatpush2.bf16.msra.mxu0 %v5679_v8 }
 0x25f   :  { %2220 = vmatmul.mubr.bf16.vlgmr.msra.gmra.mxu0 %v6768_v35 }
 0x260   :  { %4945 = vmatprep.mubr.msk.bf16.mxu0 %vm1721_vm5, %v6793_v49 }
 0x267   :  { %2230 = vmatmul.mubr.bf16.gmra.mxu0 %v6784_v38 }
 0x268   :  { %4946 = vmatprep.mubr.msk.bf16.mxu0 %vm1721_vm5, %v2050_v29  ;;  %v6911_v29 = vrot.slane %v4949_v60, %v6248_v11 }
 0x26f   :  { %2240 = vmatmul.mubr.bf16.gmra.mxu0 %v2048_v45 }
 0x270   :  { %4947 = vmatprep.mubr.msk.bf16.mxu0 %vm1721_vm5, %v2049_v18 }
 0x277   :  { %2250 = vmatmul.mubr.bf16.gmra.mxu0 %v2047_v1 }
 0x2e1   :  { %v1967_v61 = vpop.f32.mrf.mxu1 }
 0x2e3   :  { %v1969_v30 = vpop.f32.mrf.mxu1 }
 0x2e5   :  { %v1971_v52 = vpop.f32.mrf.mxu1 }
 0x2e7   :  { %v1973_v31 = vpop.f32.mrf.mxu1 }
 0x2ea   :  { %v1977_v25 = vpop.f32.mrf.mxu1 }
 0x2ec   :  { %v1979_v32 = vpop.f32.mrf.mxu1 }
 0x2ee   :  { %v1981_v35 = vpop.f32.mrf.mxu1 }
 0x2ef   :  { %v1768_v14 = vpop.f32.mrf.mxu0 }
 0x2f0   :  { %v1968_v22 = vadd.f32 %v1967_v61, %v1768_v14  ;;  %v1983_v5 = vpop.f32.mrf.mxu1 }
 0x2f1   :  { %v1770_v54 = vpop.f32.mrf.mxu0 }
 0x2f2   :  { %v1970_v63 = vadd.f32 %v1969_v30, %v1770_v54  ;;  %v1987_v34 = vpop.f32.mrf.mxu1 }
 0x2f3   :  { %v1772_v46 = vpop.f32.mrf.mxu0 }
 0x2f4   :  { %v1972_v55 = vadd.f32 %v1971_v52, %v1772_v46  ;;  %v1989_v39 = vpop.f32.mrf.mxu1 }
 0x2f5   :  { %v1774_v38 = vpop.f32.mrf.mxu0 }
 0x2f6   :  { %v1974_v41 = vadd.f32 %v1973_v31, %v1774_v38  ;;  %v1991_v36 = vpop.f32.mrf.mxu1 }
 0x2f7   :  { %v1778_v53 = vpop.f32.mrf.mxu0 }
 0x2f8   :  { %v1978_v62 = vadd.f32 %v1977_v25, %v1778_v53  ;;  %v1993_v2 = vpop.f32.mrf.mxu1 }
 0x2f9   :  { %v1780_v42 = vpop.f32.mrf.mxu0 }
 0x2fa   :  { %v1980_v43 = vadd.f32 %v1979_v32, %v1780_v42  ;;  %v1997_v49 = vpop.f32.mrf.mxu1 }
 0x2fb   :  { %v1782_v1 = vpop.f32.mrf.mxu0 }
 0x2fc   :  { %v6883_v40 = vpop.f32.mrf.mxu1  ;;  %v1982_v31 = vadd.f32 %v1981_v35, %v1782_v1 }
 0x2fd   :  { %v1784_v48 = vpop.f32.mrf.mxu0 }
 0x2fe   :  { %v2001_v7 = vpop.f32.mrf.mxu1  ;;  %v1984_v25 = vadd.f32 %v1983_v5, %v1784_v48 }
 0x2ff   :  { %v1788_v9 = vpop.f32.mrf.mxu0 }
 0x300   :  { %v2002_v6 = vpop.f32.mrf.mxu1  ;;  %v1988_v38 = vadd.f32 %v1987_v34, %v1788_v9 }
 0x301   :  { %v1790_v10 = vpop.f32.mrf.mxu0 }
 0x303   :  { %v1792_v33 = vpop.f32.mrf.mxu0 }
 0x304   :  { %v1992_v53 = vadd.f32 %v1991_v36, %v1792_v33 }
 0x305   :  { %v1794_v45 = vpop.f32.mrf.mxu0 }
 0x306   :  { %v1994_v7 = vadd.f32 %v1993_v2, %v1794_v45 }
 0x307   :  { %v1798_v12 = vpop.f32.mrf.mxu0 }
 0x308   :  { %v1998_v6 = vadd.f32 %v1997_v49, %v1798_v12 }
 0x309   :  { %v1800_v13 = vpop.f32.mrf.mxu0 }
 0x30a   :  { %v2000_v9 = vadd.f32 %v6883_v40, %v1800_v13 }
 0x30b   :  { %v1802_v16 = vpop.f32.mrf.mxu0 }
 0x30d   :  { %v1803_v19 = vpop.f32.mrf.mxu0 }
 0x31f   :  { %v2221_v23 = vpop.f32.mrf.mxu0 }
 0x320   :  { %v2258_v26 = vadd.f32 %v2221_v23, %v1968_v22  ;;  %v6916_v22 = vrot.slane %v4949_v60, %v6253_v15 }
 0x321   :  { %v2223_v24 = vpop.f32.mrf.mxu0 }
 0x322   :  { %v2284_v47 = vadd.f32 %v6889_v21, %v2258_v26  ;;  %v2259_v51 = vadd.f32 %v2223_v24, %v1970_v63 }
 0x323   :  { %v2225_v57 = vpop.f32.mrf.mxu0 }
 0x324   :  { %v2298_v59 = vmax.f32 %v2284_v47, 0.0  ;;  %v2285_v28 = vadd.f32 %v6895_v37, %v2259_v51  ;;  %v2260_v58 = vadd.f32 %v2225_v57, %v1972_v55 }
 0x325   :  { %v2227_v50 = vpop.f32.mrf.mxu0 }
 0x326   :  { %v2299_v0 = vmax.f32 %v2285_v28, 0.0  ;;  %v2286_v17 = vadd.f32 %v6889_v21, %v2260_v58  ;;  %v2261_v4 = vadd.f32 %v2227_v50, %v1974_v41  ;;  %v2325_v8 = vmul.f32 %v6899_v56, %v2298_v59 }
 0x327   :  { %v2231_v18 = vpop.f32.mrf.mxu0  ;;  %v1990_v41 = vadd.f32 %v1989_v39, %v1790_v10 }
 0x328   :  { %v2300_v61 = vmax.f32 %v2286_v17, 0.0  ;;  %v2287_v30 = vadd.f32 %v6895_v37, %v2261_v4  ;;  %v2262_v52 = vadd.f32 %v2231_v18, %v1978_v62  ;;  %v2326_v32 = vmul.f32 %v6906_v44, %v2299_v0 }
 0x329   :  { %v2233_v14 = vpop.f32.mrf.mxu0  ;;  %v2352_v62 = vadd.f32 %v6911_v29, %v2325_v8 }
 0x32a   :  { %v2327_v54 = vmul.f32 %v6899_v56, %v2300_v61  ;;  %v2301_v63 = vmax.f32 %v2287_v30, 0.0  ;;  %v2288_v46 = vadd.f32 %v6889_v21, %v2262_v52  ;;  %v2263_v55 = vadd.f32 %v2233_v14, %v1980_v43 }
 0x32b   :  { %v2235_v42 = vpop.f32.mrf.mxu0  ;;  %v2353_v20 = vadd.f32 %v6916_v22, %v2326_v32  ;;  %v2381_v26 = vrot.slane %v2352_v62, 1 }
 0x32c   :  { %v2328_v35 = vmul.f32 %v6906_v44, %v2301_v63  ;;  %v2302_v5 = vmax.f32 %v2288_v46, 0.0  ;;  %v2289_v1 = vadd.f32 %v6895_v37, %v2263_v55  ;;  %v2264_v48 = vadd.f32 %v2235_v42, %v1982_v31 }
 0x32d   :  { %v2237_v16 = vpop.f32.mrf.mxu0  ;;  %v2354_v19 = vadd.f32 %v6911_v29, %v2327_v54  ;;  %v2384_v57 = vrot.slane %v2353_v20, 1 }
 0x32e   :  { %v2329_v34 = vmul.f32 %v6899_v56, %v2302_v5  ;;  %v2303_v39 = vmax.f32 %v2289_v1, 0.0  ;;  %v2290_v36 = vadd.f32 %v6889_v21, %v2264_v48  ;;  %v2265_v43 = vadd.f32 %v2237_v16, %v1984_v25 }
 0x32f   :  { %v2241_v10 = vpop.f32.mrf.mxu0  ;;  %v2382_v33 = vrot.slane %v2354_v19, 1  ;;  %v2355_v23 = vadd.f32 %v6916_v22, %v2328_v35 }
 0x330   :  { %v2330_v2 = vmul.f32 %v6906_v44, %v2303_v39  ;;  %v2304_v49 = vmax.f32 %v2290_v36, 0.0  ;;  %v2291_v45 = vadd.f32 %v6895_v37, %v2265_v43  ;;  %v2266_v12 = vadd.f32 %v2241_v10, %v1988_v38 }
 0x331   :  { %v2243_v27 = vpop.f32.mrf.mxu0  ;;  %v2356_v24 = vadd.f32 %v6911_v29, %v2329_v34  ;;  %v2385_v47 = vrot.slane %v2355_v23, 1  ;;  %v2383_v51 = vsel %vm331_vm3, %v2381_v26, %v2382_v33 }
 0x332   :  { %v2331_v40 = vmul.f32 %v6899_v56, %v2304_v49  ;;  %v2305_v13 = vmax.f32 %v2291_v45, 0.0  ;;  %v2292_v59 = vadd.f32 %v6889_v21, %v2266_v12  ;;  %v2267_v28 = vadd.f32 %v2243_v27, %v1990_v41 }
 0x333   :  { %v2245_v58 = vpop.f32.mrf.mxu0  ;;  %v2387_v60 = vrot.slane %v2356_v24, 1  ;;  %v2357_v50 = vadd.f32 %v6916_v22, %v2330_v2  ;;  %v6936_v0 = vmax.f32 %v2352_v62, %v2383_v51  ;;  %v2386_v17 = vsel %vm331_vm3, %v2384_v57, %v2385_v47 }
 0x334   :  { %v2332_v4 = vmul.f32 %v6906_v44, %v2305_v13  ;;  %v2306_v8 = vmax.f32 %v2292_v59, 0.0  ;;  %v2293_v18 = vadd.f32 %v6895_v37, %v2267_v28  ;;  %v2268_v61 = vadd.f32 %v2245_v58, %v1992_v53 }
 0x335   :  { %v2247_v30 = vpop.f32.mrf.mxu0  ;;  %v2358_v52 = vadd.f32 %v6911_v29, %v2331_v40  ;;  %v2389_v31 = vrot.slane %v2357_v50, 1  ;;  %v2388_v25 = vsel %vm331_vm3, %v2382_v33, %v2387_v60  ;;  %v6943_v32 = vmax.f32 %v2353_v20, %v2386_v17 }
 0x336   :  { %v2333_v14 = vmul.f32 %v6899_v56, %v2306_v8  ;;  %v2307_v54 = vmax.f32 %v2293_v18, 0.0  ;;  %v2294_v63 = vadd.f32 %v6889_v21, %v2268_v61  ;;  %v2269_v46 = vadd.f32 %v2247_v30, %v1994_v7 }
 0x337   :  { %v2251_v55 = vpop.f32.mrf.mxu0  ;;  %v2391_v38 = vrot.slane %v2358_v52, 1  ;;  %v2359_v41 = vadd.f32 %v6916_v22, %v2332_v4  ;;  %v6948_v42 = vmax.f32 %v2354_v19, %v2388_v25  ;;  %v2390_v53 = vsel %vm331_vm3, %v2385_v47, %v2389_v31 }
 0x338   :  { %v2360_v62 = vadd.f32 %v6911_v29, %v2333_v14  ;;  %v2334_v35 = vmul.f32 %v6906_v44, %v2307_v54  ;;  %v2308_v5 = vmax.f32 %v2294_v63, 0.0  ;;  %v2295_v1 = vadd.f32 %v6895_v37, %v2269_v46  ;;  %v5688_v14 = vld [vmem:[%s7673_s8 + $0x118] ss:$8 sps:$4 sm:$0xff]   ;;  %v5690_v54 = vld [vmem:[%s7673_s8 + $0x11c] ss:$8 sps:$4 sm:$0xff]  }
 0x339   :  { %v2270_v48 = vadd.f32 %v2251_v55, %v1998_v6  ;;  %v2253_v16 = vpop.f32.mrf.mxu0  ;;  %v2393_v20 = vrot.slane %v2359_v41, 1  ;;  %v2392_v7 = vsel %vm331_vm3, %v2387_v60, %v2391_v38  ;;  %v6955_v34 = vmax.f32 %v2355_v23, %v2390_v53  ;;  %2814 = vmatprep.subr.bf16.mxu0 %v5690_v54  ;;  %v5696_v63 = vld [vmem:[%s7673_s8 + $0x10c] ss:$8 sps:$4 sm:$0xff]   ;;  %v5694_v46 = vld [vmem:[%s7673_s8 + $0x108] ss:$8 sps:$4 sm:$0xff]  }
 0x33a   :  { %v2361_v39 = vadd.f32 %v6916_v22, %v2334_v35  ;;  %v2335_v19 = vmul.f32 %v6899_v56, %v2308_v5  ;;  %v2309_v36 = vmax.f32 %v2295_v1, 0.0  ;;  %v2271_v43 = vadd.f32 %v2253_v16, %v2000_v9  ;;  %2815 = vmatpush1.bf16.msra.mxu0 %v5688_v14  ;;  %v5702_v55 = vld [vmem:[%s7673_s8 + $0xfc] ss:$8 sps:$4 sm:$0xff]   ;;  %v5706_v53 = vld [vmem:[%s7673_s8 + $0xe8] ss:$8 sps:$4 sm:$0xff]  }
 0x33b   :  { %v2296_v10 = vadd.f32 %v6889_v21, %v2270_v48  ;;  %v2255_v33 = vpop.f32.mrf.mxu0  ;;  %v2395_v26 = vrot.slane %v2360_v62, 1  ;;  %v6960_v2 = vmax.f32 %v2356_v24, %v2392_v7  ;;  %v2394_v6 = vsel %vm331_vm3, %v2389_v31, %v2393_v20  ;;  %2816 = vmatprep.subr.bf16.mxu0 %v5696_v63  ;;  %v5712_v35 = vld [vmem:[%s7673_s8 + $0xd8] ss:$8 sps:$4 sm:$0xff]   ;;  %v5720_v5 = vld [vmem:[%s7673_s8 + $0xcc] ss:$8 sps:$4 sm:$0xff]  }
 0x33c   :  { %v2362_v49 = vadd.f32 %v6911_v29, %v2335_v19  ;;  %v2336_v45 = vmul.f32 %v6906_v44, %v2309_v36  ;;  %v2297_v23 = vadd.f32 %v6895_v37, %v2271_v43  ;;  %v2397_v12 = vrot.slane %v2361_v39, 1  ;;  %v5718_v1 = vld [vmem:[%s7673_s8 + $0xc8] ss:$8 sps:$4 sm:$0xff]   ;;  %v5726_v48 = vld [vmem:[%s7673_s8 + $0xbc] ss:$8 sps:$4 sm:$0xff]  }
 0x33d   :  { %v2310_v27 = vmax.f32 %v2296_v10, 0.0  ;;  %v2256_v47 = vpop.f32.mrf.mxu0  ;;  %v2396_v51 = vsel %vm331_vm3, %v2391_v38, %v2395_v26  ;;  %v6967_v9 = vmax.f32 %v2357_v50, %v2394_v6  ;;  %v5875_v25 = vmov 0.0   ;;  %v5700_v38 = vld [vmem:[%s7673_s8 + $0xf8] ss:$8 sps:$4 sm:$0xff]   ;;  %v5705_v14 = vld [vmem:[%s7673_s8 + $0x34] ss:$8 sps:$4 sm:$0xff]  }
 0x33e   :  { %v2399_v21 = vrot.slane %v2362_v49, 1  ;;  %v2363_v57 = vadd.f32 %v6916_v22, %v2336_v45  ;;  %v2311_v24 = vmax.f32 %v2297_v23, 0.0  ;;  %v6970_v40 = vmax.f32 %v2358_v52, %v2396_v51  ;;  %2597 = vmatprep.mubr.f32.mxu1 %v5875_v25  ;;  %2817 = vmatpush1.bf16.msra.mxu0 %v5694_v46  ;;  %v5724_v16 = vld [vmem:[%s7673_s8 + $0xb8] ss:$8 sps:$4 sm:$0xff]   ;;  %v5711_v63 = vld [vmem:[%s7673_s8 + $0x24] ss:$8 sps:$4 sm:$0xff]  }
 0x33f   :  { %v2337_v13 = vmul.f32 %v6899_v56, %v2310_v27  ;;  %v2398_v59 = vsel %vm331_vm3, %v2393_v20, %v2397_v12  ;;  %2818 = vmatprep.subr.bf16.mxu0 %v5702_v55  ;;  %v5703_v54 = vld [vmem:[%s7673_s8 + $0x30] ss:$8 sps:$4 sm:$0xff]   ;;  %v5709_v46 = vld [vmem:[%s7673_s8 + $0x20] ss:$8 sps:$4 sm:$0xff]   ;;  %v5717_v55 = vld [vmem:[%s7673_s8 + $0x14] ss:$8 sps:$4 sm:$0xff]  }
 0x340   :  { %v2401_v28 = vrot.slane %v2363_v57, 1  ;;  %v2338_v37 = vmul.f32 %v6906_v44, %v2311_v24  ;;  %2461 = vrot.lane.b32.xlu0 %v6970_v40, %s5874_s6  ;;  %v6977_v58 = vmax.f32 %v2359_v41, %v2398_v59  ;;  %v2400_v60 = vsel %vm331_vm3, %v2395_v26, %v2399_v21  ;;  %v5708_v41 = vld [vmem:[%s7673_s8 + $0xec] ss:$8 sps:$4 sm:$0xff]  }
 0x341   :  { %v6980_v50 = vmax.f32 %v2360_v62, %v2400_v60  ;;  %v2364_v17 = vadd.f32 %v6911_v29, %v2337_v13  ;;  %v5714_v62 = vld [vmem:[%s7673_s8 + $0xdc] ss:$8 sps:$4 sm:$0xff]  }
 0x342   :  { %2463 = vrot.lane.b32.xlu1 %v6977_v58, %s5874_s6  ;;  %v2402_v56 = vsel %vm331_vm3, %v2397_v12, %v2401_v28  ;;  %v2365_v4 = vadd.f32 %v6916_v22, %v2338_v37  ;;  %2819 = vmatpush1.bf16.msra.mxu0 %v5700_v38  ;;  %v5715_v38 = vld [vmem:[%s7673_s8 + $0x10] ss:$8 sps:$4 sm:$0xff]  }
 0x343   :  { %v6987_v44 = vmax.f32 %v2361_v39, %v2402_v56  ;;  %v2403_v8 = vrot.slane %v2364_v17, 1  ;;  %2820 = vmatprep.subr.bf16.mxu0 %v5708_v41  ;;  %v5723_v41 = vld [vmem:[%s7673_s8 + $0x4] ss:$8 sps:$4 sm:$0xff]  }
 0x344   :  { %2465 = vrot.lane.b32.xlu0 %v6980_v50, %s5874_s6  ;;  %v2405_v30 = vrot.slane %v2365_v4, 1 }
 0x345   :  { %v6991_v18 = vmax.f32 %v2364_v17, %v2403_v8  ;;  %v2404_v61 = vsel %vm331_vm3, %v2399_v21, %v2403_v8 }
 0x346   :  { %2467 = vrot.lane.b32.xlu1 %v6987_v44, %s5874_s6  ;;  %v6998_v29 = vmax.f32 %v2362_v49, %v2404_v61  ;;  %v2406_v22 = vsel %vm331_vm3, %v2401_v28, %v2405_v30  ;;  %v2434_v52 = vmax.f32 %v2365_v4, %v2405_v30  ;;  %2821 = vmatpush1.bf16.msra.mxu0 %v5706_v53  ;;  %v5685_v61 = vld [vmem:[%s7673_s8 + $0x60] ss:$8 sps:$4 sm:$0xff]   ;;  %v5693_v30 = vld [vmem:[%s7673_s8 + $0x54] ss:$8 sps:$4 sm:$0xff]  }
 0x347   :  { %v2432_v31 = vmax.f32 %v2363_v57, %v2406_v22  ;;  %2822 = vmatprep.subr.bf16.mxu0 %v5714_v62  ;;  %v5691_v22 = vld [vmem:[%s7673_s8 + $0x50] ss:$8 sps:$4 sm:$0xff]   ;;  %v2640_v53 = vld [vmem:[%s7673_s8 + $0xa0] sm:$0xff] }
 0x348   :  { %2473 = vrot.lane.b32.xlu0 %v6991_v18, %s5874_s6  ;;  %v5721_v62 = vld [vmem:[%s7673_s8] ss:$8 sps:$4 sm:$0xff]  }
 0x34a   :  { %2469 = vrot.lane.b32.xlu1 %v6998_v29, %s5874_s6  ;;  %2823 = vmatpush1.bf16.msra.mxu0 %v5712_v35  ;;  %v5022_v35 = vcombine.high %v2640_v53, %v2640_v53 }
 0x34b   :  { %2824 = vmatprep.subr.bf16.mxu0 %v5720_v5  ;;  %v5021_v5 = vcombine.low %v2640_v53, %v2640_v53  ;;  %v5763_v53 = vld [vmem:[%s7673_s8 + $0x174] ss:$8 sps:$4 sm:$0xff]  }
 0x34c   :  { %2475 = vrot.lane.b32.xlu0 %v2434_v52, %s5874_s6 }
 0x34e   :  { %2471 = vrot.lane.b32.xlu1 %v2432_v31, %s5874_s6  ;;  %2825 = vmatpush1.bf16.msra.mxu0 %v5718_v1  ;;  %v2975_v1 = vsel %vm2807_vm9, %v5021_v5, 0  ;;  %v5764_v5 = vld [vmem:[%s7673_s8 + $0x160] ss:$8 sps:$4 sm:$0xff]  }
 0x34f   :  { %2826 = vmatprep.subr.bf16.mxu0 %v5726_v48  ;;  %v5729_v48 = vld [vmem:[%s7673_s8 + $0xa8] ss:$8 sps:$4 sm:$0xff]  }
 0x350   :  { %2457 = vrot.lane.b32.xlu0 %v6960_v2, %s5874_s6 }
 0x352   :  { %2459 = vrot.lane.b32.xlu1 %v6967_v9, %s5874_s6  ;;  %2827 = vmatpush1.bf16.msra.mxu0 %v5724_v16  ;;  %v5731_v16 = vld [vmem:[%s7673_s8 + $0xac] ss:$8 sps:$4 sm:$0xff]  }
 0x353   :  { %2828 = vmatprep.subr.bf16.mxu0 %v5731_v16  ;;  %v5767_v16 = vld [vmem:[%s7673_s8 + $0x150] ss:$8 sps:$4 sm:$0xff]  }
 0x354   :  { %2453 = vrot.lane.b32.xlu0 %v6948_v42, %s5874_s6 }
 0x356   :  { %2455 = vrot.lane.b32.xlu1 %v6955_v34, %s5874_s6  ;;  %2829 = vmatpush1.bf16.msra.mxu0 %v5729_v48  ;;  %v5046_v48 = vld [vmem:[%s7673_s8 + $0x1f0] sm:$0xff] }
 0x358   :  { %2449 = vrot.lane.b32.xlu0 %v6936_v0, %s5874_s6 }
 0x35a   :  { %2451 = vrot.lane.b32.xlu1 %v6943_v32, %s5874_s6 }
 0x3b2   :  { %v2462_v20 = vpop.permute.xlu0 %2461 }
 0x3b4   :  { %v2464_v7 = vpop.permute.xlu1 %2463 }
 0x3b5   :  { %v2481_v51 = vsel %vm2477_vm6, %v2462_v20, %v2464_v7  ;;  %v2506_v13 = vmax.f32 %v6977_v58, %v2464_v7  ;;  %v5732_v20 = vld [vmem:[%s7673_s8 + $0x90] ss:$8 sps:$4 sm:$0xff]   ;;  %v5734_v7 = vld [vmem:[%s7673_s8 + $0x94] ss:$8 sps:$4 sm:$0xff]  }
 0x3b6   :  { %v2466_v39 = vpop.permute.xlu0 %2465  ;;  %v2505_v28 = vmax.f32 %v6970_v40, %v2481_v51 }
 0x3b8   :  { %v2468_v19 = vpop.permute.xlu1 %2467 }
 0x3b9   :  { %v2482_v45 = vsel %vm2477_vm6, %v2466_v39, %v2468_v19  ;;  %v2508_v21 = vmax.f32 %v6987_v44, %v2468_v19  ;;  %v4975_v39 = vld [vmem:[%s7673_s8 + $0x148] sm:$0xff] }
 0x3ba   :  { %v2474_v36 = vpop.permute.xlu0 %2473  ;;  %v2507_v57 = vmax.f32 %v6980_v50, %v2482_v45  ;;  %v4997_v19 = vcombine.high %v4975_v39, %v4975_v39  ;;  %v5743_v45 = vld [vmem:[%s7673_s8 + $0x128] ss:$8 sps:$4 sm:$0xff]  }
 0x3bc   :  { %v2470_v43 = vpop.permute.xlu1 %2469  ;;  %4998 = vmatprep.subr.msk.bf16.mxu0 %vm2807_vm9, %v4997_v19  ;;  %v5774_v19 = vld [vmem:[%s7673_s8 + $0x1e4] ss:$8 sps:$4 sm:$0xff]  }
 0x3be   :  { %v2476_v10 = vpop.permute.xlu0 %2475 }
 0x3bf   :  { %v2484_v33 = vsel %vm2477_vm6, %v2474_v36, %v2476_v10  ;;  %v2512_v26 = vmax.f32 %v2434_v52, %v2476_v10  ;;  %v5699_v52 = vld [vmem:[%s7673_s8 + $0x44] ss:$8 sps:$4 sm:$0xff]   ;;  %v5736_v10 = vld [vmem:[%s7673_s8 + $0x80] ss:$8 sps:$4 sm:$0xff]  }
 0x3c0   :  { %v2511_v6 = vmax.f32 %v6991_v18, %v2484_v33  ;;  %v2472_v49 = vpop.permute.xlu1 %2471  ;;  %v5738_v36 = vld [vmem:[%s7673_s8 + $0x84] ss:$8 sps:$4 sm:$0xff]  }
 0x3c1   :  { %v2483_v23 = vsel %vm2477_vm6, %v2470_v43, %v2472_v49  ;;  %v2510_v12 = vmax.f32 %v2432_v31, %v2472_v49  ;;  %4950 = vmatprep.subr.msk.mxu1 %vm2526_vm7, %v2512_v26  ;;  %v5697_v31 = vld [vmem:[%s7673_s8 + $0x40] ss:$8 sps:$4 sm:$0xff]   ;;  %v4996_v43 = vcombine.low %v4975_v39, %v4975_v39  ;;  %v5742_v26 = vld [vmem:[%s7673_s8 + $0x13c] ss:$8 sps:$4 sm:$0xff]   ;;  %v5745_v49 = vld [vmem:[%s7673_s8 + $0x12c] ss:$8 sps:$4 sm:$0xff]  }
 0x3c2   :  { %v2509_v27 = vmax.f32 %v6998_v29, %v2483_v23  ;;  %4951 = vmatpush1.msk.msra.mxu1 %vm2526_vm7, %v2511_v6  ;;  %v2458_v47 = vpop.permute.xlu0 %2457  ;;  %v2515_v29 = vld [vmem:[%s7672_s7 + $0x10] sm:$0x3f]  ;;  %v5740_v6 = vld [vmem:[%s7673_s8 + $0x138] ss:$8 sps:$4 sm:$0xff]   ;;  %v5748_v23 = vld [vmem:[%s7673_s8 + $0x1c4] ss:$8 sps:$4 sm:$0xff]  }
 0x3c3   :  { %2553 = vmatprep.subr.mxu1 %v2510_v12  ;;  %v2809_v33 = vsel %vm2807_vm9, %v4996_v43, 0  ;;  %v5777_v43 = vld [vmem:[%s7673_s8 + $0x1d4] ss:$8 sps:$4 sm:$0xff]  }
 0x3c4   :  { %2554 = vmatpush1.msra.mxu1 %v2509_v27  ;;  %v2460_v24 = vpop.permute.xlu1 %2459  ;;  %2841 = vmatpush2.bf16.msra.mxu0 %v2809_v33 }
 0x3c5   :  { %v2480_v59 = vsel %vm2477_vm6, %v2458_v47, %v2460_v24  ;;  %2555 = vmatprep.subr.mxu1 %v2508_v21  ;;  %v2504_v60 = vmax.f32 %v6967_v9, %v2460_v24  ;;  %2842 = vmatprep.subr.bf16.mxu0 %v5742_v26 }
 0x3c6   :  { %v2454_v37 = vpop.permute.xlu0 %2453  ;;  %2556 = vmatpush1.msra.mxu1 %v2507_v57  ;;  %v2503_v17 = vmax.f32 %v6960_v2, %v2480_v59  ;;  %v5684_v2 = vld [vmem:[%s7673_s8 + $0x74] ss:$8 sps:$4 sm:$0xff]  }
 0x3c7   :  { %2557 = vmatprep.subr.mxu1 %v2506_v13 }
 0x3c8   :  { %2558 = vmatpush1.msra.mxu1 %v2505_v28  ;;  %v2456_v56 = vpop.permute.xlu1 %2455  ;;  %2843 = vmatpush2.bf16.msra.mxu0 %v5740_v6 }
 0x3c9   :  { %v2479_v50 = vsel %vm2477_vm6, %v2454_v37, %v2456_v56  ;;  %v2502_v4 = vmax.f32 %v6955_v34, %v2456_v56  ;;  %2559 = vmatprep.subr.mxu1 %v2504_v60  ;;  %v2513_v34 = vld [vmem:[%s7672_s7] sm:$0xff]  ;;  %2844 = vmatprep.subr.bf16.mxu0 %v5745_v49  ;;  %v5778_v49 = vld [vmem:[%s7675_s10 + $0xc8] sm:$0xff]  }
 0x3ca   :  { %v2501_v58 = vmax.f32 %v6948_v42, %v2479_v50  ;;  %2560 = vmatpush1.msra.mxu1 %v2503_v17  ;;  %v2450_v44 = vpop.permute.xlu0 %2449  ;;  %v5682_v42 = vld [vmem:[%s7673_s8 + $0x70] ss:$8 sps:$4 sm:$0xff]  }
 0x3cb   :  { %2561 = vmatprep.subr.mxu1 %v2502_v4 }
 0x3cc   :  { %2562 = vmatpush1.msra.mxu1 %v2501_v58  ;;  %v2452_v40 = vpop.permute.xlu1 %2451  ;;  %2845 = vmatpush2.bf16.msra.mxu0 %v5743_v45  ;;  %v5779_v45 = vld [vmem:[%s7675_s10 + $0x80] sm:$0xff]  }
 0x3cd   :  { %v2478_v8 = vsel %vm2477_vm6, %v2450_v44, %v2452_v40  ;;  %v2500_v9 = vmax.f32 %v6943_v32, %v2452_v40  ;;  %v5687_v32 = vld [vmem:[%s7673_s8 + $0x64] ss:$8 sps:$4 sm:$0xff]   ;;  %3182 = vmatprep.subr.bf16.mxu0 %v5748_v23 }
 0x3ce   :  { %v2499_v18 = vmax.f32 %v6936_v0, %v2478_v8  ;;  %v2514_v0 = vld [vmem:[%s7672_s7 + $0x8] sm:$0xff]  ;;  %v5780_v23 = vld [vmem:[%s7675_s10 + $0xc0] sm:$0xff]  }
 0x3cf   :  { %2563 = vmatprep.subr.mxu1 %v2500_v9 }
 0x3d0   :  { %2564 = vmatpush1.msra.mxu1 %v2499_v18  ;;  %v5746_v18 = vld [vmem:[%s7673_s8 + $0x1c0] ss:$8 sps:$4 sm:$0xff]  }
 0x3d1   :  { %4952 = vmatmul.mubr.msk.f32.vlgmr.msra.gmra.mxu1 %vm2516_vm8, %v2513_v34  ;;  %2980 = vmatprep.subr.bf16.mxu1 %v5684_v2 }
 0x3d2   :  { %2603 = vmatprep.mubr.f32.mxu1 %v5875_v25  ;;  %2981 = vmatpush1.bf16.msra.mxu1 %v5682_v42 }
 0x3d3   :  { %2982 = vmatprep.subr.bf16.mxu1 %v5687_v32  ;;  %v5751_v32 = vld [vmem:[%s7673_s8 + $0x1b4] ss:$8 sps:$4 sm:$0xff]  }
 0x3d5   :  { %4953 = vmatmul.mubr.msk.f32.gmra.mxu1 %vm2516_vm8, %v2514_v0 }
 0x3d6   :  { %2609 = vmatprep.mubr.f32.mxu1 %v5875_v25  ;;  %2983 = vmatpush1.bf16.msra.mxu1 %v5685_v61 }
 0x3d7   :  { %2984 = vmatprep.subr.bf16.mxu1 %v5693_v30  ;;  %v5749_v30 = vld [vmem:[%s7673_s8 + $0x1b0] ss:$8 sps:$4 sm:$0xff]  }
 0x3d9   :  { %4954 = vmatmul.mubr.msk.f32.gmra.mxu1 %vm2516_vm8, %v2515_v29  ;;  %v5754_v29 = vld [vmem:[%s7673_s8 + $0x1a4] ss:$8 sps:$4 sm:$0xff]  }
 0x3da   :  { %2985 = vmatpush1.bf16.msra.mxu1 %v5691_v22 }
 0x3db   :  { %2986 = vmatprep.subr.bf16.mxu1 %v5699_v52 }
 0x3de   :  { %2987 = vmatpush1.bf16.msra.mxu1 %v5697_v31  ;;  %v5752_v31 = vld [vmem:[%s7673_s8 + $0x1a0] ss:$8 sps:$4 sm:$0xff]  }
 0x3df   :  { %2988 = vmatprep.subr.bf16.mxu1 %v5705_v14 }
 0x3e2   :  { %2989 = vmatpush1.bf16.msra.mxu1 %v5703_v54 }
 0x3e3   :  { %2990 = vmatprep.subr.bf16.mxu1 %v5711_v63  ;;  %v5757_v63 = vld [vmem:[%s7673_s8 + $0x194] ss:$8 sps:$4 sm:$0xff]  }
 0x3e6   :  { %2991 = vmatpush1.bf16.msra.mxu1 %v5709_v46 }
 0x3e7   :  { %2992 = vmatprep.subr.bf16.mxu1 %v5717_v55  ;;  %v5755_v55 = vld [vmem:[%s7673_s8 + $0x190] ss:$8 sps:$4 sm:$0xff]  }
 0x3ea   :  { %2993 = vmatpush1.bf16.msra.mxu1 %v5715_v38  ;;  %v5760_v38 = vld [vmem:[%s7673_s8 + $0x184] ss:$8 sps:$4 sm:$0xff]  }
 0x3eb   :  { %2994 = vmatprep.subr.bf16.mxu1 %v5723_v41  ;;  %v5758_v41 = vld [vmem:[%s7673_s8 + $0x180] ss:$8 sps:$4 sm:$0xff]  }
 0x3ee   :  { %2995 = vmatpush1.bf16.msra.mxu1 %v5721_v62  ;;  %v5761_v62 = vld [vmem:[%s7673_s8 + $0x170] ss:$8 sps:$4 sm:$0xff]  }
 0x3ef   :  { %5023 = vmatprep.subr.msk.bf16.mxu1 %vm2807_vm9, %v5022_v35  ;;  %v5766_v35 = vld [vmem:[%s7673_s8 + $0x164] ss:$8 sps:$4 sm:$0xff]  }
 0x3f2   :  { %3007 = vmatpush2.bf16.msra.mxu1 %v2975_v1  ;;  %v5769_v1 = vld [vmem:[%s7673_s8 + $0x154] ss:$8 sps:$4 sm:$0xff]  }
 0x3f3   :  { %3008 = vmatprep.subr.bf16.mxu1 %v5734_v7  ;;  %v5067_v7 = vcombine.low %v5046_v48, %v5046_v48 }
 0x3f5   :  { %v3177_v39 = vsel %vm2807_vm9, %v5067_v7, 0 }
 0x3f6   :  { %3009 = vmatpush2.bf16.msra.mxu1 %v5732_v20  ;;  %v5068_v20 = vcombine.high %v5046_v48, %v5046_v48 }
 0x3f7   :  { %3010 = vmatprep.subr.bf16.mxu1 %v5738_v36  ;;  %v5772_v36 = vld [vmem:[%s7673_s8 + $0x1e0] ss:$8 sps:$4 sm:$0xff]  }
 0x3fa   :  { %3011 = vmatpush2.bf16.msra.mxu1 %v5736_v10  ;;  %v5775_v10 = vld [vmem:[%s7673_s8 + $0x1d0] ss:$8 sps:$4 sm:$0xff]  }
 0x3fb   :  { %3435 = vmatprep.subr.bf16.mxu1 %v5873_v3 }
 0x491   :  { %v2599_v12 = vpop.f32.mrf.mxu1 }
 0x493   :  { %v2601_v27 = vpop.f32.mrf.mxu1 }
 0x495   :  { %v2605_v47 = vpop.f32.mrf.mxu1 }
 0x496   :  { %v7185_v51 = vpack.c.bf16 %v2605_v47, %v2599_v12  ;;  %v5781_v12 = vld [vmem:[%s7675_s10 + $0x78] sm:$0xff]   ;;  %v5783_v47 = vld [vmem:[%s7675_s10 + $0x70] sm:$0xff]  }
 0x497   :  { %v2607_v21 = vpop.f32.mrf.mxu1 }
 0x498   :  { %v2617_v57 = vpack.c.bf16 %v2607_v21, %v2601_v27  ;;  %v2666_v24 = vshll.u32 %v7185_v51, 16  ;;  %v2664_v44 = vshrl.u32 %v7185_v51, 16  ;;  %v3057_v26 = vrot.slane %v7185_v51, 1  ;;  %v5782_v27 = vld [vmem:[%s7675_s10 + $0xb8] sm:$0xff]   ;;  %v5785_v21 = vld [vmem:[%s7675_s10 + $0x68] sm:$0xff]  }
 0x499   :  { %v2611_v13 = vpop.f32.mrf.mxu1 }
 0x49a   :  { %v2678_v59 = vshll.u32 %v2617_v57, 16  ;;  %v7188_v28 = vpack.c.bf16 %v2611_v13, %v2611_v13  ;;  %5024 = vmatprep.mubr.msk.bf16.mxu1 %vm2800_vm10, %v2617_v57  ;;  %v2668_v50 = vrot.slane %v2666_v24, 1  ;;  %v2676_v4 = vshrl.u32 %v2617_v57, 16  ;;  %v5787_v24 = vld [vmem:[%s7675_s10 + $0x60] sm:$0xff]  }
 0x49b   :  { %v2613_v37 = vpop.f32.mrf.mxu1  ;;  %3013 = vmatmul.mubr.bf16.vlgmr.msra.gmra.mxu1 %v7185_v51  ;;  %v3060_v54 = vrot.slane %v2617_v57, 1  ;;  %v5784_v51 = vld [vmem:[%s7675_s10 + $0xb0] sm:$0xff]   ;;  %v5786_v57 = vld [vmem:[%s7675_s10 + $0xa8] sm:$0xff]   ;;  %v5788_v13 = vld [vmem:[%s7675_s10 + $0xa0] sm:$0xff]  }
 0x49c   :  { %v2680_v60 = vrot.slane %v2678_v59, 1  ;;  %v2671_v17 = vshll.u32 %v7188_v28, 16  ;;  %v7193_v56 = vpack.c.bf16 %v2613_v37, %v2613_v37  ;;  %v2669_v34 = vor.u32 %v2668_v50, %v2664_v44  ;;  %3436 = vmatpush1.bf16.msra.mxu1 %v5779_v45  ;;  %v5789_v59 = vld [vmem:[%s7675_s10 + $0x58] sm:$0xff]   ;;  %v5791_v37 = vld [vmem:[%s7675_s10 + $0x50] sm:$0xff]   ;;  %v5795_v50 = vld [vmem:[%s7675_s10 + $0x88] sm:$0xff]  }
 0x49d   :  { %v2687_v22 = vshrl.u32 %v7188_v28, 16  ;;  %v3058_v33 = vrot.slane %v7188_v28, 1  ;;  %3437 = vmatprep.subr.bf16.mxu1 %v5873_v3 }
 0x49e   :  { %5025 = vmatprep.mubr.msk.bf16.mxu1 %vm2800_vm10, %v7193_v56  ;;  %v2683_v58 = vshll.u32 %v7193_v56, 16  ;;  %v2673_v40 = vrot.slane %v2671_v17, 1  ;;  %v2690_v8 = vshrl.u32 %v7193_v56, 16  ;;  %v2681_v9 = vor.u32 %v2680_v60, %v2676_v4  ;;  %v5792_v60 = vld [vmem:[%s7675_s10 + $0x90] sm:$0xff]   ;;  %v5793_v17 = vld [vmem:[%s7675_s10 + $0x48] sm:$0xff]  }
 0x49f   :  { %v3061_v52 = vrot.slane %v7193_v56, 1  ;;  %v3059_v6 = vsel %vm331_vm3, %v3057_v26, %v3058_v33  ;;  %v5794_v56 = vld [vmem:[%s7675_s10 + $0xd0] sm:$0xff]  }
 0x4a0   :  { %v2685_v2 = vrot.slane %v2683_v58, 1  ;;  %v2674_v61 = vsel %vm78_vm2, %v2669_v34, %v2673_v40  ;;  %v2689_v14 = vor.u32 %v2687_v22, %v2673_v40  ;;  %3438 = vmatpush1.bf16.msra.mxu1 %v5781_v12 }
 0x4a1   :  { %v3062_v46 = vsel %vm331_vm3, %v3060_v54, %v3061_v52  ;;  %3439 = vmatprep.subr.bf16.mxu1 %v5873_v3 }
 0x4a2   :  { %v2686_v42 = vsel %vm78_vm2, %v2681_v9, %v2685_v2  ;;  %v2692_v0 = vor.u32 %v2690_v8, %v2685_v2 }
 0x4a3   :  { %4999 = vmatprep.mubr.msk.bf16.mxu0 %vm2800_vm10, %v2686_v42  ;;  %3023 = vmatmul.mubr.bf16.gmra.mxu1 %v7188_v28  ;;  %v5790_v28 = vld [vmem:[%s7675_s10 + $0x98] sm:$0xff]  }
 0x4a4   :  { %2847 = vmatmul.mubr.bf16.vlgmr.msra.gmra.mxu0 %v2674_v61  ;;  %3440 = vmatpush1.bf16.msra.mxu1 %v5783_v47 }
 0x4a5   :  { %3183 = vmatpush1.bf16.msra.mxu0 %v5746_v18  ;;  %5000 = vmatprep.mubr.msk.bf16.mxu0 %vm2800_vm10, %v2692_v0 }
 0x4a6   :  { %3184 = vmatprep.subr.bf16.mxu0 %v5751_v32  ;;  %3441 = vmatprep.subr.bf16.mxu1 %v5873_v3 }
 0x4a8   :  { %3442 = vmatpush1.bf16.msra.mxu1 %v5785_v21 }
 0x4a9   :  { %3185 = vmatpush1.bf16.msra.mxu0 %v5749_v30  ;;  %3443 = vmatprep.subr.bf16.mxu1 %v5873_v3 }
 0x4aa   :  { %3186 = vmatprep.subr.bf16.mxu0 %v5754_v29 }
 0x4ac   :  { %2857 = vmatmul.mubr.bf16.gmra.mxu0 %v2689_v14  ;;  %3444 = vmatpush1.bf16.msra.mxu1 %v5787_v24 }
 0x4ad   :  { %3187 = vmatpush1.bf16.msra.mxu0 %v5752_v31  ;;  %5070 = vmatprep.mubr.msk.bf16.mxu0 %vm2800_vm10, %v3062_v46 }
 0x4ae   :  { %3188 = vmatprep.subr.bf16.mxu0 %v5757_v63  ;;  %3445 = vmatprep.subr.bf16.mxu1 %v5873_v3 }
 0x4b0   :  { %3446 = vmatpush1.bf16.msra.mxu1 %v5789_v59 }
 0x4b1   :  { %3189 = vmatpush1.bf16.msra.mxu0 %v5755_v55  ;;  %3447 = vmatprep.subr.bf16.mxu1 %v5873_v3  ;;  %v5072_v55 = vld [vmem:[%s7674_s9 + $0x1] ss:$4 sm:$0x3] }
 0x4b2   :  { %3190 = vmatprep.subr.bf16.mxu0 %v5760_v38 }
 0x4b4   :  { %3448 = vmatpush1.bf16.msra.mxu1 %v5791_v37 }
 0x4b5   :  { %3191 = vmatpush1.bf16.msra.mxu0 %v5758_v41  ;;  %3449 = vmatprep.subr.bf16.mxu1 %v5873_v3 }
 0x4b6   :  { %3192 = vmatprep.subr.bf16.mxu0 %v5763_v53 }
 0x4b8   :  { %3450 = vmatpush1.bf16.msra.mxu1 %v5793_v17 }
 0x4b9   :  { %3193 = vmatpush1.bf16.msra.mxu0 %v5761_v62  ;;  %3465 = vmatprep.subr.bf16.mxu1 %v5873_v3 }
 0x4ba   :  { %3194 = vmatprep.subr.bf16.mxu0 %v5766_v35 }
 0x4bc   :  { %3466 = vmatpush2.bf16.msra.mxu1 %v5795_v50 }
 0x4bd   :  { %3195 = vmatpush1.bf16.msra.mxu0 %v5764_v5  ;;  %3541 = vmatprep.subr.bf16.mxu1 %v5873_v3  ;;  %v3269_v5 = vrot.slane %v5072_v55, %v6248_v11 }
 0x4be   :  { %3196 = vmatprep.subr.bf16.mxu0 %v5769_v1 }
 0x4c1   :  { %3197 = vmatpush1.bf16.msra.mxu0 %v5767_v16 }
 0x4c2   :  { %5069 = vmatprep.subr.msk.bf16.mxu0 %vm2807_vm9, %v5068_v20  ;;  %v5073_v20 = vld [vmem:[%s7674_s9 + $0x2] ss:$4 sm:$0x3] }
 0x4c3   :  { %v3292_v47 = vrot.slane %v5073_v20, %v6253_v15 }
 0x4c5   :  { %3209 = vmatpush2.bf16.msra.mxu0 %v3177_v39 }
 0x4c6   :  { %3210 = vmatprep.subr.bf16.mxu0 %v5774_v19 }
 0x4c9   :  { %3211 = vmatpush2.bf16.msra.mxu0 %v5772_v36 }
 0x4ca   :  { %3212 = vmatprep.subr.bf16.mxu0 %v5777_v43  ;;  %v3273_v43 = vrot.slane %v5072_v55, %v6253_v15 }
 0x4cd   :  { %3213 = vmatpush2.bf16.msra.mxu0 %v5775_v10 }
 0x4ce   :  { %3680 = vmatprep.subr.bf16.mxu0 %v5873_v3 }
 0x4d0   :  { %3215 = vmatmul.mubr.bf16.vlgmr.msra.gmra.mxu0 %v3059_v6  ;;  %v3288_v6 = vrot.slane %v5073_v20, %v6248_v11 }
 0x4d1   :  { %5071 = vmatprep.mubr.msk.bf16.mxu0 %vm2800_vm10, %v3061_v52  ;;  %3681 = vmatpush1.bf16.msra.mxu0 %v5778_v49  ;;  %v3239_v52 = vld [vmem:[%s7674_s9] ss:$4 sm:$0x3] }
 0x4d2   :  { %3682 = vmatprep.subr.bf16.mxu0 %v5873_v3  ;;  %v3244_v14 = vrot.slane %v3239_v52, %v6248_v11  ;;  %v3248_v38 = vrot.slane %v3239_v52, %v6253_v15 }
 0x4d5   :  { %3683 = vmatpush1.bf16.msra.mxu0 %v5780_v23 }
 0x4d6   :  { %3684 = vmatprep.subr.bf16.mxu0 %v5873_v3 }
 0x4d8   :  { %3225 = vmatmul.mubr.bf16.gmra.mxu0 %v3058_v33 }
 0x4d9   :  { %3685 = vmatpush1.bf16.msra.mxu0 %v5782_v27 }
 0x4da   :  { %3686 = vmatprep.subr.bf16.mxu0 %v5873_v3 }
 0x4dd   :  { %3687 = vmatpush1.bf16.msra.mxu0 %v5784_v51 }
 0x4de   :  { %3688 = vmatprep.subr.bf16.mxu0 %v5873_v3 }
 0x4e1   :  { %3689 = vmatpush1.bf16.msra.mxu0 %v5786_v57 }
 0x4e2   :  { %3690 = vmatprep.subr.bf16.mxu0 %v5873_v3 }
 0x4e5   :  { %3691 = vmatpush1.bf16.msra.mxu0 %v5788_v13 }
 0x4e6   :  { %3692 = vmatprep.subr.bf16.mxu0 %v5873_v3 }
 0x4e9   :  { %3693 = vmatpush1.bf16.msra.mxu0 %v5790_v28 }
 0x4ea   :  { %3694 = vmatprep.subr.bf16.mxu0 %v5873_v3 }
 0x4ed   :  { %3695 = vmatpush1.bf16.msra.mxu0 %v5792_v60 }
 0x4ee   :  { %3710 = vmatprep.subr.bf16.mxu0 %v5873_v3 }
 0x4f1   :  { %3711 = vmatpush2.bf16.msra.mxu0 %v5794_v56 }
 0x4f2   :  { %5329 = vmatprep.subr.bf16.mxu0 %v5875_v25 }
 0x55b   :  { %v3014_v4 = vpop.f32.mrf.mxu1 }
 0x55d   :  { %v3016_v58 = vpop.f32.mrf.mxu1 }
 0x55f   :  { %v3018_v44 = vpop.f32.mrf.mxu1 }
 0x561   :  { %v3020_v40 = vpop.f32.mrf.mxu1 }
 0x563   :  { %v3024_v8 = vpop.f32.mrf.mxu1 }
 0x564   :  { %v2848_v9 = vpop.f32.mrf.mxu0 }
 0x565   :  { %v3026_v2 = vpop.f32.mrf.mxu1  ;;  %v3015_v31 = vadd.f32 %v3014_v4, %v2848_v9 }
 0x566   :  { %v2850_v18 = vpop.f32.mrf.mxu0 }
 0x567   :  { %v3028_v34 = vpop.f32.mrf.mxu1  ;;  %v3017_v63 = vadd.f32 %v3016_v58, %v2850_v18 }
 0x568   :  { %v2852_v42 = vpop.f32.mrf.mxu0 }
 0x569   :  { %v3029_v32 = vpop.f32.mrf.mxu1  ;;  %v3019_v53 = vadd.f32 %v3018_v44, %v2852_v42 }
 0x56a   :  { %v2854_v0 = vpop.f32.mrf.mxu0 }
 0x56b   :  { %v3021_v48 = vadd.f32 %v3020_v40, %v2854_v0 }
 0x56c   :  { %v2858_v61 = vpop.f32.mrf.mxu0 }
 0x56d   :  { %v3025_v26 = vadd.f32 %v3024_v8, %v2858_v61 }
 0x56e   :  { %v2860_v30 = vpop.f32.mrf.mxu0 }
 0x56f   :  { %v3027_v45 = vadd.f32 %v3026_v2, %v2860_v30 }
 0x570   :  { %v2862_v29 = vpop.f32.mrf.mxu0 }
 0x572   :  { %v2863_v22 = vpop.f32.mrf.mxu0 }
 0x590   :  { %v3216_v54 = vpop.f32.mrf.mxu0 }
 0x591   :  { %v3233_v46 = vadd.f32 %v3216_v54, %v3015_v31 }
 0x592   :  { %v3218_v41 = vpop.f32.mrf.mxu0 }
 0x593   :  { %v3251_v62 = vadd.f32 %v3244_v14, %v3233_v46  ;;  %v3234_v35 = vadd.f32 %v3218_v41, %v3017_v63 }
 0x594   :  { %v3220_v1 = vpop.f32.mrf.mxu0 }
 0x595   :  { %v3257_v16 = vmax.f32 %v3251_v62, 0.0  ;;  %v3252_v7 = vadd.f32 %v3248_v38, %v3234_v35  ;;  %v3235_v39 = vadd.f32 %v3220_v1, %v3019_v53 }
 0x596   :  { %v3222_v19 = vpop.f32.mrf.mxu0 }
 0x597   :  { %v3258_v36 = vmax.f32 %v3252_v7, 0.0  ;;  %v3253_v10 = vadd.f32 %v3244_v14, %v3235_v39  ;;  %v3236_v33 = vadd.f32 %v3222_v19, %v3021_v48  ;;  %v3276_v23 = vmul.f32 %v3269_v5, %v3257_v16  ;;  %v5796_v48 = vld [vmem:[%s7675_s10 + $0x38] sm:$0xff]   ;;  %v5797_v39 = vld [vmem:[%s7675_s10 + $0x30] sm:$0xff]  }
 0x598   :  { %v3226_v49 = vpop.f32.mrf.mxu0 }
 0x599   :  { %v3259_v12 = vmax.f32 %v3253_v10, 0.0  ;;  %v3254_v27 = vadd.f32 %v3248_v38, %v3236_v33  ;;  %v3237_v51 = vadd.f32 %v3226_v49, %v3025_v26  ;;  %v3277_v57 = vmul.f32 %v3273_v43, %v3258_v36  ;;  %v5798_v36 = vld [vmem:[%s7675_s10 + $0x28] sm:$0xff]   ;;  %v5799_v10 = vld [vmem:[%s7675_s10 + $0x20] sm:$0xff]   ;;  %v5800_v33 = vld [vmem:[%s7675_s10 + $0x18] sm:$0xff]  }
 0x59a   :  { %v3228_v21 = vpop.f32.mrf.mxu0  ;;  %v3295_v60 = vadd.f32 %v3288_v6, %v3276_v23  ;;  %v5801_v26 = vld [vmem:[%s7675_s10 + $0x10] sm:$0xff]   ;;  %v5803_v49 = vld [vmem:[%s7675_s10] sm:$0xff]  }
 0x59b   :  { %v3278_v24 = vmul.f32 %v3269_v5, %v3259_v12  ;;  %v3260_v13 = vmax.f32 %v3254_v27, 0.0  ;;  %v3238_v59 = vadd.f32 %v3228_v21, %v3027_v45  ;;  %v3255_v28 = vadd.f32 %v3244_v14, %v3237_v51  ;;  %v5804_v45 = vld [vmem:[%s7675_s10 + $0x40] sm:$0xff]   ;;  %v5805_v23 = vld [vmem:[%s7677_s12 + $0x30] sm:$0xff]   ;;  %v5806_v12 = vld [vmem:[%s7677_s12 + $0x28] sm:$0xff]  }
 0x59c   :  { %v3230_v37 = vpop.f32.mrf.mxu0  ;;  %v3296_v58 = vadd.f32 %v3292_v47, %v3277_v57  ;;  %v5808_v27 = vld [vmem:[%s7677_s12 + $0x18] sm:$0xff]   ;;  %v5810_v51 = vld [vmem:[%s7677_s12 + $0x8] sm:$0xff]   ;;  %v5811_v21 = vld [vmem:[%s7677_s12] sm:$0xff]  }
 0x59d   :  { %v3297_v17 = vadd.f32 %v3288_v6, %v3278_v24  ;;  %v3279_v56 = vmul.f32 %v3273_v43, %v3260_v13  ;;  %v3256_v50 = vadd.f32 %v3248_v38, %v3238_v59  ;;  %v3261_v11 = vmax.f32 %v3255_v28, 0.0 }
 0x59e   :  { %v3231_v4 = vpop.f32.mrf.mxu0 }
 0x59f   :  { %v7363_v44 = vpack.c.bf16 %v3297_v17, %v3295_v60  ;;  %v3298_v40 = vadd.f32 %v3292_v47, %v3279_v56  ;;  %v3262_v8 = vmax.f32 %v3256_v50, 0.0  ;;  %v3280_v15 = vmul.f32 %v3269_v5, %v3261_v11 }
 0x5a1   :  { %v3302_v9 = vpack.c.bf16 %v3298_v40, %v3296_v58  ;;  %v3281_v2 = vmul.f32 %v3273_v43, %v3262_v8  ;;  %v3299_v18 = vadd.f32 %v3288_v6, %v3280_v15  ;;  %v3345_v34 = vshll.u32 %v7363_v44, 16  ;;  %v5802_v6 = vld [vmem:[%s7675_s10 + $0x8] sm:$0xff]  }
 0x5a2   :  { %v3612_v46 = vrot.slane %v7363_v44, 1  ;;  %v3343_v55 = vshrl.u32 %v7363_v44, 16 }
 0x5a3   :  { %v3300_v42 = vadd.f32 %v3292_v47, %v3281_v2  ;;  %v3357_v32 = vshll.u32 %v3302_v9, 16  ;;  %v3303_v0 = vpack.c.bf16 %v3299_v18, %v3299_v18  ;;  %v3347_v22 = vrot.slane %v3345_v34, 1  ;;  %v5809_v47 = vld [vmem:[%s7677_s12 + $0x10] sm:$0xff]   ;;  %v5143_v2 = vld [vmem:[%s7676_s11] ss:$0 sm:$0xff] }
 0x5a4   :  { %v3615_v31 = vrot.slane %v3302_v9, 1  ;;  %v3355_v54 = vshrl.u32 %v3302_v9, 16 }
 0x5a5   :  { %v3304_v61 = vpack.c.bf16 %v3300_v42, %v3300_v42  ;;  %v3359_v30 = vrot.slane %v3357_v32, 1  ;;  %v3613_v29 = vrot.slane %v3303_v0, 1  ;;  %v3350_v52 = vshll.u32 %v3303_v0, 16 }
 0x5a6   :  { %v3348_v1 = vor.u32 %v3347_v22, %v3343_v55  ;;  %v3366_v19 = vshrl.u32 %v3303_v0, 16  ;;  %v5144_v22 = vld [vmem:[%s7676_s11 + $0x1] ss:$0 sm:$0xff] }
 0x5a7   :  { %v3616_v14 = vrot.slane %v3304_v61, 1  ;;  %v3362_v63 = vshll.u32 %v3304_v61, 16  ;;  %v3352_v38 = vrot.slane %v3350_v52, 1  ;;  %v3360_v53 = vor.u32 %v3359_v30, %v3355_v54 }
 0x5a8   :  { %v3369_v35 = vshrl.u32 %v3304_v61, 16  ;;  %v3614_v5 = vsel %vm331_vm3, %v3612_v46, %v3613_v29 }
 0x5a9   :  { %v3617_v41 = vsel %vm331_vm3, %v3615_v31, %v3616_v14  ;;  %v3364_v62 = vrot.slane %v3362_v63, 1  ;;  %v3353_v7 = vsel %vm78_vm2, %v3348_v1, %v3352_v38  ;;  %v3368_v43 = vor.u32 %v3366_v19, %v3352_v38  ;;  %v5145_v38 = vld [vmem:[%s7676_s11 + $0x2] ss:$0 sm:$0xff] }
 0x5aa   :  { %5141 = vmatprep.mubr.msk.bf16.mxu0 %vm3428_vm11, %v3617_v41  ;;  %vm4607_vm3 = vcmask 74752  }
 0x5ab   :  { %3713 = vmatmul.mubr.bf16.vlgmr.msra.gmra.mxu0 %v3614_v5  ;;  %v3365_v16 = vsel %vm78_vm2, %v3360_v53, %v3364_v62  ;;  %v3371_v20 = vor.u32 %v3369_v35, %v3364_v62  ;;  %vm4530_vm2 = vcmask 97280  }
 0x5ac   :  { %5101 = vmatprep.mubr.msk.bf16.mxu1 %vm3428_vm11, %v3365_v16  ;;  %5142 = vmatprep.mubr.msk.bf16.mxu0 %vm3428_vm11, %v3616_v14 }
 0x5ad   :  { %3468 = vmatmul.mubr.bf16.vlgmr.msra.gmra.mxu1 %v3353_v7  ;;  %v5812_v7 = vld [vmem:[%s7679_s14 + $0x68] ss:$0 sps:$4 sm:$0x77]  }
 0x5ae   :  { %3542 = vmatpush1.bf16.msra.mxu1 %v5796_v48  ;;  %5102 = vmatprep.mubr.msk.bf16.mxu1 %vm3428_vm11, %v3371_v20 }
 0x5af   :  { %3543 = vmatprep.subr.bf16.mxu1 %v5873_v3 }
 0x5b2   :  { %3544 = vmatpush1.bf16.msra.mxu1 %v5797_v39 }
 0x5b3   :  { %3721 = vmatmul.mubr.bf16.gmra.mxu0 %v3613_v29  ;;  %3545 = vmatprep.subr.bf16.mxu1 %v5873_v3 }
 0x5b4   :  { %5339 = vmatprep.mubr.msk.bf16.mxu0 %vm5876_vm14, %v5875_v25 }
 0x5b5   :  { %3476 = vmatmul.mubr.bf16.gmra.mxu1 %v3368_v43  ;;  %v5813_v43 = vld [vmem:[%s7679_s14 + $0x44] ss:$0 sps:$4 sm:$0x77]  }
 0x5b6   :  { %3546 = vmatpush1.bf16.msra.mxu1 %v5798_v36  ;;  %5112 = vmatprep.mubr.msk.bf16.mxu1 %vm3428_vm11, %v3302_v9  ;;  %v4114_v36 = vsel %vm3953_vm13, %v5812_v7, 0  ;;  %v5840_v7 = vld [vmem:[%s7679_s14 + $0xd8] sm:$0xff]  }
 0x5b7   :  { %3547 = vmatprep.subr.bf16.mxu1 %v5873_v3 }
 0x5ba   :  { %3548 = vmatpush1.bf16.msra.mxu1 %v5799_v10  ;;  %v5814_v10 = vld [vmem:[%s7679_s14 + $0x60] sm:$0xff]  }
 0x5bb   :  { %3549 = vmatprep.subr.bf16.mxu1 %v5873_v3 }
 0x5be   :  { %3550 = vmatpush1.bf16.msra.mxu1 %v5800_v33  ;;  %v3955_v33 = vsel %vm3953_vm13, %v5813_v43, 0 }
 0x5bf   :  { %3551 = vmatprep.subr.bf16.mxu1 %v5873_v3  ;;  %5330 = vmatpush3.bf16.msra.mxu0 %v3955_v33  ;;  %v5842_v33 = vld [vmem:[%s7679_s14 + $0xd4] ss:$0 sps:$4 sm:$0x77]  }
 0x5c0   :  { %5331 = vmatprep.subr.bf16.mxu0 %v5875_v25 }
 0x5c2   :  { %3552 = vmatpush1.bf16.msra.mxu1 %v5801_v26  ;;  %v5815_v26 = vld [vmem:[%s7679_s14 + $0x3c] sm:$0xff]  }
 0x5c3   :  { %3553 = vmatprep.subr.bf16.mxu1 %v5873_v3  ;;  %5332 = vmatpush3.bf16.msra.mxu0 %v5815_v26 }
 0x5c4   :  { %5333 = vmatprep.subr.bf16.mxu0 %v5875_v25 }
 0x5c6   :  { %3554 = vmatpush1.bf16.msra.mxu1 %v5802_v6  ;;  %v5816_v6 = vld [vmem:[%s7679_s14 + $0x58] sm:$0xff]  }
 0x5c7   :  { %3555 = vmatprep.subr.bf16.mxu1 %v5873_v3 }
 0x5ca   :  { %3556 = vmatpush1.bf16.msra.mxu1 %v5803_v49  ;;  %v5817_v49 = vld [vmem:[%s7679_s14 + $0x34] sm:$0xff]  }
 0x5cb   :  { %3571 = vmatprep.subr.bf16.mxu1 %v5873_v3  ;;  %v5807_v3 = vld [vmem:[%s7677_s12 + $0x20] sm:$0xff]   ;;  %5334 = vmatpush3.bf16.msra.mxu0 %v5817_v49  ;;  %v4386_v49 = vsel %vm3953_vm13, %v5842_v33, 0 }
 0x5cc   :  { %5335 = vmatprep.subr.bf16.mxu0 %v5875_v25 }
 0x5ce   :  { %3572 = vmatpush2.bf16.msra.mxu1 %v5804_v45  ;;  %v5818_v45 = vld [vmem:[%s7679_s14 + $0x50] sm:$0xff]  }
 0x5cf   :  { %5311 = vmatprep.subr.bf16.mxu1 %v5805_v23 }
 0x5d1   :  { %3574 = vmatmul.mubr.bf16.vlgmr.msra.gmra.mxu1 %v7363_v44 }
 0x5d2   :  { %5113 = vmatprep.mubr.msk.bf16.mxu1 %vm3428_vm11, %v3304_v61  ;;  %5312 = vmatpush3.bf16.msra.mxu1 %v5805_v23  ;;  %v5819_v23 = vld [vmem:[%s7679_s14 + $0x2c] sm:$0xff]  }
 0x5d3   :  { %5313 = vmatprep.subr.bf16.mxu1 %v5806_v12  ;;  %5336 = vmatpush3.bf16.msra.mxu0 %v5819_v23  ;;  %v5844_v23 = vld [vmem:[%s7679_s14 + $0xc4] sm:$0xff]  }
 0x5d4   :  { %5337 = vmatprep.subr.bf16.mxu0 %v5875_v25 }
 0x5d6   :  { %5314 = vmatpush3.bf16.msra.mxu1 %v5806_v12  ;;  %v5820_v12 = vld [vmem:[%s7679_s14 + $0x48] sm:$0xff]  }
 0x5d7   :  { %5315 = vmatprep.subr.bf16.mxu1 %v5807_v3 }
 0x5d9   :  { %3582 = vmatmul.mubr.bf16.gmra.mxu1 %v3303_v0 }
 0x5da   :  { %5316 = vmatpush3.bf16.msra.mxu1 %v5807_v3  ;;  %v5821_v3 = vld [vmem:[%s7679_s14 + $0x24] sm:$0xff]  }
 0x5db   :  { %5317 = vmatprep.subr.bf16.mxu1 %v5808_v27  ;;  %5338 = vmatpush3.bf16.msra.mxu0 %v5821_v3 }
 0x5dc   :  { %5343 = vmatprep.subr.bf16.mxu0 %v5875_v25 }
 0x5de   :  { %5318 = vmatpush3.bf16.msra.mxu1 %v5808_v27 }
 0x5df   :  { %5319 = vmatprep.subr.bf16.mxu1 %v5809_v47 }
 0x5e2   :  { %5320 = vmatpush3.bf16.msra.mxu1 %v5809_v47  ;;  %v5146_v47 = vld [vmem:[%s7678_s13] ss:$0 sm:$0xff] }
 0x5e3   :  { %5321 = vmatprep.subr.bf16.mxu1 %v5810_v51 }
 0x5e6   :  { %5322 = vmatpush3.bf16.msra.mxu1 %v5810_v51 }
 0x5e7   :  { %5323 = vmatprep.subr.bf16.mxu1 %v5811_v21 }
 0x5ea   :  { %5324 = vmatpush3.bf16.msra.mxu1 %v5811_v21 }
 0x5eb   :  { %5357 = vmatprep.subr.bf16.mxu1 %v5875_v25 }
 0x66b   :  { %v3714_v57 = vpop.f32.mrf.mxu0 }
 0x66d   :  { %v3469_v24 = vpop.f32.mrf.mxu1  ;;  %v3716_v13 = vpop.f32.mrf.mxu0 }
 0x66f   :  { %v3471_v59 = vpop.f32.mrf.mxu1  ;;  %v3717_v28 = vpop.f32.mrf.mxu0 }
 0x671   :  { %v3472_v37 = vpop.f32.mrf.mxu1  ;;  %v3719_v60 = vpop.f32.mrf.mxu0 }
 0x673   :  { %v3474_v17 = vpop.f32.mrf.mxu1  ;;  %v3722_v56 = vpop.f32.mrf.mxu0 }
 0x675   :  { %v3477_v50 = vpop.f32.mrf.mxu1  ;;  %v3724_v11 = vpop.f32.mrf.mxu0 }
 0x677   :  { %v3479_v4 = vpop.f32.mrf.mxu1  ;;  %v3725_v58 = vpop.f32.mrf.mxu0 }
 0x678   :  { %v5822_v4 = vld [vmem:[%s7679_s14 + $0xb0] ss:$0 sps:$4 sm:$0x77]  }
 0x679   :  { %v3480_v44 = vpop.f32.mrf.mxu1  ;;  %v3726_v40 = vpop.f32.mrf.mxu0 }
 0x67a   :  { %v4290_v40 = vsel %vm3953_vm13, %v5822_v4, 0 }
 0x67b   :  { %v3481_v8 = vpop.f32.mrf.mxu1 }
 0x691   :  { %v3575_v15 = vpop.f32.mrf.mxu1 }
 0x692   :  { %v3576_v9 = vadd.f32 %v3575_v15, %v3469_v24  ;;  %v5823_v15 = vld [vmem:[%s7679_s14 + $0x20] ss:$0 sps:$4 sm:$0x77]  }
 0x693   :  { %v3577_v18 = vpop.f32.mrf.mxu1 }
 0x694   :  { %v3728_v34 = vadd.f32 %v3714_v57, %v3576_v9  ;;  %v5824_v18 = vld [vmem:[%s7679_s14 + $0xa8] sm:$0xff]  }
 0x695   :  { %v3578_v42 = vpop.f32.mrf.mxu1 }
 0x696   :  { %v3736_v32 = vadd.f32 %v5143_v2, %v3728_v34  ;;  %v3579_v0 = vadd.f32 %v3578_v42, %v3472_v37  ;;  %v4028_v42 = vsel %vm3953_vm13, %v5823_v15, 0 }
 0x697   :  { %v3580_v61 = vpop.f32.mrf.mxu1 }
 0x698   :  { %v3739_v30 = vmax.f32 %v3736_v32, 0.0  ;;  %v3729_v29 = vadd.f32 %v3717_v28, %v3579_v0  ;;  %v7497_v28 = vld [vmem:[%s7678_s13 + $0x1] ss:$0 sm:$0xff]  ;;  %v5825_v32 = vld [vmem:[%s7679_s14 + $0x18] sm:$0xff]   ;;  %v5827_v61 = vld [vmem:[%s7679_s14 + $0x10] sm:$0xff]  }
 0x699   :  { %v3583_v52 = vpop.f32.mrf.mxu1  ;;  %v5826_v0 = vld [vmem:[%s7679_s14 + $0xa0] sm:$0xff]  }
 0x69a   :  { %v3737_v31 = vadd.f32 %v5143_v2, %v3729_v29  ;;  %v3584_v14 = vadd.f32 %v3583_v52, %v3477_v50  ;;  %v3747_v63 = vmul.f32 %v5144_v22, %v3739_v30  ;;  %v5828_v30 = vld [vmem:[%s7679_s14 + $0x98] sm:$0xff]   ;;  %v5829_v29 = vld [vmem:[%s7679_s14 + $0x8] sm:$0xff]  }
 0x69b   :  { %v3585_v54 = vpop.f32.mrf.mxu1  ;;  %v5832_v52 = vld [vmem:[%s7679_s14 + $0xf8] ss:$0 sps:$4 sm:$0x77]  }
 0x69c   :  { %v3740_v46 = vmax.f32 %v3737_v31, 0.0  ;;  %v3730_v55 = vadd.f32 %v3722_v56, %v3584_v14  ;;  %v3755_v5 = vadd.f32 %v5145_v38, %v3747_v63  ;;  %v7504_v56 = vld [vmem:[%s7678_s13 + $0x2] ss:$0 sm:$0xff]  ;;  %v4477_v63 = vsel %vm3953_vm13, %v5832_v52, 0 }
 0x69d   :  { %v3586_v41 = vpop.f32.mrf.mxu1  ;;  %v5831_v14 = vld [vmem:[%s7679_s14] sm:$0xff]  }
 0x69e   :  { %v3748_v53 = vmul.f32 %v5144_v22, %v3740_v46  ;;  %v3738_v62 = vadd.f32 %v5143_v2, %v3730_v55  ;;  %v5833_v46 = vld [vmem:[%s7679_s14 + $0x8c] ss:$0 sps:$4 sm:$0x77]  }
 0x69f   :  { %v3587_v35 = vpop.f32.mrf.mxu1  ;;  %v4203_v41 = vsel %vm3953_vm13, %v5833_v46, 0 }
 0x6a0   :  { %v3756_v1 = vadd.f32 %v5145_v38, %v3748_v53  ;;  %v3741_v48 = vmax.f32 %v3738_v62, 0.0  ;;  %v5835_v62 = vld [vmem:[%s7679_s14 + $0x84] sm:$0xff]  }
 0x6a1   :  { %v5836_v35 = vld [vmem:[%s7679_s14 + $0xe8] sm:$0xff]  }
 0x6a2   :  { %v3749_v16 = vmul.f32 %v5144_v22, %v3741_v48  ;;  %v3758_v20 = vpack.c.bf16 %v3756_v1, %v3755_v5  ;;  %v5830_v22 = vld [vmem:[%s7679_s14 + $0x90] sm:$0xff]   ;;  %v5837_v1 = vld [vmem:[%s7679_s14 + $0x7c] sm:$0xff]  }
 0x6a3   :  { %v5838_v48 = vld [vmem:[%s7679_s14 + $0xe0] sm:$0xff]  }
 0x6a4   :  { %v3757_v39 = vadd.f32 %v5145_v38, %v3749_v16  ;;  %5325 = vmatprep.mubr.msk.bf16.mxu1 %vm3821_vm12, %v3758_v20  ;;  %v5834_v38 = vld [vmem:[%s7679_s14 + $0xf0] sm:$0xff]  }
 0x6a5   :  { %v5839_v20 = vld [vmem:[%s7679_s14 + $0x74] sm:$0xff]  }
 0x6a6   :  { %v3759_v19 = vpack.c.bf16 %v3757_v39, %v3757_v39 }
 0x6a8   :  { %5326 = vmatmul.mubr.msk.bf16.vlgmr.msra.gmra.mxu1 %vm3821_vm12, %v3759_v19 }
 0x6a9   :  { %5358 = vmatpush3.bf16.msra.mxu1 %v4114_v36  ;;  %5367 = vmatprep.mubr.msk.bf16.mxu1 %vm5876_vm14, %v5875_v25  ;;  %v5841_v36 = vld [vmem:[%s7679_s14 + $0x6c] sm:$0xff]  }
 0x6aa   :  { %5359 = vmatprep.subr.bf16.mxu1 %v5875_v25 }
 0x6ad   :  { %5360 = vmatpush3.bf16.msra.mxu1 %v5814_v10 }
 0x6ae   :  { %5361 = vmatprep.subr.bf16.mxu1 %v5875_v25 }
 0x6b1   :  { %5362 = vmatpush3.bf16.msra.mxu1 %v5816_v6 }
 0x6b2   :  { %5363 = vmatprep.subr.bf16.mxu1 %v5875_v25 }
 0x6b5   :  { %5364 = vmatpush3.bf16.msra.mxu1 %v5818_v45  ;;  %v5843_v45 = vld [vmem:[%s7679_s14 + $0xcc] sm:$0xff]  }
 0x6b6   :  { %5365 = vmatprep.subr.bf16.mxu1 %v5875_v25 }
 0x6b9   :  { %5366 = vmatpush3.bf16.msra.mxu1 %v5820_v12  ;;  %v5845_v12 = vld [vmem:[%s7679_s14 + $0xbc] sm:$0xff]  }
 0x6ba   :  { %5385 = vmatprep.subr.bf16.mxu1 %v5875_v25 }
 0x768   :  { %v5327_v27 = vpop.f32.mrf.mxu1 }
 0x769   :  { %v3871_v31 = vadd.f32 %v5327_v27, %v5146_v47 }
 0x76a   :  { %v3862_v51 = vpop.f32.mrf.mxu1 }
 0x76b   :  { %v3863_v21 = vadd.f32 %v5146_v47, %v3862_v51  ;;  %v3878_v55 = vmax.f32 %v3871_v31, 0.0  ;;  %v5846_v51 = vld [vmem:[%s7679_s14 + $0xb4] sm:$0xff]  }
 0x76c   :  { %v5328_v57 = vpop.f32.mrf.mxu1 }
 0x76d   :  { %v3876_v24 = vmax.f32 %v3863_v21, 0.0  ;;  %v3886_v53 = vmul.f32 %v7497_v28, %v3878_v55 }
 0x76e   :  { %v3865_v13 = vpop.f32.mrf.mxu1 }
 0x76f   :  { %v3866_v59 = vadd.f32 %v5146_v47, %v3865_v13  ;;  %v3884_v37 = vmul.f32 %v7497_v28, %v3876_v24  ;;  %v3894_v5 = vadd.f32 %v7504_v56, %v3886_v53 }
 0x771   :  { %v3877_v60 = vmax.f32 %v3866_v59, 0.0  ;;  %v3892_v50 = vadd.f32 %v7504_v56, %v3884_v37  ;;  %v4335_v16 = vpack.c.bf16 %v3894_v5, %v3894_v5 }
 0x773   :  { %v3885_v17 = vmul.f32 %v7497_v28, %v3877_v60  ;;  %v4444_v19 = vrot.slane %v4335_v16, 3  ;;  %v4351_v47 = vshll.u32 %v4335_v16, 16  ;;  %v5254_v16 = vld [vmem:[%s7680_s15] ss:$0 sm:$0xff] }
 0x775   :  { %v3893_v11 = vadd.f32 %v7504_v56, %v3885_v17  ;;  %v4353_v57 = vrot.slane %v4351_v47, 3 }
 0x777   :  { %v7511_v58 = vpack.c.bf16 %v3893_v11, %v3892_v50 }
 0x779   :  { %v4082_v44 = vrot.slane %v7511_v58, 1  ;;  %v7516_v8 = vshll.u32 %v7511_v58, 16  ;;  %v7523_v9 = vshrl.u32 %v7511_v58, 16  ;;  %v4258_v54 = vrot.slane %v7511_v58, 2 }
 0x77a   :  { %v4443_v39 = vrot.slane %v7511_v58, 3 }
 0x77b   :  { %5368 = vmatmul.mubr.msk.bf16.vlgmr.msra.gmra.mxu1 %vm3949_vm15, %v4082_v44  ;;  %v3920_v2 = vrot.slane %v7516_v8, 1  ;;  %v4169_v43 = vrot.slane %v7523_v9, 1  ;;  %v4170_v10 = vrot.slane %v7516_v8, 2  ;;  %v4347_v3 = vrot.slane %v7523_v9, 2 }
 0x77c   :  { %5386 = vmatpush3.bf16.msra.mxu1 %v4290_v40  ;;  %5395 = vmatprep.mubr.msk.bf16.mxu1 %vm5876_vm14, %v5875_v25  ;;  %v4445_v26 = vsel %vm4442_vm0, %v4443_v39, %v4444_v19  ;;  %v4348_v27 = vrot.slane %v7516_v8, 3 }
 0x77d   :  { %5387 = vmatprep.subr.bf16.mxu1 %v5875_v25  ;;  %v3921_v34 = vor.u32 %v3920_v2, %v7523_v9  ;;  %v4171_v6 = vor.u32 %v4170_v10, %v4169_v43 }
 0x77e   :  { %v4349_v21 = vor.u32 %v4348_v27, %v4347_v3 }
 0x77f   :  { %5340 = vmatmul.mubr.msk.bf16.vlgmr.msra.gmra.mxu0 %vm3949_vm15, %v3921_v34 }
 0x780   :  { %5344 = vmatpush3.bf16.msra.mxu0 %v4028_v42  ;;  %5388 = vmatpush3.bf16.msra.mxu1 %v5824_v18  ;;  %v4354_v24 = vsel %vm4346_vm1, %v4349_v21, %v4353_v57 }
 0x781   :  { %5345 = vmatprep.subr.bf16.mxu0 %v5875_v25  ;;  %5389 = vmatprep.subr.bf16.mxu1 %v5875_v25 }
 0x782   :  { %5353 = vmatprep.mubr.msk.bf16.mxu0 %vm5876_vm14, %v5875_v25 }
 0x784   :  { %5346 = vmatpush3.bf16.msra.mxu0 %v5825_v32  ;;  %5390 = vmatpush3.bf16.msra.mxu1 %v5826_v0 }
 0x785   :  { %5347 = vmatprep.subr.bf16.mxu0 %v5875_v25  ;;  %5391 = vmatprep.subr.bf16.mxu1 %v5875_v25 }
 0x788   :  { %5348 = vmatpush3.bf16.msra.mxu0 %v5827_v61  ;;  %5392 = vmatpush3.bf16.msra.mxu1 %v5828_v30 }
 0x789   :  { %5349 = vmatprep.subr.bf16.mxu0 %v5875_v25  ;;  %5393 = vmatprep.subr.bf16.mxu1 %v5875_v25 }
 0x78c   :  { %5350 = vmatpush3.bf16.msra.mxu0 %v5829_v29  ;;  %5394 = vmatpush3.bf16.msra.mxu1 %v5830_v22 }
 0x78d   :  { %5351 = vmatprep.subr.bf16.mxu0 %v5875_v25  ;;  %5413 = vmatprep.subr.bf16.mxu1 %v5875_v25 }
 0x78f   :  { %5396 = vmatmul.mubr.msk.bf16.vlgmr.msra.gmra.mxu1 %vm3949_vm15, %v4258_v54 }
 0x790   :  { %5352 = vmatpush3.bf16.msra.mxu0 %v5831_v14  ;;  %5414 = vmatpush3.bf16.msra.mxu1 %v4477_v63 }
 0x791   :  { %5371 = vmatprep.subr.bf16.mxu0 %v5875_v25  ;;  %5415 = vmatprep.subr.bf16.mxu1 %v5875_v25 }
 0x792   :  { %5423 = vmatprep.mubr.msk.bf16.mxu1 %vm5876_vm14, %v5875_v25 }
 0x793   :  { %5354 = vmatmul.mubr.msk.bf16.vlgmr.msra.gmra.mxu0 %vm3949_vm15, %v7511_v58 }
 0x794   :  { %5372 = vmatpush3.bf16.msra.mxu0 %v4203_v41  ;;  %5416 = vmatpush3.bf16.msra.mxu1 %v5834_v38 }
 0x795   :  { %5373 = vmatprep.subr.bf16.mxu0 %v5875_v25  ;;  %5417 = vmatprep.subr.bf16.mxu1 %v5875_v25 }
 0x796   :  { %5381 = vmatprep.mubr.msk.bf16.mxu0 %vm5876_vm14, %v5875_v25 }
 0x798   :  { %5374 = vmatpush3.bf16.msra.mxu0 %v5835_v62  ;;  %5418 = vmatpush3.bf16.msra.mxu1 %v5836_v35 }
 0x799   :  { %5375 = vmatprep.subr.bf16.mxu0 %v5875_v25  ;;  %5419 = vmatprep.subr.bf16.mxu1 %v5875_v25 }
 0x79c   :  { %5376 = vmatpush3.bf16.msra.mxu0 %v5837_v1  ;;  %5420 = vmatpush3.bf16.msra.mxu1 %v5838_v48  ;;  %v4522_v48 = vld [vmem:[%s7681_s16] sm:$0x3]  ;;  %s5877_s16 = smov [#allocation2]  }
 0x79d   :  { %5377 = vmatprep.subr.bf16.mxu0 %v5875_v25  ;;  %5421 = vmatprep.subr.bf16.mxu1 %v5875_v25  ;;  %s4627_s15 = sshll.u32 %s5877_s16, 4  ;;  %s4628_s15 = int_to_ptr.vmem [resolvable:$true] %s4627_s15 }
 0x79e   :  { %s5851_s24 = scalar_lea.vmem %s4628_s15, 32  ;;  %p5856_p1 = scmp.lt.s32.totalorder %s4628_s15, %s4628_s15 }
 0x79f   :  { %p5852_p0 = scmp.ne.s32.totalorder %s4628_s15, %s5851_s24  ;;  %p5857_p2 = scmp.lt.s32.totalorder %s5851_s24, %s5851_s24 }
 0x7a0   :  { %5378 = vmatpush3.bf16.msra.mxu0 %v5839_v20  ;;  %5422 = vmatpush3.bf16.msra.mxu1 %v5840_v7 }
 0x7a1   :  { %5379 = vmatprep.subr.bf16.mxu0 %v5875_v25  ;;  %p5858_p3 = por %p5857_p2, %p5856_p1 }
 0x7a3   :  { %5424 = vmatmul.mubr.msk.bf16.vlgmr.msra.gmra.mxu1 %vm3949_vm15, %v4445_v26  ;;  %p5859_p4 = pnand %p5858_p3, %p5852_p0 }
 0x7a4   :  { %5380 = vmatpush3.bf16.msra.mxu0 %v5841_v36 }
 0x7a5   :  { %5399 = vmatprep.subr.bf16.mxu0 %v5875_v25 }
 0x7a7   :  { %5382 = vmatmul.mubr.msk.bf16.vlgmr.msra.gmra.mxu0 %vm3949_vm15, %v4171_v6 }
 0x7a8   :  { %5400 = vmatpush3.bf16.msra.mxu0 %v4386_v49  ;;  %5409 = vmatprep.mubr.msk.bf16.mxu0 %vm5876_vm14, %v5875_v25 }
 0x7a9   :  { %5401 = vmatprep.subr.bf16.mxu0 %v5875_v25 }
 0x7ac   :  { %5402 = vmatpush3.bf16.msra.mxu0 %v5843_v45 }
 0x7ad   :  { %5403 = vmatprep.subr.bf16.mxu0 %v5875_v25 }
 0x7b0   :  { %5404 = vmatpush3.bf16.msra.mxu0 %v5844_v23 }
 0x7b1   :  { %5405 = vmatprep.subr.bf16.mxu0 %v5875_v25 }
 0x7b4   :  { %5406 = vmatpush3.bf16.msra.mxu0 %v5845_v12 }
 0x7b5   :  { %5407 = vmatprep.subr.bf16.mxu0 %v5875_v25 }
 0x7b8   :  { %5408 = vmatpush3.bf16.msra.mxu0 %v5846_v51 }
 0x7b9   :  { %5427 = vmatprep.subr.mxu0 %v5875_v25 }
 0x7bb   :  { %5410 = vmatmul.mubr.msk.bf16.vlgmr.msra.gmra.mxu0 %vm3949_vm15, %v4354_v24 }
 0x7bc   :  { %5431 = vmatprep.mubr.msk.f32.mxu0 %vm5876_vm14, %v5875_v25 }
 0x83b   :  { %v4150_v13 = vpop.f32.mrf.mxu1 }
 0x83d   :  { %v5369_v59 = vpop.f32.mrf.mxu1 }
 0x83f   :  { %v3991_v28 = vpop.f32.mrf.mxu0  ;;  %v4153_v37 = vpop.f32.mrf.mxu1 }
 0x841   :  { %v5341_v60 = vpop.f32.mrf.mxu0  ;;  %v5370_v17 = vpop.f32.mrf.mxu1 }
 0x843   :  { %v3994_v56 = vpop.f32.mrf.mxu0 }
 0x845   :  { %v5342_v50 = vpop.f32.mrf.mxu0 }
 0x84f   :  { %v4326_v11 = vpop.f32.mrf.mxu1 }
 0x851   :  { %v5397_v4 = vpop.f32.mrf.mxu1 }
 0x853   :  { %v4064_v58 = vpop.f32.mrf.mxu0  ;;  %v4329_v44 = vpop.f32.mrf.mxu1 }
 0x854   :  { %v4065_v29 = vadd.f32 %v4064_v58, %v3991_v28 }
 0x855   :  { %v5355_v40 = vpop.f32.mrf.mxu0  ;;  %v5398_v8 = vpop.f32.mrf.mxu1 }
 0x856   :  { %v4157_v52 = vadd.f32 %v4150_v13, %v4065_v29 }
 0x857   :  { %v4067_v15 = vpop.f32.mrf.mxu0 }
 0x858   :  { %v4068_v22 = vadd.f32 %v4067_v15, %v3994_v56 }
 0x859   :  { %v5356_v9 = vpop.f32.mrf.mxu0 }
 0x85a   :  { %v4158_v31 = vadd.f32 %v4153_v37, %v4068_v22 }
 0x863   :  { %v4513_v2 = vpop.f32.mrf.mxu1 }
 0x865   :  { %v5425_v18 = vpop.f32.mrf.mxu1 }
 0x867   :  { %v4239_v34 = vpop.f32.mrf.mxu0  ;;  %v4516_v42 = vpop.f32.mrf.mxu1 }
 0x868   :  { %v4246_v14 = vadd.f32 %v4239_v34, %v4157_v52 }
 0x869   :  { %v5383_v32 = vpop.f32.mrf.mxu0  ;;  %v5426_v0 = vpop.f32.mrf.mxu1 }
 0x86a   :  { %v4333_v55 = vadd.f32 %v4326_v11, %v4246_v14 }
 0x86b   :  { %v4242_v61 = vpop.f32.mrf.mxu0 }
 0x86c   :  { %v4247_v54 = vadd.f32 %v4242_v61, %v4158_v31 }
 0x86d   :  { %v5384_v30 = vpop.f32.mrf.mxu0 }
 0x86e   :  { %v4334_v38 = vadd.f32 %v4329_v44, %v4247_v54 }
 0x87b   :  { %v4422_v63 = vpop.f32.mrf.mxu0 }
 0x87c   :  { %v4429_v53 = vadd.f32 %v4422_v63, %v4333_v55 }
 0x87d   :  { %v5411_v46 = vpop.f32.mrf.mxu0 }
 0x87e   :  { %v4520_v1 = vadd.f32 %v4513_v2, %v4429_v53 }
 0x87f   :  { %v4425_v41 = vpop.f32.mrf.mxu0 }
 0x880   :  { %v4430_v62 = vadd.f32 %v4425_v41, %v4334_v38 }
 0x881   :  { %v5412_v35 = vpop.f32.mrf.mxu0 }
 0x882   :  { %v4521_v5 = vadd.f32 %v4516_v42, %v4430_v62 }
 0x884   :  { %5428 = vmatpush3.msk.msra.mxu0 %vm2807_vm9, %v4521_v5 }
 0x885   :  { %5429 = vmatprep.subr.mxu0 %v5875_v25 }
 0x886   :  { %5430 = vmatpush3.msra.mxu0 %v4520_v1 }
 0x887   :  { %5432 = vmatmul.mubr.msk.f32.vlgmr.msra.gmra.mxu0 %vm4530_vm2, %v4522_v48 }
 0x947   :  { %v4603_v20 = vpop.f32.mrf.mxu0 }
 0x948   :  { %v4604_v7 = vadd.f32 %v5254_v16, %v4603_v20 }
 0x949   :  { %v5433_v39 = vpop.f32.mrf.mxu0 }
 0x94a   :  { %v4608_v19 = vsel %vm4607_vm3, %v4604_v7, -inf }
 0x94b   :  { %4609 = vmax.xlane.f32.xlu0 %v4608_v19 }
 0x9d4   :  { %v4610_v36 = vpop.xlane.xlu0 %4609 }
 0x9d5   :  { %v4611_v43 = vsub.f32 %v4604_v7, %v4610_v36 }
 0x9d7   :  { %v4612_v10 = vmul.f32 1.442695, %v4611_v43 }
 0x9d9   :  { %5847 = vpow2.f32 %v4612_v10 }
 0x9e6   :  { %v5848_v33 = vpop.eup %5847 }
 0x9e7   :  { %v4614_v25 = vsel %vm4607_vm3, %v5848_v33, 0.0 }
 0x9e8   :  { %4615 = vadd.xlane.f32.xlu1 %v4614_v25 }
 0xa71   :  { %v4616_v26 = vpop.xlane.xlu1 %4615 }
 0xa72   :  { %5849 = vlog2.f32 %v4616_v26 }
 0xa7f   :  { %v5850_v6 = vpop.eup %5849 }
 0xa80   :  { %v4618_v49 = vmul.f32 0.6931472, %v5850_v6 }
 0xa82   :  { %v4619_v45 = vsub.f32 %v4611_v43, %v4618_v49 }
 0xa84   :  { %4620 = vst.msk [vmem:[#allocation2] sm:$0x3] %vm4607_vm3, %v4619_v45 }
 0xa85   :  { %5862 = shalt.err (!%p5859_p4)
}
 0xa86   :  { %4630 = dma.vmem_to_hbm [thread:$0]  %s4628_s15, 32, %s7682_s17, [#allocation3]  }
 0xa87   :  { %5871 = dma.done.wait [#allocation3], 32  }
 0xa88   :  { %5872 = vsyncadd [#allocation3], 4294967264 }
 0xa89   :  { %4634 = vsyncpa [#allocation3], 1 }

</bundles_post_ra>
